<compile_context>
chip_gen: v7x
topology: tpu7x:2x2x1
jax: 0.10.0
libtpu: 0.0.40
codegen_flags: <defaults>
</compile_context>

<pallas_src>
import math

import jax
import jax.numpy as jnp
from jax.experimental import pallas as pl
from jax.experimental.pallas import tpu as pltpu


# Matmul operand dtype fed to the MXU. float32 keeps full fidelity with the PyTorch reference;
# set to jnp.bfloat16 on v6e/v7x to run the MXU at full rate (accumulation stays f32 via
# preferred_element_type either way).
MXU_DTYPE = jnp.float32


# ----------------------------- fused Pallas kernel ------------------------------

def _make_critic_kernel(c1, c2, m2, bp, n_taps, eps, mxu_dtype):
    """Fused block1+block2+block3 forward. All activations stay VMEM-resident."""

    def mm(a, b):
        return jnp.dot(a.astype(mxu_dtype), b.astype(mxu_dtype),
                       preferred_element_type=jnp.float32)

    def leaky(x):
        return jnp.where(x >= 0.0, x, 0.2 * x)

    def kernel(pdup_ref, pfull_ref, w1_ref, w2_ref, w3img_ref, sel_ref, pv_ref, o_ref):
        w1 = w1_ref[...]
        pv = pv_ref[...]

        # ---- block1 BatchNorm statistics over the true N*H1*W1 positions (bias dropped:
        #      it is cancelled exactly by the mean subtraction) ----
        s_full = mm(pfull_ref[...], w1)                                   # (Mfull, C1)
        mean1 = jnp.mean(s_full, axis=0, keepdims=True)
        var1 = jnp.maximum(
            jnp.mean(s_full * s_full, axis=0, keepdims=True) - mean1 * mean1, 0.0)
        g1 = pv[:, 0:c1]
        be1 = pv[:, c1:2 * c1]
        scale1 = g1 * jax.lax.rsqrt(var1 + eps)
        shift1 = be1 - mean1 * scale1

        # ---- block1 values, already laid out as block2 patches (grouped by block2 tap) ----
        a1 = mm(pdup_ref[...], w1)                                        # (n_taps*bp, C1)
        a1 = leaky(a1 * scale1 + shift1)

        # ---- block2 conv: sum of per-tap GEMMs over contiguous 8-aligned row blocks ----
        w2 = w2_ref[...]                                                  # (n_taps*C1, C2)
        s2 = None
        for t in range(n_taps):
            blk = a1[t * bp:t * bp + m2, :]                               # (M2, C1)
            wt = w2[t * c1:(t + 1) * c1, :]                               # (C1, C2)
            part = mm(blk, wt)
            s2 = part if s2 is None else s2 + part                        # (M2, C2)

        mean2 = jnp.mean(s2, axis=0, keepdims=True)
        var2 = jnp.maximum(
            jnp.mean(s2 * s2, axis=0, keepdims=True) - mean2 * mean2, 0.0)
        g2 = pv[:, 2 * c1:2 * c1 + c2]
        be2 = pv[:, 2 * c1 + c2:2 * c1 + 2 * c2]
        scale2 = g2 * jax.lax.rsqrt(var2 + eps)
        shift2 = be2 - mean2 * scale2
        a2 = leaky(s2 * scale2 + shift2)                                  # (M2, C2)

        # ---- block3 (final conv, 1x1 spatial output, bias kept) ----
        # out[n] = sum_{r,c} sel[n,r] * a2[r,c] * w3img[r,c] + b3
        z = mm(sel_ref[...], a2 * w3img_ref[...])                         # (N, C2)
        b3 = pv[:, 2 * c1 + 2 * c2:2 * c1 + 2 * c2 + 1]                   # (1, 1)
        o_ref[...] = (jnp.sum(z, axis=1, keepdims=True) + b3).astype(o_ref.dtype)

    return kernel


# ------------------------------ forward wrapper -------------------------------

def critic_forward(image_nchw, params):
    (w1, _b1, g1, be1) = params[0]        # conv1 bias unused: cancelled by BatchNorm
    (w2, _b2, g2, be2) = params[1]
    (w3, b3, _, _) = params[2]

    N, Cin, H, W = image_nchw.shape
    K, S = 4, 2
    C1, C2, C3 = w1.shape[0], w2.shape[0], w3.shape[0]
    H1, W1s = (H - K) // S + 1, (W - K) // S + 1
    H2, W2s = (H1 - K) // S + 1, (W1s - K) // S + 1
    H3, W3s = (H2 - K) // S + 1, (W2s - K) // S + 1
    assert C3 == 1 and H3 == 1 and W3s == 1, "fused kernel assumes a final 1x1 spatial output"

    F1 = Cin * K * K
    n_taps = K * K
    Mfull = N * H1 * W1s
    M2 = H2 * W2s * N
    BP = -(-M2 // 8) * 8                  # pad each tap's row block to a multiple of 8 sublanes

    x = image_nchw.astype(jnp.float32)

    # ---- im2col of the INPUT image only (everything downstream stays inside the kernel) ----
    # P[n, h1, w1, f] with feature order f = (kh, kw, ci)
    cols = [x[:, :, kh:kh + S * H1:S, kw:kw + S * W1s:S]
            for kh in range(K) for kw in range(K)]                      # each (N, Cin, H1, W1)
    P = jnp.stack(cols, axis=-1)                                        # (N, Cin, H1, W1, K*K)
    P = P.transpose(0, 2, 3, 4, 1).reshape(N, H1, W1s, F1)

    patches_full = P.reshape(Mfull, F1)                                 # rows (n, h1, w1)

    # block1 patches evaluated at exactly the positions block2 needs, grouped by block2 tap
    taps = [P[:, kh:kh + S * H2:S, kw:kw + S * W2s:S, :]
            for kh in range(K) for kw in range(K)]                      # each (N, H2, W2, F1)
    D = jnp.stack(taps, axis=0)                                         # (n_taps, N, H2, W2, F1)
    D = D.transpose(0, 2, 3, 1, 4).reshape(n_taps, M2, F1)              # rows (ho2, wo2, n)
    D = jnp.pad(D, ((0, 0), (0, BP - M2), (0, 0)))
    patches_dup = D.reshape(n_taps * BP, F1)

    # ---- static weight re-layouts (feature order (kh, kw, ci) everywhere) ----
    w1m = w1.transpose(2, 3, 1, 0).reshape(F1, C1).astype(jnp.float32)
    w2m = w2.transpose(2, 3, 1, 0).reshape(n_taps * C1, C2).astype(jnp.float32)

    # block3 weight spread over the (ho2, wo2, n) rows of the block2 activation
    w3sp = jnp.zeros((H2, W2s, C2), jnp.float32)
    w3sp = w3sp.at[:K, :K, :].set(jnp.transpose(w3[0].astype(jnp.float32), (1, 2, 0)))
    w3img = jnp.broadcast_to(w3sp.reshape(H2 * W2s, 1, C2), (H2 * W2s, N, C2)).reshape(M2, C2)

    # constant parity-selection matrix: out[n] = sum over rows r with r % N == n
    sel = (jnp.arange(M2)[None, :] % N == jnp.arange(N)[:, None]).astype(jnp.float32)

    # packed BN affine params + final bias, padded to a lane-aligned width
    plen = -(-(2 * C1 + 2 * C2 + 1) // 128) * 128
    pvec = jnp.zeros((1, plen), jnp.float32)
    pvec = pvec.at[0, 0:C1].set(g1.astype(jnp.float32))
    pvec = pvec.at[0, C1:2 * C1].set(be1.astype(jnp.float32))
    pvec = pvec.at[0, 2 * C1:2 * C1 + C2].set(g2.astype(jnp.float32))
    pvec = pvec.at[0, 2 * C1 + C2:2 * C1 + 2 * C2].set(be2.astype(jnp.float32))
    pvec = pvec.at[0, 2 * C1 + 2 * C2].set(b3[0].astype(jnp.float32))

    kernel = _make_critic_kernel(C1, C2, M2, BP, n_taps, 1e-5, MXU_DTYPE)
    out = pl.pallas_call(
        kernel,
        out_shape=jax.ShapeDtypeStruct((N, 1), jnp.float32),
        in_specs=[pl.BlockSpec(memory_space=pltpu.MemorySpace.VMEM)] * 7,
        out_specs=pl.BlockSpec(memory_space=pltpu.MemorySpace.VMEM),
    )(patches_dup, patches_full, w1m, w2m, w3img, sel, pvec)

    return out                                                           # (N, 1) == view(N, -1)


# ------------------------------ pure-JAX reference ------------------------------

def critic_forward_reference(image, params):
    x = image
    for i, (w, b, g, be) in enumerate(params):
        x = jax.lax.conv_general_dilated(
            x, w, window_strides=(2, 2), padding="VALID",
            dimension_numbers=("NCHW", "OIHW", "NCHW"),
            precision=jax.lax.Precision.HIGHEST) + b.reshape(1, -1, 1, 1)
        if i < len(params) - 1:
            mean = jnp.mean(x, axis=(0, 2, 3), keepdims=True)
            var = jnp.mean((x - mean) ** 2, axis=(0, 2, 3), keepdims=True)
            x = (x - mean) * jax.lax.rsqrt(var + 1e-5) * g.reshape(1, -1, 1, 1) \
                + be.reshape(1, -1, 1, 1)
            x = jnp.where(x >= 0, x, 0.2 * x)
    return x.reshape(x.shape[0], -1)


# ------------------------------- param init --------------------------------

def _init_conv(key, c_in, c_out, k=4):
    """PyTorch-default Conv2d init: U(-1/sqrt(fan_in), 1/sqrt(fan_in))."""
    k1, k2 = jax.random.split(key)
    fan_in = c_in * k * k
    bound = 1.0 / math.sqrt(fan_in)
    w = jax.random.uniform(k1, (c_out, c_in, k, k), jnp.float32, -bound, bound)
    b = jax.random.uniform(k2, (c_out,), jnp.float32, -bound, bound)
    return w, b


def init_critic_params(key, im_chan=1, hidden_dim=16):
    dims = [(im_chan, hidden_dim), (hidden_dim, hidden_dim * 2), (hidden_dim * 2, 1)]
    params = []
    for (ci, co) in dims:
        key, sub = jax.random.split(key)
        w, b = _init_conv(sub, ci, co)
        gamma = jnp.ones((co,), jnp.float32)   # BN default init (unused for final layer)
        beta = jnp.zeros((co,), jnp.float32)
        params.append((w, b, gamma, beta))
    return params


# ----------------------------------- main -----------------------------------

if __name__ == "__main__":
    key = jax.random.PRNGKey(0)
    k_img, k_par = jax.random.split(key)

    batch, im_chan, hidden_dim, spatial = 2, 1, 16, 28   # 28 -> 13 -> 5 -> 1
    image = jax.random.normal(k_img, (batch, im_chan, spatial, spatial), jnp.float32)
    params = init_critic_params(k_par, im_chan=im_chan, hidden_dim=hidden_dim)

    out = jax.jit(critic_forward)(image, params)
    out = jax.block_until_ready(out)

    assert out.shape == (batch, 1), out.shape
    assert bool(jnp.all(jnp.isfinite(out)))

    ref = critic_forward_reference(image, params)
    err = float(jnp.max(jnp.abs(out - ref)))
    assert err < 1e-2, f"mismatch vs pure-JAX reference: max abs err = {err}"

    print("KERNEL_OK")
</pallas_src>

<mosaic_0001>
module attributes {stable_mosaic.version = 11 : i64} {
  func.func @kernel(%arg0: memref<896x16xf32, #tpu.memory_space<vmem>>, %arg1: memref<338x16xf32, #tpu.memory_space<vmem>>, %arg2: memref<16x16xf32, #tpu.memory_space<vmem>>, %arg3: memref<256x32xf32, #tpu.memory_space<vmem>>, %arg4: memref<50x32xf32, #tpu.memory_space<vmem>>, %arg5: memref<2x50xf32, #tpu.memory_space<vmem>>, %arg6: memref<1x128xf32, #tpu.memory_space<vmem>>, %arg7: memref<2x1xf32, #tpu.memory_space<vmem>>) attributes {dimension_semantics = [], scalar_prefetch = 0 : i64, scratch_operands = 0 : i64, tpu.core_type = #tpu.core_type<tc>} {
    %c0 = arith.constant 0 : index
    %c0_0 = arith.constant 0 : index
    %0 = vector.load %arg2[%c0, %c0_0] : memref<16x16xf32, #tpu.memory_space<vmem>>, vector<16x16xf32>
    %c0_1 = arith.constant 0 : index
    %c0_2 = arith.constant 0 : index
    %1 = vector.load %arg6[%c0_1, %c0_2] : memref<1x128xf32, #tpu.memory_space<vmem>>, vector<1x128xf32>
    %c0_3 = arith.constant 0 : index
    %c0_4 = arith.constant 0 : index
    %2 = vector.load %arg1[%c0_3, %c0_4] : memref<338x16xf32, #tpu.memory_space<vmem>>, vector<338x16xf32>
    %cst = arith.constant dense<0.000000e+00> : vector<338x16xf32>
    %3 = tpu.matmul %2, %0, %cst {dimension_numbers = #tpu.dot_dimension_numbers<[1], [0], [0], [1], [0, 0, 1, 1], [], []>} : vector<338x16xf32>, vector<16x16xf32>, vector<338x16xf32> -> vector<338x16xf32>
    %cst_5 = arith.constant dense<0.000000e+00> : vector<16xf32>
    %4 = vector.multi_reduction <add>, %3, %cst_5 [0] : vector<338x16xf32> to vector<16xf32>
    %5 = vector.shape_cast %4 : vector<16xf32> to vector<1x16xf32>
    %cst_6 = arith.constant 3.380000e+02 : f32
    %6 = vector.broadcast %cst_6 : f32 to vector<1x16xf32>
    %7 = arith.divf %5, %6 : vector<1x16xf32>
    %8 = arith.mulf %3, %3 : vector<338x16xf32>
    %cst_7 = arith.constant dense<0.000000e+00> : vector<16xf32>
    %9 = vector.multi_reduction <add>, %8, %cst_7 [0] : vector<338x16xf32> to vector<16xf32>
    %10 = vector.shape_cast %9 : vector<16xf32> to vector<1x16xf32>
    %cst_8 = arith.constant 3.380000e+02 : f32
    %11 = vector.broadcast %cst_8 : f32 to vector<1x16xf32>
    %12 = arith.divf %10, %11 : vector<1x16xf32>
    %13 = arith.mulf %7, %7 : vector<1x16xf32>
    %14 = arith.subf %12, %13 : vector<1x16xf32>
    %cst_9 = arith.constant 0.000000e+00 : f32
    %15 = vector.broadcast %cst_9 : f32 to vector<1x16xf32>
    %16 = arith.maximumf %14, %15 : vector<1x16xf32>
    %17 = vector.extract_strided_slice %1 {offsets = [0, 0], sizes = [1, 16], strides = [1, 1]} : vector<1x128xf32> to vector<1x16xf32>
    %18 = vector.extract_strided_slice %1 {offsets = [0, 16], sizes = [1, 16], strides = [1, 1]} : vector<1x128xf32> to vector<1x16xf32>
    %cst_10 = arith.constant 9.99999974E-6 : f32
    %19 = vector.broadcast %cst_10 : f32 to vector<1x16xf32>
    %20 = arith.addf %16, %19 : vector<1x16xf32>
    %21 = math.rsqrt %20 : vector<1x16xf32>
    %22 = arith.mulf %17, %21 : vector<1x16xf32>
    %23 = arith.mulf %7, %22 : vector<1x16xf32>
    %24 = arith.subf %18, %23 : vector<1x16xf32>
    %c0_11 = arith.constant 0 : index
    %c0_12 = arith.constant 0 : index
    %25 = vector.load %arg0[%c0_11, %c0_12] : memref<896x16xf32, #tpu.memory_space<vmem>>, vector<896x16xf32>
    %cst_13 = arith.constant dense<0.000000e+00> : vector<896x16xf32>
    %26 = tpu.matmul %25, %0, %cst_13 {dimension_numbers = #tpu.dot_dimension_numbers<[1], [0], [0], [1], [0, 0, 1, 1], [], []>} : vector<896x16xf32>, vector<16x16xf32>, vector<896x16xf32> -> vector<896x16xf32>
    %27 = vector.broadcast %22 : vector<1x16xf32> to vector<896x16xf32>
    %28 = arith.mulf %26, %27 : vector<896x16xf32>
    %29 = vector.broadcast %24 : vector<1x16xf32> to vector<896x16xf32>
    %30 = arith.addf %28, %29 : vector<896x16xf32>
    %cst_14 = arith.constant 0.000000e+00 : f32
    %31 = vector.broadcast %cst_14 : f32 to vector<896x16xf32>
    %32 = arith.cmpf oge, %30, %31 : vector<896x16xf32>
    %cst_15 = arith.constant 2.000000e-01 : f32
    %33 = vector.broadcast %cst_15 : f32 to vector<896x16xf32>
    %34 = arith.mulf %33, %30 : vector<896x16xf32>
    %35 = arith.select %32, %30, %34 : vector<896x16xi1>, vector<896x16xf32>
    %c0_16 = arith.constant 0 : index
    %c0_17 = arith.constant 0 : index
    %36 = vector.load %arg3[%c0_16, %c0_17] : memref<256x32xf32, #tpu.memory_space<vmem>>, vector<256x32xf32>
    %37 = vector.extract_strided_slice %35 {offsets = [0, 0], sizes = [50, 16], strides = [1, 1]} : vector<896x16xf32> to vector<50x16xf32>
    %38 = vector.extract_strided_slice %36 {offsets = [0, 0], sizes = [16, 32], strides = [1, 1]} : vector<256x32xf32> to vector<16x32xf32>
    %cst_18 = arith.constant dense<0.000000e+00> : vector<50x32xf32>
    %39 = tpu.matmul %37, %38, %cst_18 {dimension_numbers = #tpu.dot_dimension_numbers<[1], [0], [0], [1], [0, 0, 1, 1], [], []>} : vector<50x16xf32>, vector<16x32xf32>, vector<50x32xf32> -> vector<50x32xf32>
    %40 = vector.extract_strided_slice %35 {offsets = [56, 0], sizes = [50, 16], strides = [1, 1]} : vector<896x16xf32> to vector<50x16xf32>
    %41 = vector.extract_strided_slice %36 {offsets = [16, 0], sizes = [16, 32], strides = [1, 1]} : vector<256x32xf32> to vector<16x32xf32>
    %cst_19 = arith.constant dense<0.000000e+00> : vector<50x32xf32>
    %42 = tpu.matmul %40, %41, %cst_19 {dimension_numbers = #tpu.dot_dimension_numbers<[1], [0], [0], [1], [0, 0, 1, 1], [], []>} : vector<50x16xf32>, vector<16x32xf32>, vector<50x32xf32> -> vector<50x32xf32>
    %43 = arith.addf %39, %42 : vector<50x32xf32>
    %44 = vector.extract_strided_slice %35 {offsets = [112, 0], sizes = [50, 16], strides = [1, 1]} : vector<896x16xf32> to vector<50x16xf32>
    %45 = vector.extract_strided_slice %36 {offsets = [32, 0], sizes = [16, 32], strides = [1, 1]} : vector<256x32xf32> to vector<16x32xf32>
    %cst_20 = arith.constant dense<0.000000e+00> : vector<50x32xf32>
    %46 = tpu.matmul %44, %45, %cst_20 {dimension_numbers = #tpu.dot_dimension_numbers<[1], [0], [0], [1], [0, 0, 1, 1], [], []>} : vector<50x16xf32>, vector<16x32xf32>, vector<50x32xf32> -> vector<50x32xf32>
    %47 = arith.addf %43, %46 : vector<50x32xf32>
    %48 = vector.extract_strided_slice %35 {offsets = [168, 0], sizes = [50, 16], strides = [1, 1]} : vector<896x16xf32> to vector<50x16xf32>
    %49 = vector.extract_strided_slice %36 {offsets = [48, 0], sizes = [16, 32], strides = [1, 1]} : vector<256x32xf32> to vector<16x32xf32>
    %cst_21 = arith.constant dense<0.000000e+00> : vector<50x32xf32>
    %50 = tpu.matmul %48, %49, %cst_21 {dimension_numbers = #tpu.dot_dimension_numbers<[1], [0], [0], [1], [0, 0, 1, 1], [], []>} : vector<50x16xf32>, vector<16x32xf32>, vector<50x32xf32> -> vector<50x32xf32>
    %51 = arith.addf %47, %50 : vector<50x32xf32>
    %52 = vector.extract_strided_slice %35 {offsets = [224, 0], sizes = [50, 16], strides = [1, 1]} : vector<896x16xf32> to vector<50x16xf32>
    %53 = vector.extract_strided_slice %36 {offsets = [64, 0], sizes = [16, 32], strides = [1, 1]} : vector<256x32xf32> to vector<16x32xf32>
    %cst_22 = arith.constant dense<0.000000e+00> : vector<50x32xf32>
    %54 = tpu.matmul %52, %53, %cst_22 {dimension_numbers = #tpu.dot_dimension_numbers<[1], [0], [0], [1], [0, 0, 1, 1], [], []>} : vector<50x16xf32>, vector<16x32xf32>, vector<50x32xf32> -> vector<50x32xf32>
    %55 = arith.addf %51, %54 : vector<50x32xf32>
    %56 = vector.extract_strided_slice %35 {offsets = [280, 0], sizes = [50, 16], strides = [1, 1]} : vector<896x16xf32> to vector<50x16xf32>
    %57 = vector.extract_strided_slice %36 {offsets = [80, 0], sizes = [16, 32], strides = [1, 1]} : vector<256x32xf32> to vector<16x32xf32>
    %cst_23 = arith.constant dense<0.000000e+00> : vector<50x32xf32>
    %58 = tpu.matmul %56, %57, %cst_23 {dimension_numbers = #tpu.dot_dimension_numbers<[1], [0], [0], [1], [0, 0, 1, 1], [], []>} : vector<50x16xf32>, vector<16x32xf32>, vector<50x32xf32> -> vector<50x32xf32>
    %59 = arith.addf %55, %58 : vector<50x32xf32>
    %60 = vector.extract_strided_slice %35 {offsets = [336, 0], sizes = [50, 16], strides = [1, 1]} : vector<896x16xf32> to vector<50x16xf32>
    %61 = vector.extract_strided_slice %36 {offsets = [96, 0], sizes = [16, 32], strides = [1, 1]} : vector<256x32xf32> to vector<16x32xf32>
    %cst_24 = arith.constant dense<0.000000e+00> : vector<50x32xf32>
    %62 = tpu.matmul %60, %61, %cst_24 {dimension_numbers = #tpu.dot_dimension_numbers<[1], [0], [0], [1], [0, 0, 1, 1], [], []>} : vector<50x16xf32>, vector<16x32xf32>, vector<50x32xf32> -> vector<50x32xf32>
    %63 = arith.addf %59, %62 : vector<50x32xf32>
    %64 = vector.extract_strided_slice %35 {offsets = [392, 0], sizes = [50, 16], strides = [1, 1]} : vector<896x16xf32> to vector<50x16xf32>
    %65 = vector.extract_strided_slice %36 {offsets = [112, 0], sizes = [16, 32], strides = [1, 1]} : vector<256x32xf32> to vector<16x32xf32>
    %cst_25 = arith.constant dense<0.000000e+00> : vector<50x32xf32>
    %66 = tpu.matmul %64, %65, %cst_25 {dimension_numbers = #tpu.dot_dimension_numbers<[1], [0], [0], [1], [0, 0, 1, 1], [], []>} : vector<50x16xf32>, vector<16x32xf32>, vector<50x32xf32> -> vector<50x32xf32>
    %67 = arith.addf %63, %66 : vector<50x32xf32>
    %68 = vector.extract_strided_slice %35 {offsets = [448, 0], sizes = [50, 16], strides = [1, 1]} : vector<896x16xf32> to vector<50x16xf32>
    %69 = vector.extract_strided_slice %36 {offsets = [128, 0], sizes = [16, 32], strides = [1, 1]} : vector<256x32xf32> to vector<16x32xf32>
    %cst_26 = arith.constant dense<0.000000e+00> : vector<50x32xf32>
    %70 = tpu.matmul %68, %69, %cst_26 {dimension_numbers = #tpu.dot_dimension_numbers<[1], [0], [0], [1], [0, 0, 1, 1], [], []>} : vector<50x16xf32>, vector<16x32xf32>, vector<50x32xf32> -> vector<50x32xf32>
    %71 = arith.addf %67, %70 : vector<50x32xf32>
    %72 = vector.extract_strided_slice %35 {offsets = [504, 0], sizes = [50, 16], strides = [1, 1]} : vector<896x16xf32> to vector<50x16xf32>
    %73 = vector.extract_strided_slice %36 {offsets = [144, 0], sizes = [16, 32], strides = [1, 1]} : vector<256x32xf32> to vector<16x32xf32>
    %cst_27 = arith.constant dense<0.000000e+00> : vector<50x32xf32>
    %74 = tpu.matmul %72, %73, %cst_27 {dimension_numbers = #tpu.dot_dimension_numbers<[1], [0], [0], [1], [0, 0, 1, 1], [], []>} : vector<50x16xf32>, vector<16x32xf32>, vector<50x32xf32> -> vector<50x32xf32>
    %75 = arith.addf %71, %74 : vector<50x32xf32>
    %76 = vector.extract_strided_slice %35 {offsets = [560, 0], sizes = [50, 16], strides = [1, 1]} : vector<896x16xf32> to vector<50x16xf32>
    %77 = vector.extract_strided_slice %36 {offsets = [160, 0], sizes = [16, 32], strides = [1, 1]} : vector<256x32xf32> to vector<16x32xf32>
    %cst_28 = arith.constant dense<0.000000e+00> : vector<50x32xf32>
    %78 = tpu.matmul %76, %77, %cst_28 {dimension_numbers = #tpu.dot_dimension_numbers<[1], [0], [0], [1], [0, 0, 1, 1], [], []>} : vector<50x16xf32>, vector<16x32xf32>, vector<50x32xf32> -> vector<50x32xf32>
    %79 = arith.addf %75, %78 : vector<50x32xf32>
    %80 = vector.extract_strided_slice %35 {offsets = [616, 0], sizes = [50, 16], strides = [1, 1]} : vector<896x16xf32> to vector<50x16xf32>
    %81 = vector.extract_strided_slice %36 {offsets = [176, 0], sizes = [16, 32], strides = [1, 1]} : vector<256x32xf32> to vector<16x32xf32>
    %cst_29 = arith.constant dense<0.000000e+00> : vector<50x32xf32>
    %82 = tpu.matmul %80, %81, %cst_29 {dimension_numbers = #tpu.dot_dimension_numbers<[1], [0], [0], [1], [0, 0, 1, 1], [], []>} : vector<50x16xf32>, vector<16x32xf32>, vector<50x32xf32> -> vector<50x32xf32>
    %83 = arith.addf %79, %82 : vector<50x32xf32>
    %84 = vector.extract_strided_slice %35 {offsets = [672, 0], sizes = [50, 16], strides = [1, 1]} : vector<896x16xf32> to vector<50x16xf32>
    %85 = vector.extract_strided_slice %36 {offsets = [192, 0], sizes = [16, 32], strides = [1, 1]} : vector<256x32xf32> to vector<16x32xf32>
    %cst_30 = arith.constant dense<0.000000e+00> : vector<50x32xf32>
    %86 = tpu.matmul %84, %85, %cst_30 {dimension_numbers = #tpu.dot_dimension_numbers<[1], [0], [0], [1], [0, 0, 1, 1], [], []>} : vector<50x16xf32>, vector<16x32xf32>, vector<50x32xf32> -> vector<50x32xf32>
    %87 = arith.addf %83, %86 : vector<50x32xf32>
    %88 = vector.extract_strided_slice %35 {offsets = [728, 0], sizes = [50, 16], strides = [1, 1]} : vector<896x16xf32> to vector<50x16xf32>
    %89 = vector.extract_strided_slice %36 {offsets = [208, 0], sizes = [16, 32], strides = [1, 1]} : vector<256x32xf32> to vector<16x32xf32>
    %cst_31 = arith.constant dense<0.000000e+00> : vector<50x32xf32>
    %90 = tpu.matmul %88, %89, %cst_31 {dimension_numbers = #tpu.dot_dimension_numbers<[1], [0], [0], [1], [0, 0, 1, 1], [], []>} : vector<50x16xf32>, vector<16x32xf32>, vector<50x32xf32> -> vector<50x32xf32>
    %91 = arith.addf %87, %90 : vector<50x32xf32>
    %92 = vector.extract_strided_slice %35 {offsets = [784, 0], sizes = [50, 16], strides = [1, 1]} : vector<896x16xf32> to vector<50x16xf32>
    %93 = vector.extract_strided_slice %36 {offsets = [224, 0], sizes = [16, 32], strides = [1, 1]} : vector<256x32xf32> to vector<16x32xf32>
    %cst_32 = arith.constant dense<0.000000e+00> : vector<50x32xf32>
    %94 = tpu.matmul %92, %93, %cst_32 {dimension_numbers = #tpu.dot_dimension_numbers<[1], [0], [0], [1], [0, 0, 1, 1], [], []>} : vector<50x16xf32>, vector<16x32xf32>, vector<50x32xf32> -> vector<50x32xf32>
    %95 = arith.addf %91, %94 : vector<50x32xf32>
    %96 = vector.extract_strided_slice %35 {offsets = [840, 0], sizes = [50, 16], strides = [1, 1]} : vector<896x16xf32> to vector<50x16xf32>
    %97 = vector.extract_strided_slice %36 {offsets = [240, 0], sizes = [16, 32], strides = [1, 1]} : vector<256x32xf32> to vector<16x32xf32>
    %cst_33 = arith.constant dense<0.000000e+00> : vector<50x32xf32>
    %98 = tpu.matmul %96, %97, %cst_33 {dimension_numbers = #tpu.dot_dimension_numbers<[1], [0], [0], [1], [0, 0, 1, 1], [], []>} : vector<50x16xf32>, vector<16x32xf32>, vector<50x32xf32> -> vector<50x32xf32>
    %99 = arith.addf %95, %98 : vector<50x32xf32>
    %cst_34 = arith.constant dense<0.000000e+00> : vector<32xf32>
    %100 = vector.multi_reduction <add>, %99, %cst_34 [0] : vector<50x32xf32> to vector<32xf32>
    %101 = vector.shape_cast %100 : vector<32xf32> to vector<1x32xf32>
    %cst_35 = arith.constant 5.000000e+01 : f32
    %102 = vector.broadcast %cst_35 : f32 to vector<1x32xf32>
    %103 = arith.divf %101, %102 : vector<1x32xf32>
    %104 = arith.mulf %99, %99 : vector<50x32xf32>
    %cst_36 = arith.constant dense<0.000000e+00> : vector<32xf32>
    %105 = vector.multi_reduction <add>, %104, %cst_36 [0] : vector<50x32xf32> to vector<32xf32>
    %106 = vector.shape_cast %105 : vector<32xf32> to vector<1x32xf32>
    %cst_37 = arith.constant 5.000000e+01 : f32
    %107 = vector.broadcast %cst_37 : f32 to vector<1x32xf32>
    %108 = arith.divf %106, %107 : vector<1x32xf32>
    %109 = arith.mulf %103, %103 : vector<1x32xf32>
    %110 = arith.subf %108, %109 : vector<1x32xf32>
    %cst_38 = arith.constant 0.000000e+00 : f32
    %111 = vector.broadcast %cst_38 : f32 to vector<1x32xf32>
    %112 = arith.maximumf %110, %111 : vector<1x32xf32>
    %113 = vector.extract_strided_slice %1 {offsets = [0, 32], sizes = [1, 32], strides = [1, 1]} : vector<1x128xf32> to vector<1x32xf32>
    %114 = vector.extract_strided_slice %1 {offsets = [0, 64], sizes = [1, 32], strides = [1, 1]} : vector<1x128xf32> to vector<1x32xf32>
    %cst_39 = arith.constant 9.99999974E-6 : f32
    %115 = vector.broadcast %cst_39 : f32 to vector<1x32xf32>
    %116 = arith.addf %112, %115 : vector<1x32xf32>
    %117 = math.rsqrt %116 : vector<1x32xf32>
    %118 = arith.mulf %113, %117 : vector<1x32xf32>
    %119 = arith.mulf %103, %118 : vector<1x32xf32>
    %120 = arith.subf %114, %119 : vector<1x32xf32>
    %121 = vector.broadcast %118 : vector<1x32xf32> to vector<50x32xf32>
    %122 = arith.mulf %99, %121 : vector<50x32xf32>
    %123 = vector.broadcast %120 : vector<1x32xf32> to vector<50x32xf32>
    %124 = arith.addf %122, %123 : vector<50x32xf32>
    %cst_40 = arith.constant 0.000000e+00 : f32
    %125 = vector.broadcast %cst_40 : f32 to vector<50x32xf32>
    %126 = arith.cmpf oge, %124, %125 : vector<50x32xf32>
    %cst_41 = arith.constant 2.000000e-01 : f32
    %127 = vector.broadcast %cst_41 : f32 to vector<50x32xf32>
    %128 = arith.mulf %127, %124 : vector<50x32xf32>
    %129 = arith.select %126, %124, %128 : vector<50x32xi1>, vector<50x32xf32>
    %c0_42 = arith.constant 0 : index
    %c0_43 = arith.constant 0 : index
    %130 = vector.load %arg5[%c0_42, %c0_43] : memref<2x50xf32, #tpu.memory_space<vmem>>, vector<2x50xf32>
    %c0_44 = arith.constant 0 : index
    %c0_45 = arith.constant 0 : index
    %131 = vector.load %arg4[%c0_44, %c0_45] : memref<50x32xf32, #tpu.memory_space<vmem>>, vector<50x32xf32>
    %132 = arith.mulf %129, %131 : vector<50x32xf32>
    %cst_46 = arith.constant dense<0.000000e+00> : vector<2x32xf32>
    %133 = tpu.matmul %130, %132, %cst_46 {dimension_numbers = #tpu.dot_dimension_numbers<[1], [0], [0], [1], [0, 0, 1, 1], [], []>} : vector<2x50xf32>, vector<50x32xf32>, vector<2x32xf32> -> vector<2x32xf32>
    %134 = vector.extract_strided_slice %1 {offsets = [0, 96], sizes = [1, 1], strides = [1, 1]} : vector<1x128xf32> to vector<1x1xf32>
    %cst_47 = arith.constant dense<0.000000e+00> : vector<2xf32>
    %135 = vector.multi_reduction <add>, %133, %cst_47 [1] : vector<2x32xf32> to vector<2xf32>
    %136 = vector.shape_cast %135 : vector<2xf32> to vector<2x1xf32>
    %137 = vector.broadcast %134 : vector<1x1xf32> to vector<2x1xf32>
    %138 = arith.addf %136, %137 : vector<2x1xf32>
    %c0_48 = arith.constant 0 : index
    %c0_49 = arith.constant 0 : index
    %139 = vector.load %arg7[%c0_48, %c0_49] : memref<2x1xf32, #tpu.memory_space<vmem>>, vector<2x1xf32>
    tpu.vector_store %arg7[%c0_48, %c0_49], %138 {strides = array<i32>} : memref<2x1xf32, #tpu.memory_space<vmem>>, vector<2x1xf32>,
    return
  }
}

</mosaic_0001>

<bundles_post_ra>
// kernel: critic_forward.1
= control target key start
LH: loop header
LB: loop body
LE: loop exit
PB: predicated region body
PF: predicated region fallthrough
CT: control target
= control target key end

     0   :  { %v8311_v0 = vmov 0.0|0.0   ;;  %vm6295_vm0 = vmmov 0   ;;  %v8309_v3 = vmov 0.0   ;;  %vm72_vm1 = vcmask 130048   ;;  %s6298_s18 = smov 16   ;;  %s6299_s23 = smov 112   ;;  %s8301_s2 = inlined_call_operand.vmem [shape: f32[16,16], index: 2, kind: input, shape index: {}]   ;;  %s8302_s1 = inlined_call_operand.vmem [shape: f32[338,16], index: 1, kind: input, shape index: {}]   ;;  %s8303_s0 = inlined_call_operand.vmem [shape: f32[896,16], index: 0, kind: input, shape index: {}]   ;;  %s8304_s6 = inlined_call_operand.vmem [shape: f32[1,128], index: 6, kind: input, shape index: {}]   ;;  %s8305_s3 = inlined_call_operand.vmem [shape: f32[256,32], index: 3, kind: input, shape index: {}]   ;;  %s8306_s4 = inlined_call_operand.vmem [shape: f32[50,32], index: 4, kind: input, shape index: {}]   ;;  %s8307_s5 = inlined_call_operand.vmem [shape: f32[2,50], index: 5, kind: input, shape index: {}]   ;;  %s8308_s7 = inlined_call_operand.vmem [shape: f32[2,1], index: 7, kind: output, shape index: {}]  }
   0x1   :  { %6010 = vmatprep.subr.bf16.mxu1 %v8311_v0  ;;  %v26_v1 = vld [vmem:[%s8301_s2] sm:$0xff]  ;;  %v27_v2 = vld [vmem:[%s8301_s2 + $0x8] sm:$0xff]  ;;  %5292 = vmatprep.mubr.msk.f32.mxu1 %vm6295_vm0, %v8309_v3  ;;  %v31_v7 = vld [vmem:[%s8302_s1 + $0x10] sm:$0xff]  ;;  %vm565_vm2 = vcmask 123904   ;;  %s6301_s9 = smov 96   ;;  %s6302_s10 = smov 64  }
   0x2   :  { %v6011_v4 = vpack.c.bf16 %v27_v2, %v26_v1  ;;  %6017 = vmatprep.subr.bf16.mxu0 %v8311_v0  ;;  %5597 = vmatprep.mubr.msk.f32.mxu0 %vm6295_vm0, %v8309_v3  ;;  %v29_v5 = vld [vmem:[%s8302_s1] sm:$0xff]  ;;  %v30_v6 = vld [vmem:[%s8302_s1 + $0x8] sm:$0xff]  ;;  %v32_v8 = vld [vmem:[%s8302_s1 + $0x18] sm:$0xff] }
   0x3   :  { %v33_v9 = vld [vmem:[%s8302_s1 + $0x20] sm:$0xff]  ;;  %v34_v10 = vld [vmem:[%s8302_s1 + $0x28] sm:$0xff]  ;;  %v35_v11 = vld [vmem:[%s8302_s1 + $0x30] sm:$0xff] }
   0x4   :  { %6012 = vmatpush3.bf16.msra.mxu1 %v6011_v4  ;;  %v36_v12 = vld [vmem:[%s8302_s1 + $0x38] sm:$0xff]  ;;  %v37_v13 = vld [vmem:[%s8302_s1 + $0x40] sm:$0xff]  ;;  %v38_v14 = vld [vmem:[%s8302_s1 + $0x48] sm:$0xff] }
   0x5   :  { %6014 = vmatprep.subr.bf16.mxu1 %v6011_v4  ;;  %v39_v15 = vld [vmem:[%s8302_s1 + $0x50] sm:$0xff]  ;;  %v40_v16 = vld [vmem:[%s8302_s1 + $0x58] sm:$0xff]  ;;  %v41_v17 = vld [vmem:[%s8302_s1 + $0x60] sm:$0xff] }
   0x6   :  { %v42_v18 = vld [vmem:[%s8302_s1 + $0x68] sm:$0xff]  ;;  %v43_v19 = vld [vmem:[%s8302_s1 + $0x70] sm:$0xff]  ;;  %v44_v20 = vld [vmem:[%s8302_s1 + $0x78] sm:$0xff] }
   0x7   :  { %5293 = vmatmul.mubr.msk.f32.vlgmr.msra.gmra.mrb[0].mxu1 %vm72_vm1, %v29_v5  ;;  %v45_v21 = vld [vmem:[%s8302_s1 + $0x80] sm:$0xff]  ;;  %v46_v22 = vld [vmem:[%s8302_s1 + $0x88] sm:$0xff]  ;;  %v47_v23 = vld [vmem:[%s8302_s1 + $0x90] sm:$0xff] }
   0x8   :  { %5295 = vmatprep.mubr.msk.f32.mxu1 %vm6295_vm0, %v8309_v3  ;;  %6016 = vmatpush3.bf16.msra.mxu1 %v6011_v4  ;;  %v48_v24 = vld [vmem:[%s8302_s1 + $0x98] sm:$0xff]  ;;  %v49_v25 = vld [vmem:[%s8302_s1 + $0xa0] sm:$0xff]  ;;  %v50_v26 = vld [vmem:[%s8302_s1 + $0xa8] sm:$0xff] }
   0x9   :  { %6074 = vmatprep.subr.bf16.mxu1 %v8311_v0  ;;  %v51_v27 = vld [vmem:[%s8302_s1 + $0xb0] sm:$0xff]  ;;  %v52_v28 = vld [vmem:[%s8302_s1 + $0xb8] sm:$0xff]  ;;  %v53_v29 = vld [vmem:[%s8302_s1 + $0xc0] sm:$0xff] }
   0xa   :  { %v54_v30 = vld [vmem:[%s8302_s1 + $0xc8] sm:$0xff]  ;;  %v55_v31 = vld [vmem:[%s8302_s1 + $0xd0] sm:$0xff]  ;;  %v56_v32 = vld [vmem:[%s8302_s1 + $0xd8] sm:$0xff] }
   0xb   :  { %5296 = vmatmul.mubr.msk.f32.gmra.mrb[2].mxu1 %vm72_vm1, %v30_v6  ;;  %v57_v33 = vld [vmem:[%s8302_s1 + $0xe0] sm:$0xff]  ;;  %v58_v34 = vld [vmem:[%s8302_s1 + $0xe8] sm:$0xff]  ;;  %v59_v35 = vld [vmem:[%s8302_s1 + $0xf0] sm:$0xff] }
   0xc   :  { %5298 = vmatprep.mubr.msk.f32.mxu1 %vm6295_vm0, %v8309_v3  ;;  %v60_v36 = vld [vmem:[%s8302_s1 + $0xf8] sm:$0xff]  ;;  %v61_v37 = vld [vmem:[%s8302_s1 + $0x100] sm:$0xff]  ;;  %v62_v38 = vld [vmem:[%s8302_s1 + $0x108] sm:$0xff] }
   0xd   :  { %v63_v39 = vld [vmem:[%s8302_s1 + $0x110] sm:$0xff]  ;;  %v64_v40 = vld [vmem:[%s8302_s1 + $0x118] sm:$0xff]  ;;  %v65_v41 = vld [vmem:[%s8302_s1 + $0x120] sm:$0xff] }
   0xe   :  { %v66_v42 = vld [vmem:[%s8302_s1 + $0x128] sm:$0xff]  ;;  %v67_v43 = vld [vmem:[%s8302_s1 + $0x130] sm:$0xff]  ;;  %v68_v44 = vld [vmem:[%s8302_s1 + $0x138] sm:$0xff] }
   0xf   :  { %5299 = vmatmul.mubr.msk.f32.gmra.mrb[4].mxu1 %vm72_vm1, %v31_v7  ;;  %v69_v45 = vld [vmem:[%s8302_s1 + $0x140] sm:$0xff]  ;;  %v70_v46 = vld [vmem:[%s8302_s1 + $0x148] sm:$0xff]  ;;  %v71_v47 = vld [vmem:[%s8302_s1 + $0x150] sm:$0x3] }
  0x10   :  { %5301 = vmatprep.mubr.msk.f32.mxu1 %vm6295_vm0, %v8309_v3  ;;  %v737_v48 = vld [vmem:[%s8303_s0] sm:$0xff]  ;;  %v738_v49 = vld [vmem:[%s8303_s0 + $0x8] sm:$0xff]  ;;  %v739_v50 = vld [vmem:[%s8303_s0 + $0x10] sm:$0xff] }
  0x11   :  { %v740_v51 = vld [vmem:[%s8303_s0 + $0x18] sm:$0xff]  ;;  %v741_v52 = vld [vmem:[%s8303_s0 + $0x20] sm:$0xff]  ;;  %v742_v53 = vld [vmem:[%s8303_s0 + $0x28] sm:$0xff] }
  0x12   :  { %v743_v54 = vld [vmem:[%s8303_s0 + $0x30] sm:$0xff]  ;;  %v744_v55 = vld [vmem:[%s8303_s0 + $0x38] sm:$0xff]  ;;  %v745_v56 = vld [vmem:[%s8303_s0 + $0x40] sm:$0xff] }
  0x13   :  { %5302 = vmatmul.mubr.msk.f32.gmra.mrb[6].mxu1 %vm72_vm1, %v32_v8  ;;  %v746_v57 = vld [vmem:[%s8303_s0 + $0x48] sm:$0xff]  ;;  %v747_v58 = vld [vmem:[%s8303_s0 + $0x50] sm:$0xff]  ;;  %v748_v59 = vld [vmem:[%s8303_s0 + $0x58] sm:$0xff] }
  0x14   :  { %5304 = vmatprep.mubr.msk.f32.mxu1 %vm6295_vm0, %v8309_v3  ;;  %v749_v60 = vld [vmem:[%s8303_s0 + $0x60] sm:$0xff]  ;;  %v750_v61 = vld [vmem:[%s8303_s0 + $0x68] sm:$0xff]  ;;  %v751_v62 = vld [vmem:[%s8303_s0 + $0x70] sm:$0xff] }
  0x15   :  { %v752_v63 = vld [vmem:[%s8303_s0 + $0x78] sm:$0xff]  ;;  %v753_v1 = vld [vmem:[%s8303_s0 + $0x80] sm:$0xff]  ;;  %v754_v2 = vld [vmem:[%s8303_s0 + $0x88] sm:$0xff] }
  0x16   :  { %v755_v4 = vld [vmem:[%s8303_s0 + $0x90] sm:$0xff]  ;;  %v756_v5 = vld [vmem:[%s8303_s0 + $0x98] sm:$0xff]  ;;  %v757_v6 = vld [vmem:[%s8303_s0 + $0xa0] sm:$0xff] }
  0x17   :  { %5305 = vmatmul.mubr.msk.f32.gmra.mrb[8].mxu1 %vm72_vm1, %v33_v9  ;;  %v758_v7 = vld [vmem:[%s8303_s0 + $0xa8] sm:$0xff]  ;;  %v759_v8 = vld [vmem:[%s8303_s0 + $0xb0] sm:$0xff] }
  0x18   :  { %5307 = vmatprep.mubr.msk.f32.mxu1 %vm6295_vm0, %v8309_v3 }
  0x1b   :  { %5308 = vmatmul.mubr.msk.f32.gmra.mrb[10].mxu1 %vm72_vm1, %v34_v10 }
  0x1c   :  { %5310 = vmatprep.mubr.msk.f32.mxu1 %vm6295_vm0, %v8309_v3 }
  0x1f   :  { %5311 = vmatmul.mubr.msk.f32.gmra.mrb[12].mxu1 %vm72_vm1, %v35_v11  ;;  %v760_v11 = vld [vmem:[%s8303_s0 + $0xb8] sm:$0xff] }
  0x20   :  { %5313 = vmatprep.mubr.msk.f32.mxu1 %vm6295_vm0, %v8309_v3 }
  0x23   :  { %5314 = vmatmul.mubr.msk.f32.gmra.mrb[14].mxu1 %vm72_vm1, %v36_v12 }
  0x24   :  { %5316 = vmatprep.mubr.msk.f32.mxu1 %vm6295_vm0, %v8309_v3 }
  0x27   :  { %5317 = vmatmul.mubr.msk.f32.gmra.mrb[16].mxu1 %vm72_vm1, %v37_v13  ;;  %v761_v13 = vld [vmem:[%s8303_s0 + $0xc0] sm:$0xff] }
  0x28   :  { %5319 = vmatprep.mubr.msk.f32.mxu1 %vm6295_vm0, %v8309_v3 }
  0x2b   :  { %5320 = vmatmul.mubr.msk.f32.gmra.mrb[18].mxu1 %vm72_vm1, %v38_v14 }
  0x2c   :  { %5322 = vmatprep.mubr.msk.f32.mxu1 %vm6295_vm0, %v8309_v3 }
  0x2f   :  { %5323 = vmatmul.mubr.msk.f32.gmra.mrb[20].mxu1 %vm72_vm1, %v39_v15 }
  0x30   :  { %5325 = vmatprep.mubr.msk.f32.mxu1 %vm6295_vm0, %v8309_v3 }
  0x33   :  { %5326 = vmatmul.mubr.msk.f32.gmra.mrb[22].mxu1 %vm72_vm1, %v40_v16 }
  0x34   :  { %5328 = vmatprep.mubr.msk.f32.mxu1 %vm6295_vm0, %v8309_v3 }
  0x37   :  { %5329 = vmatmul.mubr.msk.f32.gmra.mrb[24].mxu1 %vm72_vm1, %v41_v17 }
  0x38   :  { %5331 = vmatprep.mubr.msk.f32.mxu1 %vm6295_vm0, %v8309_v3 }
  0x3b   :  { %5332 = vmatmul.mubr.msk.f32.gmra.mrb[26].mxu1 %vm72_vm1, %v42_v18 }
  0x3c   :  { %5334 = vmatprep.mubr.msk.f32.mxu1 %vm6295_vm0, %v8309_v3 }
  0x3f   :  { %5335 = vmatmul.mubr.msk.f32.gmra.mrb[28].mxu1 %vm72_vm1, %v43_v19 }
  0x40   :  { %5337 = vmatprep.mubr.msk.f32.mxu1 %vm6295_vm0, %v8309_v3 }
  0x43   :  { %5338 = vmatmul.mubr.msk.f32.gmra.mrb[30].mxu1 %vm72_vm1, %v44_v20  ;;  %v762_v20 = vld [vmem:[%s8303_s0 + $0xc8] sm:$0xff] }
  0x44   :  { %5340 = vmatprep.mubr.msk.f32.mxu1 %vm6295_vm0, %v8309_v3 }
  0x47   :  { %5341 = vmatmul.mubr.msk.f32.gmra.mrb[32].mxu1 %vm72_vm1, %v45_v21 }
  0x48   :  { %5343 = vmatprep.mubr.msk.f32.mxu1 %vm6295_vm0, %v8309_v3 }
  0x4b   :  { %5344 = vmatmul.mubr.msk.f32.gmra.mrb[34].mxu1 %vm72_vm1, %v46_v22 }
  0x4c   :  { %5346 = vmatprep.mubr.msk.f32.mxu1 %vm6295_vm0, %v8309_v3 }
  0x4f   :  { %5347 = vmatmul.mubr.msk.f32.gmra.mrb[36].mxu1 %vm72_vm1, %v47_v23  ;;  %v763_v23 = vld [vmem:[%s8303_s0 + $0xd0] sm:$0xff] }
  0x50   :  { %5349 = vmatprep.mubr.msk.f32.mxu1 %vm6295_vm0, %v8309_v3 }
  0x53   :  { %5350 = vmatmul.mubr.msk.f32.gmra.mrb[38].mxu1 %vm72_vm1, %v48_v24 }
  0x54   :  { %5352 = vmatprep.mubr.msk.f32.mxu1 %vm6295_vm0, %v8309_v3 }
  0x57   :  { %5353 = vmatmul.mubr.msk.f32.gmra.mrb[40].mxu1 %vm72_vm1, %v49_v25 }
  0x58   :  { %5355 = vmatprep.mubr.msk.f32.mxu1 %vm6295_vm0, %v8309_v3 }
  0x5b   :  { %5356 = vmatmul.mubr.msk.f32.gmra.mrb[42].mxu1 %vm72_vm1, %v50_v26 }
  0x5c   :  { %5358 = vmatprep.mubr.msk.f32.mxu1 %vm6295_vm0, %v8309_v3 }
  0x5f   :  { %5359 = vmatmul.mubr.msk.f32.gmra.mrb[44].mxu1 %vm72_vm1, %v51_v27 }
  0x60   :  { %5361 = vmatprep.mubr.msk.f32.mxu1 %vm6295_vm0, %v8309_v3 }
  0x63   :  { %5362 = vmatmul.mubr.msk.f32.gmra.mrb[46].mxu1 %vm72_vm1, %v52_v28 }
  0x64   :  { %5364 = vmatprep.mubr.msk.f32.mxu1 %vm6295_vm0, %v8309_v3 }
  0x67   :  { %5365 = vmatmul.mubr.msk.f32.gmra.mrb[48].mxu1 %vm72_vm1, %v53_v29 }
  0x68   :  { %5367 = vmatprep.mubr.msk.f32.mxu1 %vm6295_vm0, %v8309_v3 }
  0x6b   :  { %5368 = vmatmul.mubr.msk.f32.gmra.mrb[50].mxu1 %vm72_vm1, %v54_v30  ;;  %v764_v30 = vld [vmem:[%s8303_s0 + $0xd8] sm:$0xff] }
  0x6c   :  { %5370 = vmatprep.mubr.msk.f32.mxu1 %vm6295_vm0, %v8309_v3 }
  0x6f   :  { %5371 = vmatmul.mubr.msk.f32.gmra.mrb[52].mxu1 %vm72_vm1, %v55_v31 }
  0x70   :  { %5373 = vmatprep.mubr.msk.f32.mxu1 %vm6295_vm0, %v8309_v3 }
  0x73   :  { %5374 = vmatmul.mubr.msk.f32.gmra.mrb[54].mxu1 %vm72_vm1, %v56_v32  ;;  %v765_v32 = vld [vmem:[%s8303_s0 + $0xe0] sm:$0xff] }
  0x74   :  { %5376 = vmatprep.mubr.msk.f32.mxu1 %vm6295_vm0, %v8309_v3 }
  0x77   :  { %5377 = vmatmul.mubr.msk.f32.gmra.mrb[56].mxu1 %vm72_vm1, %v57_v33 }
  0x78   :  { %5379 = vmatprep.mubr.msk.f32.mxu1 %vm6295_vm0, %v8309_v3 }
  0x7b   :  { %5380 = vmatmul.mubr.msk.f32.gmra.mrb[58].mxu1 %vm72_vm1, %v58_v34 }
  0x7c   :  { %5382 = vmatprep.mubr.msk.f32.mxu1 %vm6295_vm0, %v8309_v3 }
  0x7f   :  { %5383 = vmatmul.mubr.msk.f32.gmra.mrb[60].mxu1 %vm72_vm1, %v59_v35 }
  0x80   :  { %5385 = vmatprep.mubr.msk.f32.mxu1 %vm6295_vm0, %v8309_v3 }
  0x83   :  { %5386 = vmatmul.mubr.msk.f32.gmra.mrb[62].mxu1 %vm72_vm1, %v60_v36 }
  0x84   :  { %5388 = vmatprep.mubr.msk.f32.mxu1 %vm6295_vm0, %v8309_v3 }
  0x87   :  { %5389 = vmatmul.mubr.msk.f32.gmra.mrb[64].mxu1 %vm72_vm1, %v61_v37 }
  0x88   :  { %5391 = vmatprep.mubr.msk.f32.mxu1 %vm6295_vm0, %v8309_v3 }
  0x8b   :  { %5392 = vmatmul.mubr.msk.f32.gmra.mrb[66].mxu1 %vm72_vm1, %v62_v38 }
  0x8c   :  { %5394 = vmatprep.mubr.msk.f32.mxu1 %vm6295_vm0, %v8309_v3 }
  0x8f   :  { %5395 = vmatmul.mubr.msk.f32.gmra.mrb[68].mxu1 %vm72_vm1, %v63_v39  ;;  %v766_v39 = vld [vmem:[%s8303_s0 + $0xe8] sm:$0xff] }
  0x90   :  { %5397 = vmatprep.mubr.msk.f32.mxu1 %vm6295_vm0, %v8309_v3 }
  0x93   :  { %5398 = vmatmul.mubr.msk.f32.gmra.mrb[70].mxu1 %vm72_vm1, %v64_v40 }
  0x94   :  { %5400 = vmatprep.mubr.msk.f32.mxu1 %vm6295_vm0, %v8309_v3 }
  0x97   :  { %5401 = vmatmul.mubr.msk.f32.gmra.mrb[72].mxu1 %vm72_vm1, %v65_v41  ;;  %v767_v41 = vld [vmem:[%s8303_s0 + $0xf0] sm:$0xff] }
  0x98   :  { %5403 = vmatprep.mubr.msk.f32.mxu1 %vm6295_vm0, %v8309_v3 }
  0x9b   :  { %5404 = vmatmul.mubr.msk.f32.gmra.mrb[74].mxu1 %vm72_vm1, %v66_v42 }
  0x9c   :  { %5406 = vmatprep.mubr.msk.f32.mxu1 %vm6295_vm0, %v8309_v3 }
  0x9f   :  { %5407 = vmatmul.mubr.msk.f32.gmra.mrb[76].mxu1 %vm72_vm1, %v67_v43 }
  0xa0   :  { %5409 = vmatprep.mubr.msk.f32.mxu1 %vm6295_vm0, %v8309_v3 }
  0xa3   :  { %5410 = vmatmul.mubr.msk.f32.gmra.mrb[78].mxu1 %vm72_vm1, %v68_v44 }
  0xa4   :  { %5412 = vmatprep.mubr.msk.f32.mxu1 %vm6295_vm0, %v8309_v3 }
  0xa7   :  { %5413 = vmatmul.mubr.msk.f32.gmra.mrb[80].mxu1 %vm72_vm1, %v69_v45 }
  0xa8   :  { %5415 = vmatprep.mubr.msk.f32.mxu1 %vm6295_vm0, %v8309_v3 }
  0xab   :  { %5416 = vmatmul.mubr.msk.f32.gmra.mrb[82].mxu1 %vm72_vm1, %v70_v46 }
  0xac   :  { %5418 = vmatprep.mubr.msk.f32.mxu1 %vm6295_vm0, %v8309_v3 }
  0xaf   :  { %5419 = vmatmul.mubr.msk.f32.gmra.mrb[84].mxu1 %vm72_vm1, %v71_v47 }
  0xb0   :  { %5425 = vmatprep.mubr.msk.f32.mxu1 %vm72_vm1, %v737_v48  ;;  %v768_v48 = vld [vmem:[%s8303_s0 + $0xf8] sm:$0xff] }
  0xb3   :  { %5426 = vmatmul.mubr.msk.f32.vlgmr.msra.gmra.mrb[86].mxu1 %vm72_vm1, %v738_v49 }
  0xb4   :  { %5428 = vmatprep.mubr.msk.f32.mxu1 %vm72_vm1, %v739_v50  ;;  %v769_v50 = vld [vmem:[%s8303_s0 + $0x100] sm:$0xff] }
  0xb7   :  { %5429 = vmatmul.mubr.msk.f32.gmra.mrb[88].mxu1 %vm72_vm1, %v740_v51 }
  0xb8   :  { %5431 = vmatprep.mubr.msk.f32.mxu1 %vm72_vm1, %v741_v52 }
  0xbb   :  { %5432 = vmatmul.mubr.msk.f32.gmra.mrb[90].mxu1 %vm72_vm1, %v742_v53 }
  0xbc   :  { %5434 = vmatprep.mubr.msk.f32.mxu1 %vm72_vm1, %v743_v54 }
  0xbf   :  { %5435 = vmatmul.mubr.msk.f32.gmra.mrb[92].mxu1 %vm72_vm1, %v744_v55 }
  0xc0   :  { %5437 = vmatprep.mubr.msk.f32.mxu1 %vm72_vm1, %v745_v56 }
  0xc3   :  { %5438 = vmatmul.mubr.msk.f32.gmra.mrb[94].mxu1 %vm72_vm1, %v746_v57  ;;  %v770_v57 = vld [vmem:[%s8303_s0 + $0x108] sm:$0xff] }
  0xc4   :  { %5440 = vmatprep.mubr.msk.f32.mxu1 %vm72_vm1, %v747_v58 }
  0xc7   :  { %5441 = vmatmul.mubr.msk.f32.gmra.mrb[96].mxu1 %vm72_vm1, %v748_v59  ;;  %v771_v59 = vld [vmem:[%s8303_s0 + $0x110] sm:$0xff] }
  0xc8   :  { %5443 = vmatprep.mubr.msk.f32.mxu1 %vm72_vm1, %v749_v60 }
  0xcb   :  { %5444 = vmatmul.mubr.msk.f32.gmra.mrb[98].mxu1 %vm72_vm1, %v750_v61 }
  0xcc   :  { %5446 = vmatprep.mubr.msk.f32.mxu1 %vm72_vm1, %v751_v62 }
  0xcf   :  { %5447 = vmatmul.mubr.msk.f32.gmra.mrb[100].mxu1 %vm72_vm1, %v752_v63 }
  0xd0   :  { %5449 = vmatprep.mubr.msk.f32.mxu1 %vm72_vm1, %v753_v1 }
  0xd3   :  { %5450 = vmatmul.mubr.msk.f32.gmra.mrb[102].mxu1 %vm72_vm1, %v754_v2 }
  0xd4   :  { %5452 = vmatprep.mubr.msk.f32.mxu1 %vm72_vm1, %v755_v4  ;;  %v772_v4 = vld [vmem:[%s8303_s0 + $0x118] sm:$0xff] }
  0xd7   :  { %5453 = vmatmul.mubr.msk.f32.gmra.mrb[104].mxu1 %vm72_vm1, %v756_v5 }
  0xd8   :  { %5455 = vmatprep.mubr.msk.f32.mxu1 %vm72_vm1, %v757_v6  ;;  %v773_v6 = vld [vmem:[%s8303_s0 + $0x120] sm:$0xff] }
  0xda   :  { %v268_v9 = vpop.f32.mrb[0].mxu1 }
  0xdb   :  { %v5294_v10 = vpop.f32.mrb[1].mxu1  ;;  %5456 = vmatmul.mubr.msk.f32.gmra.mrb[106].mxu1 %vm72_vm1, %v758_v7  ;;  %v576_v12 = vmul.f32 %v268_v9, %v268_v9  ;;  %v482_v15 = vsel %vm72_vm1, %v268_v9, 0.0 }
  0xdc   :  { %5458 = vmatprep.mubr.msk.f32.mxu1 %vm72_vm1, %v759_v8 }
  0xdd   :  { %v619_v21 = vsel %vm72_vm1, %v576_v12, 0.0 }
  0xde   :  { %v273_v14 = vpop.f32.mrb[2].mxu1 }
  0xdf   :  { %v483_v16 = vsel %vm72_vm1, %v273_v14, 0.0  ;;  %v577_v17 = vmul.f32 %v273_v14, %v273_v14  ;;  %v5297_v18 = vpop.f32.mrb[3].mxu1  ;;  %5459 = vmatmul.mubr.msk.f32.gmra.mrb[108].mxu1 %vm72_vm1, %v760_v11 }
  0xe0   :  { %v484_v19 = vadd.f32 %v483_v16, %v482_v15  ;;  %5461 = vmatprep.mubr.msk.f32.mxu1 %vm72_vm1, %v761_v13  ;;  %v774_v13 = vld [vmem:[%s8303_s0 + $0x128] sm:$0xff]  ;;  %v775_v15 = vld [vmem:[%s8303_s0 + $0x130] sm:$0xff] }
  0xe1   :  { %v620_v22 = vsel %vm72_vm1, %v577_v17, 0.0 }
  0xe2   :  { %v621_v24 = vadd.f32 %v620_v22, %v619_v21  ;;  %v278_v25 = vpop.f32.mrb[4].mxu1  ;;  %v776_v22 = vld [vmem:[%s8303_s0 + $0x138] sm:$0xff] }
  0xe3   :  { %v485_v26 = vsel %vm72_vm1, %v278_v25, 0.0  ;;  %v578_v27 = vmul.f32 %v278_v25, %v278_v25  ;;  %v5300_v28 = vpop.f32.mrb[5].mxu1  ;;  %5462 = vmatmul.mubr.msk.f32.gmra.mrb[110].mxu1 %vm72_vm1, %v762_v20 }
  0xe4   :  { %v486_v29 = vadd.f32 %v485_v26, %v484_v19  ;;  %5464 = vmatprep.mubr.msk.f32.mxu1 %vm72_vm1, %v763_v23 }
  0xe5   :  { %v622_v31 = vsel %vm72_vm1, %v578_v27, 0.0 }
  0xe6   :  { %v623_v33 = vadd.f32 %v622_v31, %v621_v24  ;;  %v283_v34 = vpop.f32.mrb[6].mxu1  ;;  %v777_v24 = vld [vmem:[%s8303_s0 + $0x140] sm:$0xff]  ;;  %v778_v31 = vld [vmem:[%s8303_s0 + $0x148] sm:$0xff] }
  0xe7   :  { %v487_v35 = vsel %vm72_vm1, %v283_v34, 0.0  ;;  %v579_v36 = vmul.f32 %v283_v34, %v283_v34  ;;  %v5303_v37 = vpop.f32.mrb[7].mxu1  ;;  %5465 = vmatmul.mubr.msk.f32.gmra.mrb[112].mxu1 %vm72_vm1, %v764_v30 }
  0xe8   :  { %v488_v38 = vadd.f32 %v487_v35, %v486_v29  ;;  %5467 = vmatprep.mubr.msk.f32.mxu1 %vm72_vm1, %v765_v32 }
  0xe9   :  { %v624_v40 = vsel %vm72_vm1, %v579_v36, 0.0 }
  0xea   :  { %v625_v42 = vadd.f32 %v624_v40, %v623_v33  ;;  %v288_v43 = vpop.f32.mrb[8].mxu1  ;;  %v779_v33 = vld [vmem:[%s8303_s0 + $0x150] sm:$0xff]  ;;  %v780_v40 = vld [vmem:[%s8303_s0 + $0x158] sm:$0xff] }
  0xeb   :  { %v489_v44 = vsel %vm72_vm1, %v288_v43, 0.0  ;;  %v580_v45 = vmul.f32 %v288_v43, %v288_v43  ;;  %v5306_v46 = vpop.f32.mrb[9].mxu1  ;;  %5468 = vmatmul.mubr.msk.f32.gmra.mrb[114].mxu1 %vm72_vm1, %v766_v39 }
  0xec   :  { %v490_v47 = vadd.f32 %v489_v44, %v488_v38  ;;  %5470 = vmatprep.mubr.msk.f32.mxu1 %vm72_vm1, %v767_v41 }
  0xed   :  { %v626_v49 = vsel %vm72_vm1, %v580_v45, 0.0 }
  0xee   :  { %v627_v51 = vadd.f32 %v626_v49, %v625_v42  ;;  %v293_v52 = vpop.f32.mrb[10].mxu1  ;;  %v781_v42 = vld [vmem:[%s8303_s0 + $0x160] sm:$0xff]  ;;  %v782_v49 = vld [vmem:[%s8303_s0 + $0x168] sm:$0xff] }
  0xef   :  { %v491_v53 = vsel %vm72_vm1, %v293_v52, 0.0  ;;  %v581_v54 = vmul.f32 %v293_v52, %v293_v52  ;;  %v5309_v55 = vpop.f32.mrb[11].mxu1  ;;  %5471 = vmatmul.mubr.msk.f32.gmra.mrb[116].mxu1 %vm72_vm1, %v768_v48 }
  0xf0   :  { %v492_v56 = vadd.f32 %v491_v53, %v490_v47  ;;  %5473 = vmatprep.mubr.msk.f32.mxu1 %vm72_vm1, %v769_v50 }
  0xf1   :  { %v628_v58 = vsel %vm72_vm1, %v581_v54, 0.0 }
  0xf2   :  { %v629_v60 = vadd.f32 %v628_v58, %v627_v51  ;;  %v298_v61 = vpop.f32.mrb[12].mxu1  ;;  %v783_v51 = vld [vmem:[%s8303_s0 + $0x170] sm:$0xff]  ;;  %v784_v58 = vld [vmem:[%s8303_s0 + $0x178] sm:$0xff] }
  0xf3   :  { %v493_v62 = vsel %vm72_vm1, %v298_v61, 0.0  ;;  %v582_v63 = vmul.f32 %v298_v61, %v298_v61  ;;  %v5312_v1 = vpop.f32.mrb[13].mxu1  ;;  %5474 = vmatmul.mubr.msk.f32.gmra.mrb[118].mxu1 %vm72_vm1, %v770_v57 }
  0xf4   :  { %v494_v2 = vadd.f32 %v493_v62, %v492_v56  ;;  %5476 = vmatprep.mubr.msk.f32.mxu1 %vm72_vm1, %v771_v59 }
  0xf5   :  { %v630_v5 = vsel %vm72_vm1, %v582_v63, 0.0 }
  0xf6   :  { %v631_v7 = vadd.f32 %v630_v5, %v629_v60  ;;  %v303_v8 = vpop.f32.mrb[14].mxu1  ;;  %v785_v60 = vld [vmem:[%s8303_s0 + $0x180] sm:$0xff]  ;;  %v786_v5 = vld [vmem:[%s8303_s0 + $0x188] sm:$0xff] }
  0xf7   :  { %v495_v9 = vsel %vm72_vm1, %v303_v8, 0.0  ;;  %v583_v10 = vmul.f32 %v303_v8, %v303_v8  ;;  %v5315_v11 = vpop.f32.mrb[15].mxu1  ;;  %5477 = vmatmul.mubr.msk.f32.gmra.mrb[120].mxu1 %vm72_vm1, %v772_v4 }
  0xf8   :  { %v496_v12 = vadd.f32 %v495_v9, %v494_v2  ;;  %5479 = vmatprep.mubr.msk.f32.mxu1 %vm72_vm1, %v773_v6 }
  0xf9   :  { %v632_v14 = vsel %vm72_vm1, %v583_v10, 0.0 }
  0xfa   :  { %v633_v16 = vadd.f32 %v632_v14, %v631_v7  ;;  %v308_v17 = vpop.f32.mrb[16].mxu1  ;;  %v787_v7 = vld [vmem:[%s8303_s0 + $0x190] sm:$0xff]  ;;  %v788_v14 = vld [vmem:[%s8303_s0 + $0x198] sm:$0xff] }
  0xfb   :  { %v497_v18 = vsel %vm72_vm1, %v308_v17, 0.0  ;;  %v584_v19 = vmul.f32 %v308_v17, %v308_v17  ;;  %v5318_v20 = vpop.f32.mrb[17].mxu1  ;;  %5480 = vmatmul.mubr.msk.f32.gmra.mrb[122].mxu1 %vm72_vm1, %v774_v13 }
  0xfc   :  { %v498_v21 = vadd.f32 %v497_v18, %v496_v12  ;;  %5482 = vmatprep.mubr.msk.f32.mxu1 %vm72_vm1, %v775_v15 }
  0xfd   :  { %v634_v23 = vsel %vm72_vm1, %v584_v19, 0.0 }
  0xfe   :  { %v635_v25 = vadd.f32 %v634_v23, %v633_v16  ;;  %v313_v26 = vpop.f32.mrb[18].mxu1  ;;  %v789_v16 = vld [vmem:[%s8303_s0 + $0x1a0] sm:$0xff]  ;;  %v790_v23 = vld [vmem:[%s8303_s0 + $0x1a8] sm:$0xff] }
  0xff   :  { %v499_v27 = vsel %vm72_vm1, %v313_v26, 0.0  ;;  %v585_v28 = vmul.f32 %v313_v26, %v313_v26  ;;  %v5321_v29 = vpop.f32.mrb[19].mxu1  ;;  %5483 = vmatmul.mubr.msk.f32.gmra.mrb[124].mxu1 %vm72_vm1, %v776_v22 }
 0x100   :  { %v500_v30 = vadd.f32 %v499_v27, %v498_v21  ;;  %5485 = vmatprep.mubr.msk.f32.mxu1 %vm72_vm1, %v777_v24 }
 0x101   :  { %v636_v32 = vsel %vm72_vm1, %v585_v28, 0.0 }
 0x102   :  { %v637_v34 = vadd.f32 %v636_v32, %v635_v25  ;;  %v318_v35 = vpop.f32.mrb[20].mxu1  ;;  %v791_v25 = vld [vmem:[%s8303_s0 + $0x1b0] sm:$0xff]  ;;  %v792_v32 = vld [vmem:[%s8303_s0 + $0x1b8] sm:$0xff] }
 0x103   :  { %v501_v36 = vsel %vm72_vm1, %v318_v35, 0.0  ;;  %v586_v37 = vmul.f32 %v318_v35, %v318_v35  ;;  %v5324_v38 = vpop.f32.mrb[21].mxu1  ;;  %5486 = vmatmul.mubr.msk.f32.gmra.mrb[126].mxu1 %vm72_vm1, %v778_v31 }
 0x104   :  { %v502_v39 = vadd.f32 %v501_v36, %v500_v30  ;;  %5488 = vmatprep.mubr.msk.f32.mxu1 %vm72_vm1, %v779_v33 }
 0x105   :  { %v638_v41 = vsel %vm72_vm1, %v586_v37, 0.0 }
 0x106   :  { %v639_v43 = vadd.f32 %v638_v41, %v637_v34  ;;  %v323_v44 = vpop.f32.mrb[22].mxu1  ;;  %v793_v34 = vld [vmem:[%s8303_s0 + $0x1c0] sm:$0xff]  ;;  %v794_v41 = vld [vmem:[%s8303_s0 + $0x1c8] sm:$0xff] }
 0x107   :  { %v503_v45 = vsel %vm72_vm1, %v323_v44, 0.0  ;;  %v587_v46 = vmul.f32 %v323_v44, %v323_v44  ;;  %v5327_v47 = vpop.f32.mrb[23].mxu1  ;;  %5489 = vmatmul.mubr.msk.f32.gmra.mrb[128].mxu1 %vm72_vm1, %v780_v40 }
 0x108   :  { %v504_v48 = vadd.f32 %v503_v45, %v502_v39  ;;  %5491 = vmatprep.mubr.msk.f32.mxu1 %vm72_vm1, %v781_v42 }
 0x109   :  { %v640_v50 = vsel %vm72_vm1, %v587_v46, 0.0 }
 0x10a   :  { %v641_v52 = vadd.f32 %v640_v50, %v639_v43  ;;  %v328_v53 = vpop.f32.mrb[24].mxu1  ;;  %v795_v43 = vld [vmem:[%s8303_s0 + $0x1d0] sm:$0xff]  ;;  %v796_v50 = vld [vmem:[%s8303_s0 + $0x1d8] sm:$0xff] }
 0x10b   :  { %v505_v54 = vsel %vm72_vm1, %v328_v53, 0.0  ;;  %v588_v55 = vmul.f32 %v328_v53, %v328_v53  ;;  %v5330_v56 = vpop.f32.mrb[25].mxu1  ;;  %5492 = vmatmul.mubr.msk.f32.gmra.mrb[130].mxu1 %vm72_vm1, %v782_v49 }
 0x10c   :  { %v506_v57 = vadd.f32 %v505_v54, %v504_v48  ;;  %5494 = vmatprep.mubr.msk.f32.mxu1 %vm72_vm1, %v783_v51 }
 0x10d   :  { %v642_v59 = vsel %vm72_vm1, %v588_v55, 0.0 }
 0x10e   :  { %v643_v61 = vadd.f32 %v642_v59, %v641_v52  ;;  %v333_v62 = vpop.f32.mrb[26].mxu1  ;;  %v797_v52 = vld [vmem:[%s8303_s0 + $0x1e0] sm:$0xff]  ;;  %v798_v59 = vld [vmem:[%s8303_s0 + $0x1e8] sm:$0xff] }
 0x10f   :  { %v507_v63 = vsel %vm72_vm1, %v333_v62, 0.0  ;;  %v589_v1 = vmul.f32 %v333_v62, %v333_v62  ;;  %v5333_v2 = vpop.f32.mrb[27].mxu1  ;;  %5495 = vmatmul.mubr.msk.f32.gmra.mrb[132].mxu1 %vm72_vm1, %v784_v58 }
 0x110   :  { %v508_v4 = vadd.f32 %v507_v63, %v506_v57  ;;  %5497 = vmatprep.mubr.msk.f32.mxu1 %vm72_vm1, %v785_v60 }
 0x111   :  { %v644_v6 = vsel %vm72_vm1, %v589_v1, 0.0 }
 0x112   :  { %v645_v8 = vadd.f32 %v644_v6, %v643_v61  ;;  %v338_v9 = vpop.f32.mrb[28].mxu1  ;;  %v799_v61 = vld [vmem:[%s8303_s0 + $0x1f0] sm:$0xff]  ;;  %v800_v6 = vld [vmem:[%s8303_s0 + $0x1f8] sm:$0xff] }
 0x113   :  { %v509_v10 = vsel %vm72_vm1, %v338_v9, 0.0  ;;  %v590_v11 = vmul.f32 %v338_v9, %v338_v9  ;;  %v5336_v12 = vpop.f32.mrb[29].mxu1  ;;  %5498 = vmatmul.mubr.msk.f32.gmra.mrb[134].mxu1 %vm72_vm1, %v786_v5 }
 0x114   :  { %v510_v13 = vadd.f32 %v509_v10, %v508_v4  ;;  %5500 = vmatprep.mubr.msk.f32.mxu1 %vm72_vm1, %v787_v7 }
 0x115   :  { %v646_v15 = vsel %vm72_vm1, %v590_v11, 0.0 }
 0x116   :  { %v647_v17 = vadd.f32 %v646_v15, %v645_v8  ;;  %v343_v18 = vpop.f32.mrb[30].mxu1  ;;  %v801_v8 = vld [vmem:[%s8303_s0 + $0x200] sm:$0xff]  ;;  %v802_v15 = vld [vmem:[%s8303_s0 + $0x208] sm:$0xff] }
 0x117   :  { %v511_v19 = vsel %vm72_vm1, %v343_v18, 0.0  ;;  %v591_v20 = vmul.f32 %v343_v18, %v343_v18  ;;  %v5339_v21 = vpop.f32.mrb[31].mxu1  ;;  %5501 = vmatmul.mubr.msk.f32.gmra.mrb[136].mxu1 %vm72_vm1, %v788_v14 }
 0x118   :  { %v512_v22 = vadd.f32 %v511_v19, %v510_v13  ;;  %5503 = vmatprep.mubr.msk.f32.mxu1 %vm72_vm1, %v789_v16 }
 0x119   :  { %v648_v24 = vsel %vm72_vm1, %v591_v20, 0.0 }
 0x11a   :  { %v649_v26 = vadd.f32 %v648_v24, %v647_v17  ;;  %v348_v27 = vpop.f32.mrb[32].mxu1  ;;  %v803_v17 = vld [vmem:[%s8303_s0 + $0x210] sm:$0xff]  ;;  %v804_v24 = vld [vmem:[%s8303_s0 + $0x218] sm:$0xff] }
 0x11b   :  { %v513_v28 = vsel %vm72_vm1, %v348_v27, 0.0  ;;  %v592_v29 = vmul.f32 %v348_v27, %v348_v27  ;;  %v5342_v30 = vpop.f32.mrb[33].mxu1  ;;  %5504 = vmatmul.mubr.msk.f32.gmra.mrb[138].mxu1 %vm72_vm1, %v790_v23 }
 0x11c   :  { %v514_v31 = vadd.f32 %v513_v28, %v512_v22  ;;  %5506 = vmatprep.mubr.msk.f32.mxu1 %vm72_vm1, %v791_v25 }
 0x11d   :  { %v650_v33 = vsel %vm72_vm1, %v592_v29, 0.0 }
 0x11e   :  { %v651_v35 = vadd.f32 %v650_v33, %v649_v26  ;;  %v353_v36 = vpop.f32.mrb[34].mxu1  ;;  %v805_v26 = vld [vmem:[%s8303_s0 + $0x220] sm:$0xff]  ;;  %v806_v33 = vld [vmem:[%s8303_s0 + $0x228] sm:$0xff] }
 0x11f   :  { %v515_v37 = vsel %vm72_vm1, %v353_v36, 0.0  ;;  %v593_v38 = vmul.f32 %v353_v36, %v353_v36  ;;  %v5345_v39 = vpop.f32.mrb[35].mxu1  ;;  %5507 = vmatmul.mubr.msk.f32.gmra.mrb[140].mxu1 %vm72_vm1, %v792_v32 }
 0x120   :  { %v516_v40 = vadd.f32 %v515_v37, %v514_v31  ;;  %5509 = vmatprep.mubr.msk.f32.mxu1 %vm72_vm1, %v793_v34 }
 0x121   :  { %v652_v42 = vsel %vm72_vm1, %v593_v38, 0.0 }
 0x122   :  { %v653_v44 = vadd.f32 %v652_v42, %v651_v35  ;;  %v358_v45 = vpop.f32.mrb[36].mxu1  ;;  %v807_v35 = vld [vmem:[%s8303_s0 + $0x230] sm:$0xff]  ;;  %v808_v42 = vld [vmem:[%s8303_s0 + $0x238] sm:$0xff] }
 0x123   :  { %v517_v46 = vsel %vm72_vm1, %v358_v45, 0.0  ;;  %v594_v47 = vmul.f32 %v358_v45, %v358_v45  ;;  %v5348_v48 = vpop.f32.mrb[37].mxu1  ;;  %5510 = vmatmul.mubr.msk.f32.gmra.mrb[142].mxu1 %vm72_vm1, %v794_v41 }
 0x124   :  { %v518_v49 = vadd.f32 %v517_v46, %v516_v40  ;;  %5512 = vmatprep.mubr.msk.f32.mxu1 %vm72_vm1, %v795_v43 }
 0x125   :  { %v654_v51 = vsel %vm72_vm1, %v594_v47, 0.0 }
 0x126   :  { %v655_v53 = vadd.f32 %v654_v51, %v653_v44  ;;  %v363_v54 = vpop.f32.mrb[38].mxu1  ;;  %v809_v44 = vld [vmem:[%s8303_s0 + $0x240] sm:$0xff]  ;;  %v810_v51 = vld [vmem:[%s8303_s0 + $0x248] sm:$0xff] }
 0x127   :  { %v519_v55 = vsel %vm72_vm1, %v363_v54, 0.0  ;;  %v595_v56 = vmul.f32 %v363_v54, %v363_v54  ;;  %v5351_v57 = vpop.f32.mrb[39].mxu1  ;;  %5513 = vmatmul.mubr.msk.f32.gmra.mrb[144].mxu1 %vm72_vm1, %v796_v50 }
 0x128   :  { %v520_v58 = vadd.f32 %v519_v55, %v518_v49  ;;  %5515 = vmatprep.mubr.msk.f32.mxu1 %vm72_vm1, %v797_v52 }
 0x129   :  { %v656_v60 = vsel %vm72_vm1, %v595_v56, 0.0 }
 0x12a   :  { %v657_v62 = vadd.f32 %v656_v60, %v655_v53  ;;  %v368_v63 = vpop.f32.mrb[40].mxu1  ;;  %v811_v53 = vld [vmem:[%s8303_s0 + $0x250] sm:$0xff]  ;;  %v812_v60 = vld [vmem:[%s8303_s0 + $0x258] sm:$0xff] }
 0x12b   :  { %v521_v1 = vsel %vm72_vm1, %v368_v63, 0.0  ;;  %v596_v2 = vmul.f32 %v368_v63, %v368_v63  ;;  %v5354_v4 = vpop.f32.mrb[41].mxu1  ;;  %5516 = vmatmul.mubr.msk.f32.gmra.mrb[146].mxu1 %vm72_vm1, %v798_v59 }
 0x12c   :  { %v522_v5 = vadd.f32 %v521_v1, %v520_v58  ;;  %5518 = vmatprep.mubr.msk.f32.mxu1 %vm72_vm1, %v799_v61 }
 0x12d   :  { %v658_v7 = vsel %vm72_vm1, %v596_v2, 0.0 }
 0x12e   :  { %v659_v9 = vadd.f32 %v658_v7, %v657_v62  ;;  %v373_v10 = vpop.f32.mrb[42].mxu1  ;;  %v813_v62 = vld [vmem:[%s8303_s0 + $0x260] sm:$0xff]  ;;  %v814_v7 = vld [vmem:[%s8303_s0 + $0x268] sm:$0xff] }
 0x12f   :  { %v523_v11 = vsel %vm72_vm1, %v373_v10, 0.0  ;;  %v597_v12 = vmul.f32 %v373_v10, %v373_v10  ;;  %v5357_v13 = vpop.f32.mrb[43].mxu1  ;;  %5519 = vmatmul.mubr.msk.f32.gmra.mrb[148].mxu1 %vm72_vm1, %v800_v6 }
 0x130   :  { %v524_v14 = vadd.f32 %v523_v11, %v522_v5  ;;  %5521 = vmatprep.mubr.msk.f32.mxu1 %vm72_vm1, %v801_v8 }
 0x131   :  { %v660_v16 = vsel %vm72_vm1, %v597_v12, 0.0 }
 0x132   :  { %v661_v18 = vadd.f32 %v660_v16, %v659_v9  ;;  %v378_v19 = vpop.f32.mrb[44].mxu1  ;;  %v815_v9 = vld [vmem:[%s8303_s0 + $0x270] sm:$0xff]  ;;  %v816_v16 = vld [vmem:[%s8303_s0 + $0x278] sm:$0xff] }
 0x133   :  { %v525_v20 = vsel %vm72_vm1, %v378_v19, 0.0  ;;  %v598_v21 = vmul.f32 %v378_v19, %v378_v19  ;;  %v5360_v22 = vpop.f32.mrb[45].mxu1  ;;  %5522 = vmatmul.mubr.msk.f32.gmra.mrb[150].mxu1 %vm72_vm1, %v802_v15 }
 0x134   :  { %v526_v23 = vadd.f32 %v525_v20, %v524_v14  ;;  %5524 = vmatprep.mubr.msk.f32.mxu1 %vm72_vm1, %v803_v17 }
 0x135   :  { %v662_v25 = vsel %vm72_vm1, %v598_v21, 0.0 }
 0x136   :  { %v663_v27 = vadd.f32 %v662_v25, %v661_v18  ;;  %v383_v28 = vpop.f32.mrb[46].mxu1  ;;  %v817_v18 = vld [vmem:[%s8303_s0 + $0x280] sm:$0xff]  ;;  %v818_v25 = vld [vmem:[%s8303_s0 + $0x288] sm:$0xff] }
 0x137   :  { %v527_v29 = vsel %vm72_vm1, %v383_v28, 0.0  ;;  %v599_v30 = vmul.f32 %v383_v28, %v383_v28  ;;  %v5363_v31 = vpop.f32.mrb[47].mxu1  ;;  %5525 = vmatmul.mubr.msk.f32.gmra.mrb[152].mxu1 %vm72_vm1, %v804_v24 }
 0x138   :  { %v528_v32 = vadd.f32 %v527_v29, %v526_v23  ;;  %5527 = vmatprep.mubr.msk.f32.mxu1 %vm72_vm1, %v805_v26 }
 0x139   :  { %v664_v34 = vsel %vm72_vm1, %v599_v30, 0.0 }
 0x13a   :  { %v665_v36 = vadd.f32 %v664_v34, %v663_v27  ;;  %v388_v37 = vpop.f32.mrb[48].mxu1  ;;  %v819_v27 = vld [vmem:[%s8303_s0 + $0x290] sm:$0xff]  ;;  %v820_v34 = vld [vmem:[%s8303_s0 + $0x298] sm:$0xff] }
 0x13b   :  { %v529_v38 = vsel %vm72_vm1, %v388_v37, 0.0  ;;  %v600_v39 = vmul.f32 %v388_v37, %v388_v37  ;;  %v5366_v40 = vpop.f32.mrb[49].mxu1  ;;  %5528 = vmatmul.mubr.msk.f32.gmra.mrb[154].mxu1 %vm72_vm1, %v806_v33 }
 0x13c   :  { %v530_v41 = vadd.f32 %v529_v38, %v528_v32  ;;  %5530 = vmatprep.mubr.msk.f32.mxu1 %vm72_vm1, %v807_v35 }
 0x13d   :  { %v666_v43 = vsel %vm72_vm1, %v600_v39, 0.0 }
 0x13e   :  { %v667_v45 = vadd.f32 %v666_v43, %v665_v36  ;;  %v393_v46 = vpop.f32.mrb[50].mxu1  ;;  %v821_v36 = vld [vmem:[%s8303_s0 + $0x2a0] sm:$0xff]  ;;  %v822_v43 = vld [vmem:[%s8303_s0 + $0x2a8] sm:$0xff] }
 0x13f   :  { %v531_v47 = vsel %vm72_vm1, %v393_v46, 0.0  ;;  %v601_v48 = vmul.f32 %v393_v46, %v393_v46  ;;  %v5369_v49 = vpop.f32.mrb[51].mxu1  ;;  %5531 = vmatmul.mubr.msk.f32.gmra.mrb[156].mxu1 %vm72_vm1, %v808_v42 }
 0x140   :  { %v532_v50 = vadd.f32 %v531_v47, %v530_v41  ;;  %5533 = vmatprep.mubr.msk.f32.mxu1 %vm72_vm1, %v809_v44 }
 0x141   :  { %v668_v52 = vsel %vm72_vm1, %v601_v48, 0.0 }
 0x142   :  { %v669_v54 = vadd.f32 %v668_v52, %v667_v45  ;;  %v398_v55 = vpop.f32.mrb[52].mxu1  ;;  %v823_v45 = vld [vmem:[%s8303_s0 + $0x2b0] sm:$0xff]  ;;  %v824_v52 = vld [vmem:[%s8303_s0 + $0x2b8] sm:$0xff] }
 0x143   :  { %v533_v56 = vsel %vm72_vm1, %v398_v55, 0.0  ;;  %v602_v57 = vmul.f32 %v398_v55, %v398_v55  ;;  %v5372_v58 = vpop.f32.mrb[53].mxu1  ;;  %5534 = vmatmul.mubr.msk.f32.gmra.mrb[158].mxu1 %vm72_vm1, %v810_v51 }
 0x144   :  { %v534_v59 = vadd.f32 %v533_v56, %v532_v50  ;;  %5536 = vmatprep.mubr.msk.f32.mxu1 %vm72_vm1, %v811_v53 }
 0x145   :  { %v670_v61 = vsel %vm72_vm1, %v602_v57, 0.0 }
 0x146   :  { %v671_v63 = vadd.f32 %v670_v61, %v669_v54  ;;  %v403_v1 = vpop.f32.mrb[54].mxu1  ;;  %v825_v54 = vld [vmem:[%s8303_s0 + $0x2c0] sm:$0xff]  ;;  %v826_v61 = vld [vmem:[%s8303_s0 + $0x2c8] sm:$0xff] }
 0x147   :  { %v535_v2 = vsel %vm72_vm1, %v403_v1, 0.0  ;;  %v603_v4 = vmul.f32 %v403_v1, %v403_v1  ;;  %v5375_v5 = vpop.f32.mrb[55].mxu1  ;;  %5537 = vmatmul.mubr.msk.f32.gmra.mrb[160].mxu1 %vm72_vm1, %v812_v60 }
 0x148   :  { %v536_v6 = vadd.f32 %v535_v2, %v534_v59  ;;  %5539 = vmatprep.mubr.msk.f32.mxu1 %vm72_vm1, %v813_v62 }
 0x149   :  { %v672_v8 = vsel %vm72_vm1, %v603_v4, 0.0 }
 0x14a   :  { %v673_v10 = vadd.f32 %v672_v8, %v671_v63  ;;  %v408_v11 = vpop.f32.mrb[56].mxu1  ;;  %v827_v63 = vld [vmem:[%s8303_s0 + $0x2d0] sm:$0xff]  ;;  %v828_v8 = vld [vmem:[%s8303_s0 + $0x2d8] sm:$0xff] }
 0x14b   :  { %v537_v12 = vsel %vm72_vm1, %v408_v11, 0.0  ;;  %v604_v13 = vmul.f32 %v408_v11, %v408_v11  ;;  %v5378_v14 = vpop.f32.mrb[57].mxu1  ;;  %5540 = vmatmul.mubr.msk.f32.gmra.mrb[162].mxu1 %vm72_vm1, %v814_v7 }
 0x14c   :  { %v538_v15 = vadd.f32 %v537_v12, %v536_v6  ;;  %5542 = vmatprep.mubr.msk.f32.mxu1 %vm72_vm1, %v815_v9 }
 0x14d   :  { %v674_v17 = vsel %vm72_vm1, %v604_v13, 0.0 }
 0x14e   :  { %v675_v19 = vadd.f32 %v674_v17, %v673_v10  ;;  %v413_v20 = vpop.f32.mrb[58].mxu1  ;;  %v829_v10 = vld [vmem:[%s8303_s0 + $0x2e0] sm:$0xff]  ;;  %v830_v17 = vld [vmem:[%s8303_s0 + $0x2e8] sm:$0xff] }
 0x14f   :  { %v539_v21 = vsel %vm72_vm1, %v413_v20, 0.0  ;;  %v605_v22 = vmul.f32 %v413_v20, %v413_v20  ;;  %v5381_v23 = vpop.f32.mrb[59].mxu1  ;;  %5543 = vmatmul.mubr.msk.f32.gmra.mrb[164].mxu1 %vm72_vm1, %v816_v16 }
 0x150   :  { %v540_v24 = vadd.f32 %v539_v21, %v538_v15  ;;  %5545 = vmatprep.mubr.msk.f32.mxu1 %vm72_vm1, %v817_v18 }
 0x151   :  { %v676_v26 = vsel %vm72_vm1, %v605_v22, 0.0 }
 0x152   :  { %v677_v28 = vadd.f32 %v676_v26, %v675_v19  ;;  %v418_v29 = vpop.f32.mrb[60].mxu1  ;;  %v831_v19 = vld [vmem:[%s8303_s0 + $0x2f0] sm:$0xff]  ;;  %v832_v26 = vld [vmem:[%s8303_s0 + $0x2f8] sm:$0xff] }
 0x153   :  { %v541_v30 = vsel %vm72_vm1, %v418_v29, 0.0  ;;  %v606_v31 = vmul.f32 %v418_v29, %v418_v29  ;;  %v5384_v32 = vpop.f32.mrb[61].mxu1  ;;  %5546 = vmatmul.mubr.msk.f32.gmra.mrb[166].mxu1 %vm72_vm1, %v818_v25 }
 0x154   :  { %v542_v33 = vadd.f32 %v541_v30, %v540_v24  ;;  %5548 = vmatprep.mubr.msk.f32.mxu1 %vm72_vm1, %v819_v27 }
 0x155   :  { %v678_v35 = vsel %vm72_vm1, %v606_v31, 0.0 }
 0x156   :  { %v679_v37 = vadd.f32 %v678_v35, %v677_v28  ;;  %v423_v38 = vpop.f32.mrb[62].mxu1  ;;  %v833_v28 = vld [vmem:[%s8303_s0 + $0x300] sm:$0xff]  ;;  %v834_v35 = vld [vmem:[%s8303_s0 + $0x308] sm:$0xff] }
 0x157   :  { %v543_v39 = vsel %vm72_vm1, %v423_v38, 0.0  ;;  %v607_v40 = vmul.f32 %v423_v38, %v423_v38  ;;  %v5387_v41 = vpop.f32.mrb[63].mxu1  ;;  %5549 = vmatmul.mubr.msk.f32.gmra.mrb[168].mxu1 %vm72_vm1, %v820_v34 }
 0x158   :  { %v544_v42 = vadd.f32 %v543_v39, %v542_v33  ;;  %5551 = vmatprep.mubr.msk.f32.mxu1 %vm72_vm1, %v821_v36 }
 0x159   :  { %v680_v44 = vsel %vm72_vm1, %v607_v40, 0.0 }
 0x15a   :  { %v681_v46 = vadd.f32 %v680_v44, %v679_v37  ;;  %v428_v47 = vpop.f32.mrb[64].mxu1  ;;  %v835_v37 = vld [vmem:[%s8303_s0 + $0x310] sm:$0xff]  ;;  %v836_v44 = vld [vmem:[%s8303_s0 + $0x318] sm:$0xff] }
 0x15b   :  { %v545_v48 = vsel %vm72_vm1, %v428_v47, 0.0  ;;  %v608_v49 = vmul.f32 %v428_v47, %v428_v47  ;;  %v5390_v50 = vpop.f32.mrb[65].mxu1  ;;  %5552 = vmatmul.mubr.msk.f32.gmra.mrb[170].mxu1 %vm72_vm1, %v822_v43 }
 0x15c   :  { %v546_v51 = vadd.f32 %v545_v48, %v544_v42  ;;  %5554 = vmatprep.mubr.msk.f32.mxu1 %vm72_vm1, %v823_v45 }
 0x15d   :  { %v682_v53 = vsel %vm72_vm1, %v608_v49, 0.0 }
 0x15e   :  { %v683_v55 = vadd.f32 %v682_v53, %v681_v46  ;;  %v433_v56 = vpop.f32.mrb[66].mxu1  ;;  %v837_v46 = vld [vmem:[%s8303_s0 + $0x320] sm:$0xff]  ;;  %v838_v53 = vld [vmem:[%s8303_s0 + $0x328] sm:$0xff] }
 0x15f   :  { %v547_v57 = vsel %vm72_vm1, %v433_v56, 0.0  ;;  %v609_v58 = vmul.f32 %v433_v56, %v433_v56  ;;  %v5393_v59 = vpop.f32.mrb[67].mxu1  ;;  %5555 = vmatmul.mubr.msk.f32.gmra.mrb[172].mxu1 %vm72_vm1, %v824_v52 }
 0x160   :  { %v548_v60 = vadd.f32 %v547_v57, %v546_v51  ;;  %5557 = vmatprep.mubr.msk.f32.mxu1 %vm72_vm1, %v825_v54 }
 0x161   :  { %v684_v62 = vsel %vm72_vm1, %v609_v58, 0.0 }
 0x162   :  { %v685_v1 = vadd.f32 %v684_v62, %v683_v55  ;;  %v438_v2 = vpop.f32.mrb[68].mxu1  ;;  %v839_v55 = vld [vmem:[%s8303_s0 + $0x330] sm:$0xff]  ;;  %v840_v62 = vld [vmem:[%s8303_s0 + $0x338] sm:$0xff] }
 0x163   :  { %v549_v4 = vsel %vm72_vm1, %v438_v2, 0.0  ;;  %v610_v5 = vmul.f32 %v438_v2, %v438_v2  ;;  %v5396_v6 = vpop.f32.mrb[69].mxu1  ;;  %5558 = vmatmul.mubr.msk.f32.gmra.mrb[174].mxu1 %vm72_vm1, %v826_v61 }
 0x164   :  { %v550_v7 = vadd.f32 %v549_v4, %v548_v60  ;;  %5560 = vmatprep.mubr.msk.f32.mxu1 %vm72_vm1, %v827_v63 }
 0x165   :  { %v686_v9 = vsel %vm72_vm1, %v610_v5, 0.0 }
 0x166   :  { %v687_v11 = vadd.f32 %v686_v9, %v685_v1  ;;  %v443_v12 = vpop.f32.mrb[70].mxu1  ;;  %v841_v1 = vld [vmem:[%s8303_s0 + $0x340] sm:$0xff]  ;;  %v842_v9 = vld [vmem:[%s8303_s0 + $0x348] sm:$0xff] }
 0x167   :  { %v551_v13 = vsel %vm72_vm1, %v443_v12, 0.0  ;;  %v611_v14 = vmul.f32 %v443_v12, %v443_v12  ;;  %v5399_v15 = vpop.f32.mrb[71].mxu1  ;;  %5561 = vmatmul.mubr.msk.f32.gmra.mrb[176].mxu1 %vm72_vm1, %v828_v8 }
 0x168   :  { %v552_v16 = vadd.f32 %v551_v13, %v550_v7  ;;  %5563 = vmatprep.mubr.msk.f32.mxu1 %vm72_vm1, %v829_v10 }
 0x169   :  { %v688_v18 = vsel %vm72_vm1, %v611_v14, 0.0 }
 0x16a   :  { %v689_v20 = vadd.f32 %v688_v18, %v687_v11  ;;  %v448_v21 = vpop.f32.mrb[72].mxu1  ;;  %v843_v11 = vld [vmem:[%s8303_s0 + $0x350] sm:$0xff]  ;;  %v844_v18 = vld [vmem:[%s8303_s0 + $0x358] sm:$0xff] }
 0x16b   :  { %v553_v22 = vsel %vm72_vm1, %v448_v21, 0.0  ;;  %v612_v23 = vmul.f32 %v448_v21, %v448_v21  ;;  %v5402_v24 = vpop.f32.mrb[73].mxu1  ;;  %5564 = vmatmul.mubr.msk.f32.gmra.mrb[178].mxu1 %vm72_vm1, %v830_v17 }
 0x16c   :  { %v554_v25 = vadd.f32 %v553_v22, %v552_v16  ;;  %5566 = vmatprep.mubr.msk.f32.mxu1 %vm72_vm1, %v831_v19 }
 0x16d   :  { %v690_v27 = vsel %vm72_vm1, %v612_v23, 0.0 }
 0x16e   :  { %v691_v29 = vadd.f32 %v690_v27, %v689_v20  ;;  %v453_v30 = vpop.f32.mrb[74].mxu1  ;;  %v845_v20 = vld [vmem:[%s8303_s0 + $0x360] sm:$0xff]  ;;  %v846_v27 = vld [vmem:[%s8303_s0 + $0x368] sm:$0xff] }
 0x16f   :  { %v555_v31 = vsel %vm72_vm1, %v453_v30, 0.0  ;;  %v613_v32 = vmul.f32 %v453_v30, %v453_v30  ;;  %v5405_v33 = vpop.f32.mrb[75].mxu1  ;;  %5567 = vmatmul.mubr.msk.f32.gmra.mrb[180].mxu1 %vm72_vm1, %v832_v26 }
 0x170   :  { %v556_v34 = vadd.f32 %v555_v31, %v554_v25  ;;  %5569 = vmatprep.mubr.msk.f32.mxu1 %vm72_vm1, %v833_v28  ;;  %v847_v28 = vld [vmem:[%s8303_s0 + $0x370] sm:$0xff] }
 0x171   :  { %v692_v36 = vsel %vm72_vm1, %v613_v32, 0.0 }
 0x172   :  { %v693_v38 = vadd.f32 %v692_v36, %v691_v29  ;;  %v458_v39 = vpop.f32.mrb[76].mxu1 }
 0x173   :  { %v557_v40 = vsel %vm72_vm1, %v458_v39, 0.0  ;;  %v614_v41 = vmul.f32 %v458_v39, %v458_v39  ;;  %v5408_v42 = vpop.f32.mrb[77].mxu1  ;;  %5570 = vmatmul.mubr.msk.f32.gmra.mrb[182].mxu1 %vm72_vm1, %v834_v35  ;;  %v848_v35 = vld [vmem:[%s8303_s0 + $0x378] sm:$0xff] }
 0x174   :  { %v558_v43 = vadd.f32 %v557_v40, %v556_v34  ;;  %5572 = vmatprep.mubr.msk.f32.mxu1 %vm72_vm1, %v835_v37 }
 0x175   :  { %v694_v45 = vsel %vm72_vm1, %v614_v41, 0.0 }
 0x176   :  { %v695_v47 = vadd.f32 %v694_v45, %v693_v38  ;;  %v463_v48 = vpop.f32.mrb[78].mxu1 }
 0x177   :  { %v559_v49 = vsel %vm72_vm1, %v463_v48, 0.0  ;;  %v615_v50 = vmul.f32 %v463_v48, %v463_v48  ;;  %v5411_v51 = vpop.f32.mrb[79].mxu1  ;;  %5573 = vmatmul.mubr.msk.f32.gmra.mrb[184].mxu1 %vm72_vm1, %v836_v44 }
 0x178   :  { %v560_v52 = vadd.f32 %v559_v49, %v558_v43  ;;  %5575 = vmatprep.mubr.msk.f32.mxu1 %vm72_vm1, %v837_v46 }
 0x179   :  { %v696_v54 = vsel %vm72_vm1, %v615_v50, 0.0 }
 0x17a   :  { %v697_v56 = vadd.f32 %v696_v54, %v695_v47  ;;  %v468_v57 = vpop.f32.mrb[80].mxu1 }
 0x17b   :  { %v561_v58 = vsel %vm72_vm1, %v468_v57, 0.0  ;;  %v616_v59 = vmul.f32 %v468_v57, %v468_v57  ;;  %v5414_v60 = vpop.f32.mrb[81].mxu1  ;;  %5576 = vmatmul.mubr.msk.f32.gmra.mrb[186].mxu1 %vm72_vm1, %v838_v53 }
 0x17c   :  { %v562_v61 = vadd.f32 %v561_v58, %v560_v52  ;;  %5578 = vmatprep.mubr.msk.f32.mxu1 %vm72_vm1, %v839_v55  ;;  %v6297_v60 = vmov 1966171168  }
 0x17d   :  { %v698_v63 = vsel %vm72_vm1, %v616_v59, 0.0  ;;  %v7181_v59 = vld [vmem:[%s8304_s6] sm:$0x1] }
 0x17e   :  { %v699_v2 = vadd.f32 %v698_v63, %v697_v56  ;;  %v473_v4 = vpop.f32.mrb[82].mxu1  ;;  %v722_v63 = vlaneseq }
 0x17f   :  { %v563_v5 = vsel %vm72_vm1, %v473_v4, 0.0  ;;  %v617_v6 = vmul.f32 %v473_v4, %v473_v4  ;;  %v5417_v7 = vpop.f32.mrb[83].mxu1  ;;  %5579 = vmatmul.mubr.msk.f32.gmra.mrb[188].mxu1 %vm72_vm1, %v840_v62 }
 0x180   :  { %v564_v8 = vadd.f32 %v563_v5, %v562_v61  ;;  %5581 = vmatprep.mubr.msk.f32.mxu1 %vm72_vm1, %v841_v1  ;;  %v720_v61 = vunpack.c.l.s4 %v6297_v60  ;;  %v7191_v7 = vshrl.u32 %v722_v63, 7 }
 0x181   :  { %v700_v10 = vsel %vm72_vm1, %v617_v6, 0.0 }
 0x182   :  { %v701_v12 = vadd.f32 %v700_v10, %v699_v2  ;;  %v478_v13 = vpop.f32.mrb[84].mxu1  ;;  %v721_v5 = vunpack.c.0.s8 %v720_v61 }
 0x183   :  { %v566_v14 = vsel %vm565_vm2, %v478_v13, 0.0  ;;  %v618_v15 = vmul.f32 %v478_v13, %v478_v13  ;;  %v5420_v16 = vpop.f32.mrb[85].mxu1  ;;  %5582 = vmatmul.mubr.msk.f32.gmra.mrb[190].mxu1 %vm72_vm1, %v842_v9 }
 0x184   :  { %v567_v17 = vadd.f32 %v566_v14, %v564_v8  ;;  %5584 = vmatprep.mubr.msk.f32.mxu1 %vm72_vm1, %v843_v11  ;;  %v7198_v10 = vsub.s32 %v721_v5, %v7191_v7 }
 0x185   :  { %v702_v19 = vsel %vm565_vm2, %v618_v15, 0.0 }
 0x186   :  { %v568_v21 = vrot.slane %v567_v17, 4  ;;  %v703_v22 = vadd.f32 %v702_v19, %v701_v12  ;;  %v7130_v23 = vpop.f32.mrb[86].mxu1  ;;  %8317 = vst [vmem:[#allocation2_spill] sm:$0xff] %v7198_v10 }
 0x187   :  { %5585 = vmatmul.mubr.msk.f32.gmra.mrb[192].mxu1 %vm72_vm1, %v844_v18  ;;  %v7133_v24 = vpop.f32.mrb[87].mxu1 }
 0x188   :  { %v569_v25 = vadd.f32 %v568_v21, %v567_v17  ;;  %v704_v26 = vrot.slane %v703_v22, 4  ;;  %5587 = vmatprep.mubr.msk.f32.mxu1 %vm72_vm1, %v845_v20 }
 0x18a   :  { %v570_v29 = vrot.slane %v569_v25, 2  ;;  %v705_v30 = vadd.f32 %v704_v26, %v703_v22  ;;  %v7142_v31 = vpop.f32.mrb[88].mxu1 }
 0x18b   :  { %5588 = vmatmul.mubr.msk.f32.gmra.mrb[194].mxu1 %vm72_vm1, %v846_v27  ;;  %v7145_v32 = vpop.f32.mrb[89].mxu1 }
 0x18c   :  { %v571_v33 = vadd.f32 %v570_v29, %v569_v25  ;;  %v706_v34 = vrot.slane %v705_v30, 2  ;;  %5590 = vmatprep.mubr.msk.f32.mxu1 %vm72_vm1, %v847_v28 }
 0x18e   :  { %v572_v36 = vrot.slane %v571_v33, 1  ;;  %v707_v37 = vadd.f32 %v706_v34, %v705_v30  ;;  %v7151_v38 = vpop.f32.mrb[90].mxu1 }
 0x18f   :  { %5591 = vmatmul.mubr.msk.f32.gmra.mrb[196].mxu1 %vm72_vm1, %v848_v35  ;;  %v7154_v39 = vpop.f32.mrb[91].mxu1 }
 0x190   :  { %v708_v40 = vrot.slane %v707_v37, 1  ;;  %v573_v41 = vadd.f32 %v572_v36, %v571_v33  ;;  %5600 = vmatprep.mubr.msk.f32.mxu1 %vm6295_vm0, %v8309_v3 }
 0x192   :  { %v709_v42 = vadd.f32 %v708_v40, %v707_v37  ;;  %v575_v43 = vmul.f32 0.00295858, %v573_v41  ;;  %v7158_v44 = vpop.f32.mrb[92].mxu1 }
 0x193   :  { %v7160_v45 = vpop.f32.mrb[93].mxu1 }
 0x194   :  { %v710_v46 = vmul.f32 0.00295858, %v709_v42  ;;  %v711_v47 = vmul.f32 %v575_v43, %v575_v43 }
 0x196   :  { %v712_v48 = vsub.f32 %v710_v46, %v711_v47  ;;  %v7162_v49 = vpop.f32.mrb[94].mxu1 }
 0x197   :  { %v7164_v50 = vpop.f32.mrb[95].mxu1 }
 0x198   :  { %v713_v51 = vmax.f32 %v712_v48, 0.0 }
 0x19a   :  { %v714_v52 = vadd.f32 1e-05, %v713_v51  ;;  %v7166_v53 = vpop.f32.mrb[96].mxu1 }
 0x19b   :  { %v7168_v54 = vpop.f32.mrb[97].mxu1 }
 0x19c   :  { %6289 = vrsqrt.f32 %v714_v52 }
 0x19e   :  { %v7170_v55 = vpop.f32.mrb[98].mxu1 }
 0x19f   :  { %v7172_v56 = vpop.f32.mrb[99].mxu1 }
 0x1a2   :  { %v7174_v57 = vpop.f32.mrb[100].mxu1 }
 0x1a3   :  { %v7176_v58 = vpop.f32.mrb[101].mxu1 }
 0x1a6   :  { %v6290_v62 = vpop.eup %6289  ;;  %v7183_v1 = vpop.f32.mrb[102].mxu1 }
 0x1a7   :  { %v7186_v2 = vmul.f32 %v6290_v62, %v7181_v59  ;;  %v7188_v4 = vpop.f32.mrb[103].mxu1 }
 0x1a9   :  { %v717_v6 = vmul.f32 %v7186_v2, %v575_v43 }
 0x1aa   :  { %v7193_v8 = vpop.f32.mrb[104].mxu1 }
 0x1ab   :  { %v7195_v9 = vpop.f32.mrb[105].mxu1  ;;  %v725_v13 = vrot.slane %v717_v6, %v7198_v10 }
 0x1ad   :  { %v732_v14 = vrot.slane %v725_v13, %v7198_v10 }
 0x1ae   :  { %v7200_v11 = vpop.f32.mrb[106].mxu1 }
 0x1af   :  { %v7202_v12 = vpop.f32.mrb[107].mxu1  ;;  %733 = vrot.lane.b32.xlu0 %v732_v14, %s6298_s18 }
 0x1b2   :  { %v7206_v15 = vpop.f32.mrb[108].mxu1 }
 0x1b3   :  { %v7208_v16 = vpop.f32.mrb[109].mxu1 }
 0x1b6   :  { %v7210_v17 = vpop.f32.mrb[110].mxu1 }
 0x1b7   :  { %v7212_v18 = vpop.f32.mrb[111].mxu1 }
 0x1ba   :  { %v7214_v19 = vpop.f32.mrb[112].mxu1 }
 0x1bb   :  { %v7216_v20 = vpop.f32.mrb[113].mxu1 }
 0x1be   :  { %v7218_v21 = vpop.f32.mrb[114].mxu1 }
 0x1bf   :  { %v7220_v22 = vpop.f32.mrb[115].mxu1 }
 0x1c2   :  { %v7222_v25 = vpop.f32.mrb[116].mxu1 }
 0x1c3   :  { %v7224_v26 = vpop.f32.mrb[117].mxu1 }
 0x1c6   :  { %v7226_v27 = vpop.f32.mrb[118].mxu1 }
 0x1c7   :  { %v7228_v28 = vpop.f32.mrb[119].mxu1 }
 0x1ca   :  { %v7230_v29 = vpop.f32.mrb[120].mxu1 }
 0x1cb   :  { %v7232_v30 = vpop.f32.mrb[121].mxu1 }
 0x1ce   :  { %v7234_v33 = vpop.f32.mrb[122].mxu1 }
 0x1cf   :  { %v7236_v34 = vpop.f32.mrb[123].mxu1 }
 0x1d2   :  { %v7238_v35 = vpop.f32.mrb[124].mxu1 }
 0x1d3   :  { %v7240_v36 = vpop.f32.mrb[125].mxu1 }
 0x1d6   :  { %v7242_v37 = vpop.f32.mrb[126].mxu1 }
 0x1d7   :  { %v7244_v40 = vpop.f32.mrb[127].mxu1 }
 0x1da   :  { %v7246_v41 = vpop.f32.mrb[128].mxu1 }
 0x1db   :  { %v7248_v42 = vpop.f32.mrb[129].mxu1 }
 0x1de   :  { %v7250_v43 = vpop.f32.mrb[130].mxu1 }
 0x1df   :  { %v7252_v46 = vpop.f32.mrb[131].mxu1 }
 0x1e2   :  { %v7254_v47 = vpop.f32.mrb[132].mxu1 }
 0x1e3   :  { %v7256_v48 = vpop.f32.mrb[133].mxu1 }
 0x1e6   :  { %v7258_v51 = vpop.f32.mrb[134].mxu1 }
 0x1e7   :  { %8318 = vst [vmem:[#allocation3_spill] sm:$0xff] %v7258_v51  ;;  %v7260_v52 = vpop.f32.mrb[135].mxu1 }
 0x1e8   :  { %8319 = vst [vmem:[#allocation4_spill] sm:$0xff] %v7260_v52 }
 0x1ea   :  { %v7262_v60 = vpop.f32.mrb[136].mxu1 }
 0x1eb   :  { %8320 = vst [vmem:[#allocation5_spill] sm:$0xff] %v7262_v60  ;;  %v7264_v61 = vpop.f32.mrb[137].mxu1 }
 0x1ec   :  { %8321 = vst [vmem:[#allocation6_spill] sm:$0xff] %v7264_v61 }
 0x1ee   :  { %v7266_v62 = vpop.f32.mrb[138].mxu1 }
 0x1ef   :  { %8322 = vst [vmem:[#allocation7_spill] sm:$0xff] %v7266_v62  ;;  %v7268_v63 = vpop.f32.mrb[139].mxu1 }
 0x1f0   :  { %8323 = vst [vmem:[#allocation8_spill] sm:$0xff] %v7268_v63 }
 0x1f2   :  { %v7270_v5 = vpop.f32.mrb[140].mxu1 }
 0x1f3   :  { %8324 = vst [vmem:[#allocation9_spill] sm:$0xff] %v7270_v5  ;;  %v7272_v6 = vpop.f32.mrb[141].mxu1 }
 0x1f4   :  { %8325 = vst [vmem:[#allocation10_spill] sm:$0xff] %v7272_v6 }
 0x1f6   :  { %v7274_v13 = vpop.f32.mrb[142].mxu1 }
 0x1f7   :  { %8326 = vst [vmem:[#allocation11_spill] sm:$0xff] %v7274_v13  ;;  %v7276_v14 = vpop.f32.mrb[143].mxu1 }
 0x1f8   :  { %8327 = vst [vmem:[#allocation12_spill] sm:$0xff] %v7276_v14 }
 0x1fa   :  { %v7278_v3 = vpop.f32.mrb[144].mxu1 }
 0x1fb   :  { %8328 = vst [vmem:[#allocation13_spill] sm:$0xff] %v7278_v3  ;;  %v7280_v0 = vpop.f32.mrb[145].mxu1 }
 0x1fc   :  { %8329 = vst [vmem:[#allocation14_spill] sm:$0xff] %v7280_v0 }
 0x1fe   :  { %v7282_v10 = vpop.f32.mrb[146].mxu1 }
 0x1ff   :  { %8330 = vst [vmem:[#allocation15_spill] sm:$0xff] %v7282_v10  ;;  %v7284_v60 = vpop.f32.mrb[147].mxu1 }
 0x200   :  { %8331 = vst [vmem:[#allocation16_spill] sm:$0xff] %v7284_v60 }
 0x202   :  { %v7286_v61 = vpop.f32.mrb[148].mxu1 }
 0x203   :  { %8332 = vst [vmem:[#allocation17_spill] sm:$0xff] %v7286_v61  ;;  %v7288_v62 = vpop.f32.mrb[149].mxu1 }
 0x204   :  { %8333 = vst [vmem:[#allocation18_spill] sm:$0xff] %v7288_v62 }
 0x206   :  { %v7290_v63 = vpop.f32.mrb[150].mxu1 }
 0x207   :  { %8334 = vst [vmem:[#allocation19_spill] sm:$0xff] %v7290_v63  ;;  %v7292_v5 = vpop.f32.mrb[151].mxu1 }
 0x208   :  { %8335 = vst [vmem:[#allocation20_spill] sm:$0xff] %v7292_v5  ;;  %v7333_v5 = vsub.s32 0, %v7191_v7 }
 0x20a   :  { %v7294_v6 = vpop.f32.mrb[152].mxu1  ;;  %8352 = vst [vmem:[#allocation36_spill] sm:$0xff] %v7333_v5 }
 0x20b   :  { %8336 = vst [vmem:[#allocation21_spill] sm:$0xff] %v7294_v6  ;;  %v7296_v13 = vpop.f32.mrb[153].mxu1  ;;  %v2386_v6 = vld [vmem:[%s8305_s3 + $0x10] sm:$0xff] }
 0x20c   :  { %8337 = vst [vmem:[#allocation22_spill] sm:$0xff] %v7296_v13 }
 0x20e   :  { %v7298_v14 = vpop.f32.mrb[154].mxu1 }
 0x20f   :  { %8338 = vst [vmem:[#allocation23_spill] sm:$0xff] %v7298_v14  ;;  %v7300_v3 = vpop.f32.mrb[155].mxu1  ;;  %v2387_v14 = vld [vmem:[%s8305_s3 + $0x18] sm:$0xff] }
 0x210   :  { %8339 = vst [vmem:[#allocation24_spill] sm:$0xff] %v7300_v3 }
 0x212   :  { %v7302_v0 = vpop.f32.mrb[156].mxu1 }
 0x213   :  { %8340 = vst [vmem:[#allocation25_spill] sm:$0xff] %v7302_v0  ;;  %v7304_v10 = vpop.f32.mrb[157].mxu1  ;;  %v6018_v0 = vpack.c.bf16 %v2387_v14, %v2386_v6 }
 0x214   :  { %8341 = vst [vmem:[#allocation26_spill] sm:$0xff] %v7304_v10 }
 0x215   :  { %6019 = vmatpush3.bf16.msra.mxu0 %v6018_v0  ;;  %6075 = vmatpush3.bf16.msra.mxu1 %v6018_v0 }
 0x216   :  { %v7306_v60 = vpop.f32.mrb[158].mxu1 }
 0x217   :  { %8342 = vst [vmem:[#allocation27_spill] sm:$0xff] %v7306_v60  ;;  %v7308_v61 = vpop.f32.mrb[159].mxu1  ;;  %v8348_v60 = vmov 0.0|0.0  }
 0x218   :  { %8343 = vst [vmem:[#allocation28_spill] sm:$0xff] %v7308_v61  ;;  %6020 = vmatprep.subr.bf16.mxu0 %v8348_v60  ;;  %6065 = vmatprep.subr.bf16.mxu1 %v8348_v60 }
 0x21a   :  { %v7310_v62 = vpop.f32.mrb[160].mxu1 }
 0x21b   :  { %8344 = vst [vmem:[#allocation29_spill] sm:$0xff] %v7310_v62  ;;  %v7312_v63 = vpop.f32.mrb[161].mxu1 }
 0x21c   :  { %8345 = vst [vmem:[#allocation30_spill] sm:$0xff] %v7312_v63 }
 0x21e   :  { %v7320_v3 = vpop.f32.mrb[162].mxu1 }
 0x21f   :  { %8346 = vst [vmem:[#allocation31_spill] sm:$0xff] %v7320_v3  ;;  %v7322_v10 = vpop.f32.mrb[163].mxu1 }
 0x220   :  { %8347 = vst [vmem:[#allocation32_spill] sm:$0xff] %v7322_v10 }
 0x221   :  { %v734_v61 = vpop.permute.xlu0 %733 }
 0x222   :  { %v7326_v62 = vpop.f32.mrb[164].mxu1  ;;  %v736_v6 = vsub.f32 %v7181_v59, %v734_v61 }
 0x223   :  { %8349 = vst [vmem:[#allocation33_spill] sm:$0xff] %v7326_v62  ;;  %v7328_v63 = vpop.f32.mrb[165].mxu1 }
 0x224   :  { %8350 = vst [vmem:[#allocation34_spill] sm:$0xff] %v7328_v63  ;;  %v1932_v0 = vrot.slane %v736_v6, %v7333_v5 }
 0x226   :  { %v7330_v13 = vpop.f32.mrb[166].mxu1  ;;  %1933 = vrot.lane.b32.xlu0 %v1932_v0, %s6299_s23 }
 0x227   :  { %8351 = vst [vmem:[#allocation35_spill] sm:$0xff] %v7330_v13  ;;  %v7336_v14 = vpop.f32.mrb[167].mxu1 }
 0x228   :  { %8353 = vst [vmem:[#allocation37_spill] sm:$0xff] %v7336_v14 }
 0x22a   :  { %v7339_v3 = vpop.f32.mrb[168].mxu1 }
 0x22b   :  { %8354 = vst [vmem:[#allocation38_spill] sm:$0xff] %v7339_v3  ;;  %v7341_v10 = vpop.f32.mrb[169].mxu1 }
 0x22c   :  { %8355 = vst [vmem:[#allocation39_spill] sm:$0xff] %v7341_v10 }
 0x22e   :  { %v7343_v62 = vpop.f32.mrb[170].mxu1 }
 0x22f   :  { %8356 = vst [vmem:[#allocation40_spill] sm:$0xff] %v7343_v62  ;;  %v7345_v63 = vpop.f32.mrb[171].mxu1 }
 0x230   :  { %8357 = vst [vmem:[#allocation41_spill] sm:$0xff] %v7345_v63 }
 0x232   :  { %v7347_v13 = vpop.f32.mrb[172].mxu1 }
 0x233   :  { %8358 = vst [vmem:[#allocation42_spill] sm:$0xff] %v7347_v13  ;;  %v7349_v7 = vpop.f32.mrb[173].mxu1 }
 0x234   :  { %8359 = vst [vmem:[#allocation43_spill] sm:$0xff] %v7349_v7 }
 0x236   :  { %v7351_v51 = vpop.f32.mrb[174].mxu1 }
 0x237   :  { %8360 = vst [vmem:[#allocation44_spill] sm:$0xff] %v7351_v51  ;;  %v7353_v59 = vpop.f32.mrb[175].mxu1 }
 0x238   :  { %8361 = vst [vmem:[#allocation45_spill] sm:$0xff] %v7353_v59 }
 0x23a   :  { %v7355_v61 = vpop.f32.mrb[176].mxu1 }
 0x23b   :  { %8362 = vst [vmem:[#allocation46_spill] sm:$0xff] %v7355_v61  ;;  %v7357_v6 = vpop.f32.mrb[177].mxu1 }
 0x23c   :  { %8363 = vst [vmem:[#allocation47_spill] sm:$0xff] %v7357_v6 }
 0x23e   :  { %v7359_v3 = vpop.f32.mrb[178].mxu1 }
 0x23f   :  { %8364 = vst [vmem:[#allocation48_spill] sm:$0xff] %v7359_v3  ;;  %v7361_v0 = vpop.f32.mrb[179].mxu1 }
 0x240   :  { %8365 = vst [vmem:[#allocation49_spill] sm:$0xff] %v7361_v0 }
 0x242   :  { %v7363_v10 = vpop.f32.mrb[180].mxu1 }
 0x243   :  { %8366 = vst [vmem:[#allocation50_spill] sm:$0xff] %v7363_v10  ;;  %v7365_v62 = vpop.f32.mrb[181].mxu1 }
 0x244   :  { %8367 = vst [vmem:[#allocation51_spill] sm:$0xff] %v7365_v62 }
 0x246   :  { %v7367_v63 = vpop.f32.mrb[182].mxu1 }
 0x247   :  { %8368 = vst [vmem:[#allocation52_spill] sm:$0xff] %v7367_v63  ;;  %v7369_v13 = vpop.f32.mrb[183].mxu1 }
 0x248   :  { %8369 = vst [vmem:[#allocation53_spill] sm:$0xff] %v7369_v13 }
 0x24a   :  { %v7371_v7 = vpop.f32.mrb[184].mxu1 }
 0x24b   :  { %8370 = vst [vmem:[#allocation54_spill] sm:$0xff] %v7371_v7  ;;  %v7373_v51 = vpop.f32.mrb[185].mxu1 }
 0x24c   :  { %8371 = vst [vmem:[#allocation55_spill] sm:$0xff] %v7373_v51 }
 0x24e   :  { %v7375_v59 = vpop.f32.mrb[186].mxu1 }
 0x24f   :  { %8372 = vst [vmem:[#allocation56_spill] sm:$0xff] %v7375_v59  ;;  %v7377_v61 = vpop.f32.mrb[187].mxu1 }
 0x250   :  { %8373 = vst [vmem:[#allocation57_spill] sm:$0xff] %v7377_v61 }
 0x252   :  { %v7379_v6 = vpop.f32.mrb[188].mxu1 }
 0x253   :  { %8374 = vst [vmem:[#allocation58_spill] sm:$0xff] %v7379_v6  ;;  %v7381_v3 = vpop.f32.mrb[189].mxu1  ;;  %v7401_v6 = vrot.slane %v7186_v2, %v7333_v5 }
 0x254   :  { %8375 = vst [vmem:[#allocation59_spill] sm:$0xff] %v7381_v3 }
 0x256   :  { %v7383_v0 = vpop.f32.mrb[190].mxu1 }
 0x257   :  { %8376 = vst [vmem:[#allocation60_spill] sm:$0xff] %v7383_v0  ;;  %v7385_v10 = vpop.f32.mrb[191].mxu1  ;;  %v1823_v0 = vmul.f32 %v7158_v44, %v7401_v6 }
 0x258   :  { %8377 = vst [vmem:[#allocation61_spill] sm:$0xff] %v7385_v10 }
 0x25a   :  { %v7387_v62 = vpop.f32.mrb[192].mxu1 }
 0x25b   :  { %8378 = vst [vmem:[#allocation62_spill] sm:$0xff] %v7387_v62  ;;  %v7389_v63 = vpop.f32.mrb[193].mxu1  ;;  %v1825_v62 = vmul.f32 %v7162_v49, %v7401_v6  ;;  %v1816_v49 = vmul.f32 %v7401_v6, %v7133_v24  ;;  %v1817_v24 = vmul.f32 %v7130_v23, %v7401_v6  ;;  %v2388_v23 = vld [vmem:[%s8305_s3 + $0x20] sm:$0xff] }
 0x25c   :  { %8379 = vst [vmem:[#allocation63_spill] sm:$0xff] %v7389_v63  ;;  %v1824_v63 = vmul.f32 %v7401_v6, %v7164_v50  ;;  %v1826_v50 = vmul.f32 %v7401_v6, %v7168_v54  ;;  %v8384_v54 = vmov 0.0  }
 0x25e   :  { %v7391_v13 = vpop.f32.mrb[194].mxu1 }
 0x25f   :  { %8380 = vst [vmem:[#allocation64_spill] sm:$0xff] %v7391_v13  ;;  %v7393_v7 = vpop.f32.mrb[195].mxu1  ;;  %v2384_v13 = vld [vmem:[%s8305_s3] sm:$0xff] }
 0x260   :  { %8381 = vst [vmem:[#allocation65_spill] sm:$0xff] %v7393_v7 }
 0x262   :  { %v7395_v51 = vpop.f32.mrb[196].mxu1 }
 0x263   :  { %8382 = vst [vmem:[#allocation66_spill] sm:$0xff] %v7395_v51  ;;  %v7397_v59 = vpop.f32.mrb[197].mxu1  ;;  %v2385_v51 = vld [vmem:[%s8305_s3 + $0x8] sm:$0xff] }
 0x264   :  { %8383 = vst [vmem:[#allocation67_spill] sm:$0xff] %v7397_v59  ;;  %v6021_v7 = vpack.c.bf16 %v2385_v51, %v2384_v13  ;;  %v2389_v13 = vld [vmem:[%s8305_s3 + $0x28] sm:$0xff] }
 0x298   :  { %v7415_v59 = vpop.permute.xlu0 %1933 }
 0x299   :  { %v1943_v2 = vadd.f32 %v7415_v59, %v1823_v0  ;;  %v1944_v44 = vadd.f32 %v7415_v59, %v1824_v63  ;;  %v1945_v5 = vadd.f32 %v7415_v59, %v1825_v62  ;;  %v1946_v61 = vadd.f32 %v7415_v59, %v1826_v50 }
 0x29a   :  { %v1936_v63 = vadd.f32 %v7415_v59, %v1816_v49  ;;  %v1827_v62 = vmul.f32 %v7166_v53, %v7401_v6  ;;  %v6024_v49 = vpack.c.bf16 %v2389_v13, %v2388_v23 }
 0x29b   :  { %vm2055_vm3 = vcmp.ge.f32.partialorder %v1943_v2, 0.0  ;;  %v2167_v10 = vmul.f32 0.2, %v1943_v2  ;;  %vm2056_vm4 = vcmp.ge.f32.partialorder %v1944_v44, 0.0  ;;  %v2168_v3 = vmul.f32 0.2, %v1944_v44 }
 0x29c   :  { %v2169_v0 = vmul.f32 0.2, %v1945_v5  ;;  %vm2057_vm5 = vcmp.ge.f32.partialorder %v1945_v5, 0.0  ;;  %vm2058_vm6 = vcmp.ge.f32.partialorder %v1946_v61, 0.0  ;;  %v2160_v51 = vmul.f32 0.2, %v1936_v63 }
 0x29d   :  { %v2279_v14 = vsel %vm2055_vm3, %v1943_v2, %v2167_v10  ;;  %v2280_v52 = vsel %vm2056_vm4, %v1944_v44, %v2168_v3  ;;  %v2170_v3 = vmul.f32 0.2, %v1946_v61  ;;  %v1947_v10 = vadd.f32 %v7415_v59, %v1827_v62 }
 0x29e   :  { %5598 = vmatmul.mubr.msk.f32.vlgmr.msra.gmra.mrb[0].mxu0 %vm72_vm1, %v2279_v14  ;;  %5601 = vmatmul.mubr.msk.f32.vlgmr.msra.gmra.mrb[198].mxu1 %vm72_vm1, %v2280_v52  ;;  %v2281_v53 = vsel %vm2057_vm5, %v1945_v5, %v2169_v0  ;;  %v1937_v52 = vadd.f32 %v7415_v59, %v1817_v24  ;;  %v1828_v14 = vmul.f32 %v7401_v6, %v7172_v56  ;;  %vm2048_vm7 = vcmp.ge.f32.partialorder %v1936_v63, 0.0 }
 0x29f   :  { %5603 = vmatprep.mubr.msk.f32.mxu1 %vm6295_vm0, %v8384_v54  ;;  %6022 = vmatpush3.bf16.msra.mxu0 %v6021_v7  ;;  %v1818_v5 = vmul.f32 %v7401_v6, %v7145_v32  ;;  %v2282_v7 = vsel %vm2058_vm6, %v1946_v61, %v2170_v3  ;;  %v2171_v2 = vmul.f32 0.2, %v1947_v10  ;;  %v2272_v50 = vsel %vm2048_vm7, %v1936_v63, %v2160_v51 }
 0x2a0   :  { %5622 = vmatprep.mubr.msk.f32.mxu0 %vm6295_vm0, %v8384_v54  ;;  %6023 = vmatprep.subr.bf16.mxu0 %v8348_v60  ;;  %v1948_v44 = vadd.f32 %v7415_v59, %v1828_v14  ;;  %vm2059_vm8 = vcmp.ge.f32.partialorder %v1947_v10, 0.0  ;;  %v2161_v0 = vmul.f32 0.2, %v1937_v52  ;;  %vm2049_vm9 = vcmp.ge.f32.partialorder %v1937_v52, 0.0 }
 0x2a1   :  { %v1938_v62 = vadd.f32 %v7415_v59, %v1818_v5  ;;  %v1819_v32 = vmul.f32 %v7142_v31, %v7401_v6  ;;  %v1829_v56 = vmul.f32 %v7170_v55, %v7401_v6  ;;  %v2283_v61 = vsel %vm2059_vm8, %v1947_v10, %v2171_v2 }
 0x2a2   :  { %5604 = vmatmul.mubr.msk.f32.gmra.mrb[200].mxu1 %vm72_vm1, %v2281_v53  ;;  %v2172_v63 = vmul.f32 0.2, %v1948_v44  ;;  %v2273_v24 = vsel %vm2049_vm9, %v1937_v52, %v2161_v0  ;;  %v1820_v31 = vmul.f32 %v7401_v6, %v7154_v39  ;;  %vm2060_vm10 = vcmp.ge.f32.partialorder %v1948_v44, 0.0 }
 0x2a3   :  { %5606 = vmatprep.mubr.msk.f32.mxu1 %vm6295_vm0, %v8384_v54  ;;  %v2162_v3 = vmul.f32 0.2, %v1938_v62  ;;  %v1949_v53 = vadd.f32 %v7415_v59, %v1829_v56  ;;  %v1939_v51 = vadd.f32 %v7415_v59, %v1819_v32  ;;  %vm2050_vm11 = vcmp.ge.f32.partialorder %v1938_v62, 0.0 }
 0x2a4   :  { %v1940_v55 = vadd.f32 %v7415_v59, %v1820_v31  ;;  %v2284_v10 = vsel %vm2060_vm10, %v1948_v44, %v2172_v63  ;;  %v1821_v39 = vmul.f32 %v7151_v38, %v7401_v6  ;;  %v1822_v44 = vmul.f32 %v7401_v6, %v7160_v45 }
 0x2a5   :  { %v2274_v52 = vsel %vm2050_vm11, %v1938_v62, %v2162_v3  ;;  %v2173_v23 = vmul.f32 0.2, %v1949_v53  ;;  %v2163_v13 = vmul.f32 0.2, %v1939_v51  ;;  %vm2061_vm12 = vcmp.ge.f32.partialorder %v1949_v53, 0.0 }
 0x2a6   :  { %5607 = vmatmul.mubr.msk.f32.gmra.mrb[202].mxu1 %vm72_vm1, %v2282_v7  ;;  %5623 = vmatmul.mubr.msk.f32.vlgmr.msra.gmra.mrb[0].mxu0 %vm72_vm1, %v2272_v50  ;;  %vm2051_vm13 = vcmp.ge.f32.partialorder %v1939_v51, 0.0  ;;  %v2164_v7 = vmul.f32 0.2, %v1940_v55  ;;  %v1941_v2 = vadd.f32 %v7415_v59, %v1821_v39  ;;  %vm2052_vm14 = vcmp.ge.f32.partialorder %v1940_v55, 0.0 }
 0x2a7   :  { %5609 = vmatprep.mubr.msk.f32.mxu1 %vm6295_vm0, %v8384_v54  ;;  %5625 = vmatprep.mubr.msk.f32.mxu0 %vm6295_vm0, %v8384_v54  ;;  %v2285_v14 = vsel %vm2061_vm12, %v1949_v53, %v2173_v23  ;;  %v2275_v5 = vsel %vm2051_vm13, %v1939_v51, %v2163_v13  ;;  %v1942_v50 = vadd.f32 %v7415_v59, %v1822_v44 }
 0x2a8   :  { %6025 = vmatpush3.bf16.msra.mxu0 %v6024_v49  ;;  %v2276_v38 = vsel %vm2052_vm14, %v1940_v55, %v2164_v7  ;;  %v2165_v49 = vmul.f32 0.2, %v1941_v2  ;;  %vm2053_vm15 = vcmp.ge.f32.partialorder %v1941_v2, 0.0  ;;  %v1830_v0 = vmul.f32 %v7401_v6, %v7176_v58  ;;  %v2390_v58 = vld [vmem:[%s8305_s3 + $0x30] sm:$0xff] }
 0x2a9   :  { %6026 = vmatprep.subr.bf16.mxu0 %v8348_v60  ;;  %v2166_v62 = vmul.f32 0.2, %v1942_v50  ;;  %vm2054_vm2 = vcmp.ge.f32.partialorder %v1942_v50, 0.0  ;;  %v1831_v56 = vmul.f32 %v7174_v57, %v7401_v6  ;;  %v1832_v57 = vmul.f32 %v7401_v6, %v7188_v4 }
 0x2aa   :  { %5610 = vmatmul.mubr.msk.f32.gmra.mrb[204].mxu1 %vm72_vm1, %v2283_v61  ;;  %5626 = vmatmul.mubr.msk.f32.gmra.mrb[2].mxu0 %vm72_vm1, %v2273_v24  ;;  %v2277_v45 = vsel %vm2053_vm15, %v1941_v2, %v2165_v49  ;;  %v1950_v32 = vadd.f32 %v7415_v59, %v1830_v0  ;;  %v2391_v61 = vld [vmem:[%s8305_s3 + $0x38] sm:$0xff]  ;;  %v1834_v13 = vmul.f32 %v7401_v6, %v7195_v9 }
 0x2ab   :  { %5612 = vmatprep.mubr.msk.f32.mxu1 %vm6295_vm0, %v8384_v54  ;;  %5628 = vmatprep.mubr.msk.f32.mxu0 %vm6295_vm0, %v8384_v54  ;;  %v2278_v63 = vsel %vm2054_vm2, %v1942_v50, %v2166_v62  ;;  %v1951_v3 = vadd.f32 %v7415_v59, %v1831_v56  ;;  %v6027_v53 = vpack.c.bf16 %v2391_v61, %v2390_v58 }
 0x2ac   :  { %v2174_v24 = vmul.f32 0.2, %v1950_v32  ;;  %vm2062_vm3 = vcmp.ge.f32.partialorder %v1950_v32, 0.0  ;;  %v1952_v55 = vadd.f32 %v7415_v59, %v1832_v57  ;;  %v1836_v44 = vmul.f32 %v7401_v6, %v7202_v12 }
 0x2ad   :  { %v2175_v31 = vmul.f32 0.2, %v1951_v3  ;;  %vm2063_vm4 = vcmp.ge.f32.partialorder %v1951_v3, 0.0  ;;  %v1837_v50 = vmul.f32 %v7200_v11, %v7401_v6  ;;  %v1838_v62 = vmul.f32 %v7401_v6, %v7208_v16  ;;  %v2392_v11 = vld [vmem:[%s8305_s3 + $0x40] sm:$0xff] }
 0x2ae   :  { %5613 = vmatmul.mubr.msk.f32.gmra.mrb[206].mxu1 %vm72_vm1, %v2284_v10  ;;  %5629 = vmatmul.mubr.msk.f32.gmra.mrb[4].mxu0 %vm72_vm1, %v2274_v52  ;;  %v2286_v51 = vsel %vm2062_vm3, %v1950_v32, %v2174_v24  ;;  %v1833_v10 = vmul.f32 %v7183_v1, %v7401_v6  ;;  %v2176_v52 = vmul.f32 0.2, %v1952_v55  ;;  %vm2064_vm5 = vcmp.ge.f32.partialorder %v1952_v55, 0.0  ;;  %v2393_v32 = vld [vmem:[%s8305_s3 + $0x48] sm:$0xff] }
 0x2af   :  { %5615 = vmatprep.mubr.msk.f32.mxu1 %vm6295_vm0, %v8384_v54  ;;  %5631 = vmatprep.mubr.msk.f32.mxu0 %vm6295_vm0, %v8384_v54  ;;  %v2287_v4 = vsel %vm2063_vm4, %v1951_v3, %v2175_v31  ;;  %v1957_v12 = vadd.f32 %v7415_v59, %v1837_v50  ;;  %v1958_v61 = vadd.f32 %v7415_v59, %v1838_v62 }
 0x2b0   :  { %v1953_v23 = vadd.f32 %v7415_v59, %v1833_v10  ;;  %v2288_v1 = vsel %vm2064_vm5, %v1952_v55, %v2176_v52  ;;  %v1839_v16 = vmul.f32 %v7206_v15, %v7401_v6  ;;  %v1841_v55 = vmul.f32 %v7210_v17, %v7401_v6 }
 0x2b1   :  { %v2181_v58 = vmul.f32 0.2, %v1957_v12  ;;  %vm2069_vm10 = vcmp.ge.f32.partialorder %v1957_v12, 0.0  ;;  %v2182_v3 = vmul.f32 0.2, %v1958_v61  ;;  %vm2070_vm11 = vcmp.ge.f32.partialorder %v1958_v61, 0.0 }
 0x2b2   :  { %5616 = vmatmul.mubr.msk.f32.gmra.mrb[208].mxu1 %vm72_vm1, %v2285_v14  ;;  %5632 = vmatmul.mubr.msk.f32.gmra.mrb[6].mxu0 %vm72_vm1, %v2275_v5  ;;  %v2177_v39 = vmul.f32 0.2, %v1953_v23  ;;  %v1954_v14 = vadd.f32 %v7415_v59, %v1834_v13  ;;  %vm2065_vm6 = vcmp.ge.f32.partialorder %v1953_v23, 0.0  ;;  %v1835_v5 = vmul.f32 %v7193_v8, %v7401_v6 }
 0x2b3   :  { %5634 = vmatprep.mubr.msk.f32.mxu0 %vm6295_vm0, %v8384_v54  ;;  %6007 = vmatprep.mubr.msk.f32.mxu1 %vm6295_vm0, %v8384_v54  ;;  %v1956_v8 = vadd.f32 %v7415_v59, %v1836_v44  ;;  %v2293_v24 = vsel %vm2069_vm10, %v1957_v12, %v2181_v58  ;;  %v1959_v57 = vadd.f32 %v7415_v59, %v1839_v16  ;;  %v2395_v44 = vld [vmem:[%s8305_s3 + $0x58] sm:$0xff] }
 0x2b4   :  { %v2289_v7 = vsel %vm2065_vm6, %v1953_v23, %v2177_v39  ;;  %v2178_v2 = vmul.f32 0.2, %v1954_v14  ;;  %v1955_v9 = vadd.f32 %v7415_v59, %v1835_v5  ;;  %vm2066_vm7 = vcmp.ge.f32.partialorder %v1954_v14, 0.0 }
 0x2b5   :  { %vm2068_vm9 = vcmp.ge.f32.partialorder %v1956_v8, 0.0  ;;  %v2294_v15 = vsel %vm2070_vm11, %v1958_v61, %v2182_v3  ;;  %vm2071_vm12 = vcmp.ge.f32.partialorder %v1959_v57, 0.0  ;;  %v1842_v52 = vmul.f32 %v7401_v6, %v7216_v20 }
 0x2b6   :  { %5635 = vmatmul.mubr.msk.f32.gmra.mrb[8].mxu0 %vm72_vm1, %v2276_v38  ;;  %v2290_v38 = vsel %vm2066_vm7, %v1954_v14, %v2178_v2  ;;  %v2179_v49 = vmul.f32 0.2, %v1955_v9  ;;  %vm2067_vm8 = vcmp.ge.f32.partialorder %v1955_v9, 0.0  ;;  %v1844_v5 = vmul.f32 %v7401_v6, %v7220_v22  ;;  %v2394_v22 = vld [vmem:[%s8305_s3 + $0x50] sm:$0xff] }
 0x2b7   :  { %5637 = vmatprep.mubr.msk.f32.mxu0 %vm6295_vm0, %v8384_v54  ;;  %v1962_v17 = vadd.f32 %v7415_v59, %v1842_v52  ;;  %v6033_v50 = vpack.c.bf16 %v2395_v44, %v2394_v22  ;;  %v1847_v62 = vmul.f32 %v7222_v25, %v7401_v6  ;;  %v1849_v16 = vmul.f32 %v7226_v27, %v7401_v6 }
 0x2b8   :  { %v2291_v0 = vsel %vm2067_vm8, %v1955_v9, %v2179_v49  ;;  %v1845_v9 = vmul.f32 %v7218_v21, %v7401_v6  ;;  %v1846_v21 = vmul.f32 %v7401_v6, %v7224_v26  ;;  %v1850_v3 = vmul.f32 %v7401_v6, %v7232_v30 }
 0x2b9   :  { %v2186_v14 = vmul.f32 0.2, %v1962_v17  ;;  %vm2074_vm15 = vcmp.ge.f32.partialorder %v1962_v17, 0.0  ;;  %v1857_v44 = vmul.f32 %v7242_v37, %v7401_v6 }
 0x2ba   :  { %5638 = vmatmul.mubr.msk.f32.gmra.mrb[10].mxu0 %vm72_vm1, %v2277_v45  ;;  %v2180_v45 = vmul.f32 0.2, %v1956_v8  ;;  %v1966_v12 = vadd.f32 %v7415_v59, %v1846_v21  ;;  %v1970_v27 = vadd.f32 %v7415_v59, %v1850_v3  ;;  %v1863_v3 = vmul.f32 %v7254_v47, %v7401_v6 }
 0x2bb   :  { %5640 = vmatprep.mubr.msk.f32.mxu0 %vm6295_vm0, %v8384_v54 }
 0x2bc   :  { %v2292_v56 = vsel %vm2068_vm9, %v1956_v8, %v2180_v45  ;;  %v1965_v8 = vadd.f32 %v7415_v59, %v1845_v9  ;;  %vm2078_vm5 = vcmp.ge.f32.partialorder %v1966_v12, 0.0  ;;  %vm2082_vm9 = vcmp.ge.f32.partialorder %v1970_v27, 0.0 }
 0x2be   :  { %5641 = vmatmul.mubr.msk.f32.gmra.mrb[12].mxu0 %vm72_vm1, %v2278_v63  ;;  %v6030_v63 = vpack.c.bf16 %v2393_v32, %v2392_v11  ;;  %v2189_v45 = vmul.f32 0.2, %v1965_v8  ;;  %vm2077_vm4 = vcmp.ge.f32.partialorder %v1965_v8, 0.0  ;;  %v2190_v11 = vmul.f32 0.2, %v1966_v12 }
 0x2bf   :  { %5647 = vmatprep.mubr.msk.f32.mxu0 %vm6295_vm0, %v8384_v54  ;;  %v1967_v32 = vadd.f32 %v7415_v59, %v1847_v62 }
 0x2c0   :  { %v2301_v26 = vsel %vm2077_vm4, %v1965_v8, %v2189_v45  ;;  %v2302_v25 = vsel %vm2078_vm5, %v1966_v12, %v2190_v11  ;;  %v1858_v8 = vmul.f32 %v7401_v6, %v7248_v42  ;;  %v2398_v42 = vld [vmem:[%s8305_s3 + $0x70] sm:$0xff]  ;;  %v2399_v45 = vld [vmem:[%s8305_s3 + $0x78] sm:$0xff] }
 0x2c1   :  { %v2191_v58 = vmul.f32 0.2, %v1967_v32  ;;  %vm2079_vm6 = vcmp.ge.f32.partialorder %v1967_v32, 0.0  ;;  %v6039_v11 = vpack.c.bf16 %v2399_v45, %v2398_v42  ;;  %v8392_v42 = vld [vmem:[#allocation9_spill] sm:$0xff] }
 0x2c2   :  { %5648 = vmatmul.mubr.msk.f32.vlgmr.msra.gmra.mrb[0].mxu0 %vm72_vm1, %v2286_v51  ;;  %v2183_v51 = vmul.f32 0.2, %v1959_v57  ;;  %v1978_v37 = vadd.f32 %v7415_v59, %v1858_v8  ;;  %v8391_v8 = vld [vmem:[#allocation10_spill] sm:$0xff]  ;;  %v1871_v45 = vmul.f32 %v8392_v42, %v7401_v6 }
 0x2c3   :  { %5650 = vmatprep.mubr.msk.f32.mxu0 %vm6295_vm0, %v8384_v54  ;;  %6028 = vmatpush3.bf16.msra.mxu0 %v6027_v53  ;;  %v1840_v53 = vmul.f32 %v7401_v6, %v7212_v18 }
 0x2c4   :  { %6029 = vmatprep.subr.bf16.mxu0 %v8348_v60  ;;  %v2295_v18 = vsel %vm2071_vm12, %v1959_v57, %v2183_v51  ;;  %v2202_v62 = vmul.f32 0.2, %v1978_v37 }
 0x2c5   :  { %v1960_v31 = vadd.f32 %v7415_v59, %v1840_v53 }
 0x2c6   :  { %5651 = vmatmul.mubr.msk.f32.gmra.mrb[2].mxu0 %vm72_vm1, %v2287_v4  ;;  %v1961_v4 = vadd.f32 %v7415_v59, %v1841_v55  ;;  %v1852_v55 = vmul.f32 %v7401_v6, %v7236_v34  ;;  %v1853_v34 = vmul.f32 %v7234_v33, %v7401_v6 }
 0x2c7   :  { %5653 = vmatprep.mubr.msk.f32.mxu0 %vm6295_vm0, %v8384_v54  ;;  %v2184_v10 = vmul.f32 0.2, %v1960_v31  ;;  %vm2072_vm13 = vcmp.ge.f32.partialorder %v1960_v31, 0.0 }
 0x2c8   :  { %v2185_v13 = vmul.f32 0.2, %v1961_v4  ;;  %vm2073_vm14 = vcmp.ge.f32.partialorder %v1961_v4, 0.0  ;;  %v1972_v52 = vadd.f32 %v7415_v59, %v1852_v55 }
 0x2c9   :  { %v2296_v23 = vsel %vm2072_vm13, %v1960_v31, %v2184_v10  ;;  %v2194_v31 = vmul.f32 0.2, %v1970_v27 }
 0x2ca   :  { %5654 = vmatmul.mubr.msk.f32.gmra.mrb[4].mxu0 %vm72_vm1, %v2288_v1  ;;  %v1843_v1 = vmul.f32 %v7214_v19, %v7401_v6  ;;  %v2297_v39 = vsel %vm2073_vm14, %v1961_v4, %v2185_v13  ;;  %v1964_v19 = vadd.f32 %v7415_v59, %v1844_v5  ;;  %vm2084_vm11 = vcmp.ge.f32.partialorder %v1972_v52, 0.0 }
 0x2cb   :  { %5656 = vmatprep.mubr.msk.f32.mxu0 %vm6295_vm0, %v8384_v54  ;;  %v2306_v10 = vsel %vm2082_vm9, %v1970_v27, %v2194_v31  ;;  %v1855_v5 = vmul.f32 %v7238_v35, %v7401_v6  ;;  %v8385_v27 = vld [vmem:[#allocation4_spill] sm:$0xff] }
 0x2cc   :  { %v1963_v20 = vadd.f32 %v7415_v59, %v1843_v1  ;;  %v2188_v49 = vmul.f32 0.2, %v1964_v19  ;;  %vm2076_vm3 = vcmp.ge.f32.partialorder %v1964_v19, 0.0  ;;  %v1973_v1 = vadd.f32 %v7415_v59, %v1853_v34  ;;  %v2400_v34 = vld [vmem:[%s8305_s3 + $0x80] sm:$0xff] }
 0x2ce   :  { %5657 = vmatmul.mubr.msk.f32.gmra.mrb[6].mxu0 %vm72_vm1, %v2289_v7  ;;  %v2298_v7 = vsel %vm2074_vm15, %v1962_v17, %v2186_v14  ;;  %v2187_v2 = vmul.f32 0.2, %v1963_v20  ;;  %vm2075_vm2 = vcmp.ge.f32.partialorder %v1963_v20, 0.0  ;;  %v2196_v17 = vmul.f32 0.2, %v1972_v52 }
 0x2cf   :  { %5659 = vmatprep.mubr.msk.f32.mxu0 %vm6295_vm0, %v8384_v54  ;;  %v2197_v14 = vmul.f32 0.2, %v1973_v1  ;;  %vm2085_vm12 = vcmp.ge.f32.partialorder %v1973_v1, 0.0 }
 0x2d0   :  { %v2308_v33 = vsel %vm2084_vm11, %v1972_v52, %v2196_v17 }
 0x2d2   :  { %5660 = vmatmul.mubr.msk.f32.gmra.mrb[8].mxu0 %vm72_vm1, %v2290_v38  ;;  %v2299_v38 = vsel %vm2075_vm2, %v1963_v20, %v2187_v2  ;;  %v1975_v2 = vadd.f32 %v7415_v59, %v1855_v5 }
 0x2d3   :  { %5662 = vmatprep.mubr.msk.f32.mxu0 %vm6295_vm0, %v8384_v54 }
 0x2d4   :  { %v2199_v22 = vmul.f32 0.2, %v1975_v2  ;;  %vm2087_vm14 = vcmp.ge.f32.partialorder %v1975_v2, 0.0 }
 0x2d6   :  { %5663 = vmatmul.mubr.msk.f32.gmra.mrb[10].mxu0 %vm72_vm1, %v2291_v0  ;;  %v2300_v0 = vsel %vm2076_vm3, %v1964_v19, %v2188_v49  ;;  %v1856_v19 = vmul.f32 %v7401_v6, %v7244_v40  ;;  %v1977_v40 = vadd.f32 %v7415_v59, %v1857_v44  ;;  %vm2090_vm3 = vcmp.ge.f32.partialorder %v1978_v37, 0.0 }
 0x2d7   :  { %5665 = vmatprep.mubr.msk.f32.mxu0 %vm6295_vm0, %v8384_v54 }
 0x2d8   :  { %v1976_v35 = vadd.f32 %v7415_v59, %v1856_v19  ;;  %vm2089_vm2 = vcmp.ge.f32.partialorder %v1977_v40, 0.0 }
 0x2da   :  { %5666 = vmatmul.mubr.msk.f32.gmra.mrb[12].mxu0 %vm72_vm1, %v2292_v56  ;;  %v1848_v56 = vmul.f32 %v7401_v6, %v7228_v28  ;;  %v1969_v28 = vadd.f32 %v7415_v59, %v1849_v16  ;;  %v2200_v49 = vmul.f32 0.2, %v1976_v35  ;;  %vm2088_vm15 = vcmp.ge.f32.partialorder %v1976_v35, 0.0 }
 0x2db   :  { %5672 = vmatprep.mubr.msk.f32.mxu0 %vm6295_vm0, %v8384_v54 }
 0x2dc   :  { %v1968_v61 = vadd.f32 %v7415_v59, %v1848_v56  ;;  %v2193_v53 = vmul.f32 0.2, %v1969_v28  ;;  %vm2081_vm8 = vcmp.ge.f32.partialorder %v1969_v28, 0.0  ;;  %v2312_v21 = vsel %vm2088_vm15, %v1976_v35, %v2200_v49  ;;  %v8390_v35 = vld [vmem:[#allocation7_spill] sm:$0xff] }
 0x2dd   :  { %v1869_v44 = vmul.f32 %v8390_v35, %v7401_v6 }
 0x2de   :  { %5673 = vmatmul.mubr.msk.f32.vlgmr.msra.gmra.mrb[0].mxu0 %vm72_vm1, %v2293_v24  ;;  %v2192_v24 = vmul.f32 0.2, %v1968_v61  ;;  %vm2080_vm7 = vcmp.ge.f32.partialorder %v1968_v61, 0.0  ;;  %v2305_v51 = vsel %vm2081_vm8, %v1969_v28, %v2193_v53 }
 0x2df   :  { %5675 = vmatprep.mubr.msk.f32.mxu0 %vm6295_vm0, %v8384_v54  ;;  %6031 = vmatpush3.bf16.msra.mxu0 %v6030_v63  ;;  %v2303_v63 = vsel %vm2079_vm6, %v1967_v32, %v2191_v58  ;;  %v2314_v32 = vsel %vm2090_vm3, %v1978_v37, %v2202_v62  ;;  %v1861_v58 = vmul.f32 %v7250_v43, %v7401_v6 }
 0x2e0   :  { %6032 = vmatprep.subr.bf16.mxu0 %v8348_v60  ;;  %v2304_v57 = vsel %vm2080_vm7, %v1968_v61, %v2192_v24 }
 0x2e1   :  { %v1981_v16 = vadd.f32 %v7415_v59, %v1861_v58  ;;  %v8394_v58 = vld [vmem:[#allocation11_spill] sm:$0xff] }
 0x2e2   :  { %5676 = vmatmul.mubr.msk.f32.gmra.mrb[2].mxu0 %vm72_vm1, %v2294_v15  ;;  %v1851_v15 = vmul.f32 %v7230_v29, %v7401_v6  ;;  %v2396_v29 = vld [vmem:[%s8305_s3 + $0x60] sm:$0xff] }
 0x2e3   :  { %5678 = vmatprep.mubr.msk.f32.mxu0 %vm6295_vm0, %v8384_v54  ;;  %v2205_v24 = vmul.f32 0.2, %v1981_v16  ;;  %vm2093_vm6 = vcmp.ge.f32.partialorder %v1981_v16, 0.0 }
 0x2e4   :  { %v1971_v30 = vadd.f32 %v7415_v59, %v1851_v15  ;;  %v1864_v15 = vmul.f32 %v7401_v6, %v8385_v27 }
 0x2e6   :  { %5679 = vmatmul.mubr.msk.f32.gmra.mrb[4].mxu0 %vm72_vm1, %v2295_v18  ;;  %v2397_v18 = vld [vmem:[%s8305_s3 + $0x68] sm:$0xff]  ;;  %v2195_v4 = vmul.f32 0.2, %v1971_v30  ;;  %vm2083_vm10 = vcmp.ge.f32.partialorder %v1971_v30, 0.0  ;;  %v1984_v47 = vadd.f32 %v7415_v59, %v1864_v15  ;;  %v8396_v15 = vld [vmem:[#allocation13_spill] sm:$0xff] }
 0x2e7   :  { %5681 = vmatprep.mubr.msk.f32.mxu0 %vm6295_vm0, %v8384_v54 }
 0x2e8   :  { %v2307_v13 = vsel %vm2083_vm10, %v1971_v30, %v2195_v4  ;;  %v8386_v30 = vld [vmem:[#allocation3_spill] sm:$0xff]  ;;  %vm2096_vm9 = vcmp.ge.f32.partialorder %v1984_v47, 0.0  ;;  %v8387_v4 = vld [vmem:[#allocation6_spill] sm:$0xff] }
 0x2e9   :  { %v1865_v55 = vmul.f32 %v8386_v30, %v7401_v6  ;;  %v1866_v52 = vmul.f32 %v7401_v6, %v8387_v4 }
 0x2ea   :  { %5682 = vmatmul.mubr.msk.f32.gmra.mrb[6].mxu0 %vm72_vm1, %v2296_v23  ;;  %v6036_v23 = vpack.c.bf16 %v2397_v18, %v2396_v29  ;;  %v2208_v18 = vmul.f32 0.2, %v1984_v47 }
 0x2eb   :  { %5684 = vmatprep.mubr.msk.f32.mxu0 %vm6295_vm0, %v8384_v54 }
 0x2ee   :  { %5685 = vmatmul.mubr.msk.f32.gmra.mrb[8].mxu0 %vm72_vm1, %v2297_v39  ;;  %v1854_v39 = vmul.f32 %v7401_v6, %v7240_v36  ;;  %v2309_v36 = vsel %vm2085_vm12, %v1973_v1, %v2197_v14  ;;  %v1986_v1 = vadd.f32 %v7415_v59, %v1866_v52 }
 0x2ef   :  { %5687 = vmatprep.mubr.msk.f32.mxu0 %vm6295_vm0, %v8384_v54 }
 0x2f0   :  { %v1974_v20 = vadd.f32 %v7415_v59, %v1854_v39  ;;  %v8388_v39 = vld [vmem:[#allocation5_spill] sm:$0xff]  ;;  %v2210_v5 = vmul.f32 0.2, %v1986_v1  ;;  %vm2098_vm11 = vcmp.ge.f32.partialorder %v1986_v1, 0.0 }
 0x2f2   :  { %5688 = vmatmul.mubr.msk.f32.gmra.mrb[10].mxu0 %vm72_vm1, %v2298_v7  ;;  %v2198_v7 = vmul.f32 0.2, %v1974_v20  ;;  %vm2086_vm13 = vcmp.ge.f32.partialorder %v1974_v20, 0.0  ;;  %v2322_v19 = vsel %vm2098_vm11, %v1986_v1, %v2210_v5 }
 0x2f3   :  { %5690 = vmatprep.mubr.msk.f32.mxu0 %vm6295_vm0, %v8384_v54 }
 0x2f4   :  { %v2310_v9 = vsel %vm2086_vm13, %v1974_v20, %v2198_v7  ;;  %v8389_v7 = vld [vmem:[#allocation8_spill] sm:$0xff] }
 0x2f6   :  { %5691 = vmatmul.mubr.msk.f32.gmra.mrb[12].mxu0 %vm72_vm1, %v2299_v38  ;;  %v2311_v38 = vsel %vm2087_vm14, %v1975_v2, %v2199_v22  ;;  %v1868_v2 = vmul.f32 %v7401_v6, %v8389_v7 }
 0x2f7   :  { %5697 = vmatprep.mubr.msk.f32.mxu0 %vm6295_vm0, %v8384_v54 }
 0x2f8   :  { %v1988_v22 = vadd.f32 %v7415_v59, %v1868_v2 }
 0x2fa   :  { %5698 = vmatmul.mubr.msk.f32.vlgmr.msra.gmra.mrb[0].mxu0 %vm72_vm1, %v2300_v0  ;;  %v1859_v0 = vmul.f32 %v7246_v41, %v7401_v6  ;;  %v1860_v41 = vmul.f32 %v7401_v6, %v7252_v46  ;;  %v2212_v49 = vmul.f32 0.2, %v1988_v22  ;;  %vm2100_vm13 = vcmp.ge.f32.partialorder %v1988_v22, 0.0 }
 0x2fb   :  { %5700 = vmatprep.mubr.msk.f32.mxu0 %vm6295_vm0, %v8384_v54  ;;  %6034 = vmatpush3.bf16.msra.mxu0 %v6033_v50  ;;  %v2201_v50 = vmul.f32 0.2, %v1977_v40 }
 0x2fc   :  { %6035 = vmatprep.subr.bf16.mxu0 %v8348_v60 }
 0x2fd   :  { %v2313_v12 = vsel %vm2089_vm2, %v1977_v40, %v2201_v50  ;;  %v1989_v40 = vadd.f32 %v7415_v59, %v1869_v44  ;;  %v2324_v50 = vsel %vm2100_vm13, %v1988_v22, %v2212_v49  ;;  %v8400_v22 = vld [vmem:[#allocation17_spill] sm:$0xff] }
 0x2fe   :  { %5701 = vmatmul.mubr.msk.f32.gmra.mrb[2].mxu0 %vm72_vm1, %v2301_v26  ;;  %v1979_v26 = vadd.f32 %v7415_v59, %v1859_v0  ;;  %v1879_v35 = vmul.f32 %v8400_v22, %v7401_v6 }
 0x2ff   :  { %5703 = vmatprep.mubr.msk.f32.mxu0 %vm6295_vm0, %v8384_v54  ;;  %v2213_v37 = vmul.f32 0.2, %v1989_v40  ;;  %vm2101_vm14 = vcmp.ge.f32.partialorder %v1989_v40, 0.0 }
 0x300   :  { %v2203_v56 = vmul.f32 0.2, %v1979_v26  ;;  %vm2091_vm4 = vcmp.ge.f32.partialorder %v1979_v26, 0.0 }
 0x302   :  { %5704 = vmatmul.mubr.msk.f32.gmra.mrb[4].mxu0 %vm72_vm1, %v2302_v25  ;;  %v1980_v25 = vadd.f32 %v7415_v59, %v1860_v41  ;;  %v2315_v46 = vsel %vm2091_vm4, %v1979_v26, %v2203_v56  ;;  %v1991_v26 = vadd.f32 %v7415_v59, %v1871_v45  ;;  %v8393_v41 = vld [vmem:[#allocation12_spill] sm:$0xff] }
 0x303   :  { %5706 = vmatprep.mubr.msk.f32.mxu0 %vm6295_vm0, %v8384_v54 }
 0x304   :  { %v2204_v61 = vmul.f32 0.2, %v1980_v25  ;;  %vm2092_vm5 = vcmp.ge.f32.partialorder %v1980_v25, 0.0  ;;  %v2215_v56 = vmul.f32 0.2, %v1991_v26  ;;  %vm2103_vm2 = vcmp.ge.f32.partialorder %v1991_v26, 0.0 }
 0x306   :  { %5707 = vmatmul.mubr.msk.f32.gmra.mrb[6].mxu0 %vm72_vm1, %v2303_v63  ;;  %v1862_v63 = vmul.f32 %v7401_v6, %v7256_v48  ;;  %v2316_v43 = vsel %vm2092_vm5, %v1980_v25, %v2204_v61  ;;  %v1983_v48 = vadd.f32 %v7415_v59, %v1863_v3  ;;  %v2402_v61 = vld [vmem:[%s8305_s3 + $0x90] sm:$0xff] }
 0x307   :  { %5709 = vmatprep.mubr.msk.f32.mxu0 %vm6295_vm0, %v8384_v54 }
 0x308   :  { %v1982_v28 = vadd.f32 %v7415_v59, %v1862_v63  ;;  %v2207_v31 = vmul.f32 0.2, %v1983_v48  ;;  %vm2095_vm8 = vcmp.ge.f32.partialorder %v1983_v48, 0.0  ;;  %v2327_v63 = vsel %vm2103_vm2, %v1991_v26, %v2215_v56 }
 0x30a   :  { %5710 = vmatmul.mubr.msk.f32.gmra.mrb[8].mxu0 %vm72_vm1, %v2304_v57  ;;  %v2317_v57 = vsel %vm2093_vm6, %v1981_v16, %v2205_v24  ;;  %v2206_v53 = vmul.f32 0.2, %v1982_v28  ;;  %vm2094_vm7 = vcmp.ge.f32.partialorder %v1982_v28, 0.0  ;;  %v2319_v29 = vsel %vm2095_vm8, %v1983_v48, %v2207_v31  ;;  %v2403_v16 = vld [vmem:[%s8305_s3 + $0x98] sm:$0xff] }
 0x30b   :  { %5712 = vmatprep.mubr.msk.f32.mxu0 %vm6295_vm0, %v8384_v54 }
 0x30e   :  { %5713 = vmatmul.mubr.msk.f32.gmra.mrb[10].mxu0 %vm72_vm1, %v2305_v51  ;;  %v2318_v51 = vsel %vm2094_vm7, %v1982_v28, %v2206_v53  ;;  %v8395_v28 = vld [vmem:[#allocation14_spill] sm:$0xff] }
 0x30f   :  { %5715 = vmatprep.mubr.msk.f32.mxu0 %vm6295_vm0, %v8384_v54  ;;  %v1874_v3 = vmul.f32 %v7401_v6, %v8395_v28 }
 0x311   :  { %v1994_v27 = vadd.f32 %v7415_v59, %v1874_v3  ;;  %v8404_v3 = vld [vmem:[#allocation21_spill] sm:$0xff] }
 0x312   :  { %5716 = vmatmul.mubr.msk.f32.gmra.mrb[12].mxu0 %vm72_vm1, %v2306_v10  ;;  %v1985_v10 = vadd.f32 %v7415_v59, %v1865_v55  ;;  %v8397_v55 = vld [vmem:[#allocation16_spill] sm:$0xff] }
 0x313   :  { %5722 = vmatprep.mubr.msk.f32.mxu0 %vm6295_vm0, %v8384_v54  ;;  %vm2106_vm5 = vcmp.ge.f32.partialorder %v1994_v27, 0.0 }
 0x314   :  { %v2209_v17 = vmul.f32 0.2, %v1985_v10  ;;  %vm2097_vm10 = vcmp.ge.f32.partialorder %v1985_v10, 0.0 }
 0x316   :  { %5723 = vmatmul.mubr.msk.f32.vlgmr.msra.gmra.mrb[0].mxu0 %vm72_vm1, %v2307_v13  ;;  %v2320_v13 = vsel %vm2096_vm9, %v1984_v47, %v2208_v18  ;;  %v2321_v20 = vsel %vm2097_vm10, %v1985_v10, %v2209_v17  ;;  %v2218_v47 = vmul.f32 0.2, %v1994_v27 }
 0x317   :  { %5725 = vmatprep.mubr.msk.f32.mxu0 %vm6295_vm0, %v8384_v54  ;;  %6037 = vmatpush3.bf16.msra.mxu0 %v6036_v23  ;;  %v2401_v23 = vld [vmem:[%s8305_s3 + $0x88] sm:$0xff] }
 0x318   :  { %6038 = vmatprep.subr.bf16.mxu0 %v8348_v60  ;;  %v6042_v14 = vpack.c.bf16 %v2401_v23, %v2400_v34  ;;  %v2330_v10 = vsel %vm2106_vm5, %v1994_v27, %v2218_v47  ;;  %v8398_v23 = vld [vmem:[#allocation15_spill] sm:$0xff] }
 0x31a   :  { %5726 = vmatmul.mubr.msk.f32.gmra.mrb[2].mxu0 %vm72_vm1, %v2308_v33  ;;  %v1867_v33 = vmul.f32 %v8388_v39, %v7401_v6 }
 0x31b   :  { %5728 = vmatprep.mubr.msk.f32.mxu0 %vm6295_vm0, %v8384_v54 }
 0x31e   :  { %5729 = vmatmul.mubr.msk.f32.gmra.mrb[4].mxu0 %vm72_vm1, %v2309_v36  ;;  %v1987_v36 = vadd.f32 %v7415_v59, %v1867_v33 }
 0x31f   :  { %5731 = vmatprep.mubr.msk.f32.mxu0 %vm6295_vm0, %v8384_v54 }
 0x320   :  { %vm2099_vm12 = vcmp.ge.f32.partialorder %v1987_v36, 0.0 }
 0x322   :  { %5732 = vmatmul.mubr.msk.f32.gmra.mrb[6].mxu0 %vm72_vm1, %v2310_v9  ;;  %v2211_v9 = vmul.f32 0.2, %v1987_v36 }
 0x323   :  { %5734 = vmatprep.mubr.msk.f32.mxu0 %vm6295_vm0, %v8384_v54 }
 0x326   :  { %5735 = vmatmul.mubr.msk.f32.gmra.mrb[8].mxu0 %vm72_vm1, %v2311_v38  ;;  %v2323_v38 = vsel %vm2099_vm12, %v1987_v36, %v2211_v9 }
 0x327   :  { %5737 = vmatprep.mubr.msk.f32.mxu0 %vm6295_vm0, %v8384_v54 }
 0x32a   :  { %5738 = vmatmul.mubr.msk.f32.gmra.mrb[10].mxu0 %vm72_vm1, %v2312_v21  ;;  %v1870_v21 = vmul.f32 %v7401_v6, %v8391_v8 }
 0x32b   :  { %5740 = vmatprep.mubr.msk.f32.mxu0 %vm6295_vm0, %v8384_v54 }
 0x32c   :  { %v1990_v0 = vadd.f32 %v7415_v59, %v1870_v21  ;;  %v8401_v21 = vld [vmem:[#allocation20_spill] sm:$0xff] }
 0x32e   :  { %5741 = vmatmul.mubr.msk.f32.gmra.mrb[12].mxu0 %vm72_vm1, %v2313_v12  ;;  %v2325_v12 = vsel %vm2101_vm14, %v1989_v40, %v2213_v37  ;;  %v2214_v62 = vmul.f32 0.2, %v1990_v0  ;;  %vm2102_vm15 = vcmp.ge.f32.partialorder %v1990_v0, 0.0  ;;  %v1999_v40 = vadd.f32 %v7415_v59, %v1879_v35  ;;  %v2404_v37 = vld [vmem:[%s8305_s3 + $0xa0] sm:$0xff] }
 0x32f   :  { %5747 = vmatprep.mubr.msk.f32.mxu0 %vm6295_vm0, %v8384_v54 }
 0x330   :  { %vm2111_vm10 = vcmp.ge.f32.partialorder %v1999_v40, 0.0 }
 0x332   :  { %5748 = vmatmul.mubr.msk.f32.vlgmr.msra.gmra.mrb[0].mxu0 %vm72_vm1, %v2314_v32  ;;  %v2326_v32 = vsel %vm2102_vm15, %v1990_v0, %v2214_v62  ;;  %v2405_v0 = vld [vmem:[%s8305_s3 + $0xa8] sm:$0xff] }
 0x333   :  { %5750 = vmatprep.mubr.msk.f32.mxu0 %vm6295_vm0, %v8384_v54  ;;  %6040 = vmatpush3.bf16.msra.mxu0 %v6039_v11  ;;  %v1872_v11 = vmul.f32 %v7401_v6, %v8393_v41  ;;  %v8402_v41 = vld [vmem:[#allocation19_spill] sm:$0xff] }
 0x334   :  { %6041 = vmatprep.subr.bf16.mxu0 %v8348_v60 }
 0x335   :  { %v1992_v25 = vadd.f32 %v7415_v59, %v1872_v11  ;;  %v1881_v11 = vmul.f32 %v8402_v41, %v7401_v6 }
 0x336   :  { %5751 = vmatmul.mubr.msk.f32.gmra.mrb[2].mxu0 %vm72_vm1, %v2315_v46  ;;  %v1873_v46 = vmul.f32 %v8394_v58, %v7401_v6 }
 0x337   :  { %5753 = vmatprep.mubr.msk.f32.mxu0 %vm6295_vm0, %v8384_v54  ;;  %vm2104_vm3 = vcmp.ge.f32.partialorder %v1992_v25, 0.0 }
 0x338   :  { %v1993_v24 = vadd.f32 %v7415_v59, %v1873_v46  ;;  %v2001_v46 = vadd.f32 %v7415_v59, %v1881_v11  ;;  %v8412_v11 = vld [vmem:[#allocation29_spill] sm:$0xff] }
 0x33a   :  { %5754 = vmatmul.mubr.msk.f32.gmra.mrb[4].mxu0 %vm72_vm1, %v2316_v43  ;;  %v2216_v43 = vmul.f32 0.2, %v1992_v25  ;;  %v2217_v48 = vmul.f32 0.2, %v1993_v24  ;;  %vm2105_vm4 = vcmp.ge.f32.partialorder %v1993_v24, 0.0  ;;  %vm2113_vm12 = vcmp.ge.f32.partialorder %v2001_v46, 0.0 }
 0x33b   :  { %5756 = vmatprep.mubr.msk.f32.mxu0 %vm6295_vm0, %v8384_v54 }
 0x33c   :  { %v2328_v53 = vsel %vm2104_vm3, %v1992_v25, %v2216_v43  ;;  %v2329_v31 = vsel %vm2105_vm4, %v1993_v24, %v2217_v48  ;;  %v2225_v24 = vmul.f32 0.2, %v2001_v46 }
 0x33e   :  { %5757 = vmatmul.mubr.msk.f32.gmra.mrb[6].mxu0 %vm72_vm1, %v2317_v57  ;;  %v6045_v57 = vpack.c.bf16 %v2403_v16, %v2402_v61  ;;  %v8403_v16 = vld [vmem:[#allocation22_spill] sm:$0xff] }
 0x33f   :  { %5759 = vmatprep.mubr.msk.f32.mxu0 %vm6295_vm0, %v8384_v54 }
 0x342   :  { %5760 = vmatmul.mubr.msk.f32.gmra.mrb[8].mxu0 %vm72_vm1, %v2318_v51  ;;  %v1875_v51 = vmul.f32 %v8396_v15, %v7401_v6  ;;  %v8405_v15 = vld [vmem:[#allocation24_spill] sm:$0xff] }
 0x343   :  { %5762 = vmatprep.mubr.msk.f32.mxu0 %vm6295_vm0, %v8384_v54 }
 0x344   :  { %v1995_v30 = vadd.f32 %v7415_v59, %v1875_v51  ;;  %v1884_v51 = vmul.f32 %v7401_v6, %v8405_v15 }
 0x346   :  { %5763 = vmatmul.mubr.msk.f32.gmra.mrb[10].mxu0 %vm72_vm1, %v2319_v29  ;;  %v1876_v29 = vmul.f32 %v7401_v6, %v8397_v55  ;;  %v2219_v4 = vmul.f32 0.2, %v1995_v30  ;;  %vm2107_vm6 = vcmp.ge.f32.partialorder %v1995_v30, 0.0  ;;  %v8406_v55 = vld [vmem:[#allocation23_spill] sm:$0xff] }
 0x347   :  { %5765 = vmatprep.mubr.msk.f32.mxu0 %vm6295_vm0, %v8384_v54 }
 0x348   :  { %v1996_v52 = vadd.f32 %v7415_v59, %v1876_v29  ;;  %v2331_v1 = vsel %vm2107_vm6, %v1995_v30, %v2219_v4  ;;  %v2004_v30 = vadd.f32 %v7415_v59, %v1884_v51  ;;  %v1885_v29 = vmul.f32 %v8406_v55, %v7401_v6  ;;  %v2408_v51 = vld [vmem:[%s8305_s3 + $0xc0] sm:$0xff] }
 0x34a   :  { %5766 = vmatmul.mubr.msk.f32.gmra.mrb[12].mxu0 %vm72_vm1, %v2320_v13  ;;  %v1877_v13 = vmul.f32 %v8398_v23, %v7401_v6  ;;  %v2220_v39 = vmul.f32 0.2, %v1996_v52  ;;  %vm2108_vm7 = vcmp.ge.f32.partialorder %v1996_v52, 0.0  ;;  %v2228_v4 = vmul.f32 0.2, %v2004_v30 }
 0x34b   :  { %5772 = vmatprep.mubr.msk.f32.mxu0 %vm6295_vm0, %v8384_v54  ;;  %vm2116_vm15 = vcmp.ge.f32.partialorder %v2004_v30, 0.0 }
 0x34c   :  { %v1997_v33 = vadd.f32 %v7415_v59, %v1877_v13  ;;  %v2332_v7 = vsel %vm2108_vm7, %v1996_v52, %v2220_v39  ;;  %v2005_v52 = vadd.f32 %v7415_v59, %v1885_v29  ;;  %v2340_v13 = vsel %vm2116_vm15, %v2004_v30, %v2228_v4  ;;  %v8416_v29 = vld [vmem:[#allocation33_spill] sm:$0xff] }
 0x34e   :  { %5773 = vmatmul.mubr.msk.f32.vlgmr.msra.gmra.mrb[0].mxu0 %vm72_vm1, %v2321_v20  ;;  %v8399_v20 = vld [vmem:[#allocation18_spill] sm:$0xff]  ;;  %v2221_v2 = vmul.f32 0.2, %v1997_v33  ;;  %vm2109_vm8 = vcmp.ge.f32.partialorder %v1997_v33, 0.0  ;;  %vm2117_vm2 = vcmp.ge.f32.partialorder %v2005_v52, 0.0 }
 0x34f   :  { %5775 = vmatprep.mubr.msk.f32.mxu0 %vm6295_vm0, %v8384_v54  ;;  %6043 = vmatpush3.bf16.msra.mxu0 %v6042_v14  ;;  %v1878_v5 = vmul.f32 %v7401_v6, %v8399_v20  ;;  %v2406_v20 = vld [vmem:[%s8305_s3 + $0xb0] sm:$0xff] }
 0x350   :  { %6044 = vmatprep.subr.bf16.mxu0 %v8348_v60 }
 0x352   :  { %5776 = vmatmul.mubr.msk.f32.gmra.mrb[2].mxu0 %vm72_vm1, %v2322_v19  ;;  %v1998_v19 = vadd.f32 %v7415_v59, %v1878_v5  ;;  %v2407_v5 = vld [vmem:[%s8305_s3 + $0xb8] sm:$0xff] }
 0x353   :  { %5778 = vmatprep.mubr.msk.f32.mxu0 %vm6295_vm0, %v8384_v54  ;;  %v6051_v35 = vpack.c.bf16 %v2407_v5, %v2406_v20  ;;  %v8418_v20 = vld [vmem:[#allocation35_spill] sm:$0xff] }
 0x354   :  { %v2222_v49 = vmul.f32 0.2, %v1998_v19  ;;  %vm2110_vm9 = vcmp.ge.f32.partialorder %v1998_v19, 0.0  ;;  %v1897_v5 = vmul.f32 %v8418_v20, %v7401_v6 }
 0x356   :  { %5779 = vmatmul.mubr.msk.f32.gmra.mrb[4].mxu0 %vm72_vm1, %v2323_v38  ;;  %v2333_v38 = vsel %vm2109_vm8, %v1997_v33, %v2221_v2  ;;  %v2334_v45 = vsel %vm2110_vm9, %v1998_v19, %v2222_v49  ;;  %v8408_v33 = vld [vmem:[#allocation25_spill] sm:$0xff] }
 0x357   :  { %5781 = vmatprep.mubr.msk.f32.mxu0 %vm6295_vm0, %v8384_v54 }
 0x35a   :  { %5782 = vmatmul.mubr.msk.f32.gmra.mrb[6].mxu0 %vm72_vm1, %v2324_v50  ;;  %v1880_v50 = vmul.f32 %v7401_v6, %v8401_v21 }
 0x35b   :  { %5784 = vmatprep.mubr.msk.f32.mxu0 %vm6295_vm0, %v8384_v54 }
 0x35c   :  { %v2000_v62 = vadd.f32 %v7415_v59, %v1880_v50 }
 0x35e   :  { %5785 = vmatmul.mubr.msk.f32.gmra.mrb[8].mxu0 %vm72_vm1, %v2325_v12  ;;  %v2223_v12 = vmul.f32 0.2, %v1999_v40  ;;  %v2224_v58 = vmul.f32 0.2, %v2000_v62  ;;  %vm2112_vm11 = vcmp.ge.f32.partialorder %v2000_v62, 0.0 }
 0x35f   :  { %5787 = vmatprep.mubr.msk.f32.mxu0 %vm6295_vm0, %v8384_v54 }
 0x360   :  { %v2335_v25 = vsel %vm2111_vm10, %v1999_v40, %v2223_v12  ;;  %v2336_v43 = vsel %vm2112_vm11, %v2000_v62, %v2224_v58 }
 0x362   :  { %5788 = vmatmul.mubr.msk.f32.gmra.mrb[10].mxu0 %vm72_vm1, %v2326_v32  ;;  %v6048_v32 = vpack.c.bf16 %v2405_v0, %v2404_v37 }
 0x363   :  { %5790 = vmatprep.mubr.msk.f32.mxu0 %vm6295_vm0, %v8384_v54 }
 0x366   :  { %5791 = vmatmul.mubr.msk.f32.gmra.mrb[12].mxu0 %vm72_vm1, %v2327_v63  ;;  %v1882_v63 = vmul.f32 %v7401_v6, %v8403_v16 }
 0x367   :  { %5797 = vmatprep.mubr.msk.f32.mxu0 %vm6295_vm0, %v8384_v54 }
 0x368   :  { %v2002_v28 = vadd.f32 %v7415_v59, %v1882_v63 }
 0x36a   :  { %5798 = vmatmul.mubr.msk.f32.vlgmr.msra.gmra.mrb[0].mxu0 %vm72_vm1, %v2328_v53  ;;  %v2337_v53 = vsel %vm2113_vm12, %v2001_v46, %v2225_v24  ;;  %v2226_v48 = vmul.f32 0.2, %v2002_v28  ;;  %vm2114_vm13 = vcmp.ge.f32.partialorder %v2002_v28, 0.0 }
 0x36b   :  { %5800 = vmatprep.mubr.msk.f32.mxu0 %vm6295_vm0, %v8384_v54  ;;  %6046 = vmatpush3.bf16.msra.mxu0 %v6045_v57  ;;  %v1883_v57 = vmul.f32 %v8404_v3, %v7401_v6 }
 0x36c   :  { %6047 = vmatprep.subr.bf16.mxu0 %v8348_v60 }
 0x36d   :  { %v2003_v27 = vadd.f32 %v7415_v59, %v1883_v57 }
 0x36e   :  { %5801 = vmatmul.mubr.msk.f32.gmra.mrb[2].mxu0 %vm72_vm1, %v2329_v31  ;;  %v2338_v31 = vsel %vm2114_vm13, %v2002_v28, %v2226_v48  ;;  %v8414_v28 = vld [vmem:[#allocation31_spill] sm:$0xff] }
 0x36f   :  { %5803 = vmatprep.mubr.msk.f32.mxu0 %vm6295_vm0, %v8384_v54  ;;  %v2227_v47 = vmul.f32 0.2, %v2003_v27  ;;  %vm2115_vm14 = vcmp.ge.f32.partialorder %v2003_v27, 0.0  ;;  %v1893_v3 = vmul.f32 %v8414_v28, %v7401_v6 }
 0x371   :  { %v7824_v18 = vpop.f32.mrb[198].mxu1  ;;  %v2013_v48 = vadd.f32 %v7415_v59, %v1893_v3 }
 0x372   :  { %v5602_v34 = vpop.f32.mrb[199].mxu1  ;;  %5804 = vmatmul.mubr.msk.f32.gmra.mrb[4].mxu0 %vm72_vm1, %v2330_v10  ;;  %v2339_v10 = vsel %vm2115_vm14, %v2003_v27, %v2227_v47  ;;  %v8415_v27 = vld [vmem:[#allocation34_spill] sm:$0xff] }
 0x373   :  { %5806 = vmatprep.mubr.msk.f32.mxu0 %vm6295_vm0, %v8384_v54  ;;  %v8407_v34 = vld [vmem:[#allocation26_spill] sm:$0xff]  ;;  %v1894_v15 = vmul.f32 %v7401_v6, %v8415_v27  ;;  %v2237_v30 = vmul.f32 0.2, %v2013_v48  ;;  %vm2125_vm10 = vcmp.ge.f32.partialorder %v2013_v48, 0.0 }
 0x374   :  { %v1886_v23 = vmul.f32 %v7401_v6, %v8407_v34 }
 0x375   :  { %v7832_v17 = vpop.f32.mrb[200].mxu1  ;;  %v2014_v55 = vadd.f32 %v7415_v59, %v1894_v15 }
 0x376   :  { %v5605_v14 = vpop.f32.mrb[201].mxu1  ;;  %5807 = vmatmul.mubr.msk.f32.gmra.mrb[6].mxu0 %vm72_vm1, %v2331_v1  ;;  %v2229_v1 = vmul.f32 0.2, %v2005_v52  ;;  %v2006_v39 = vadd.f32 %v7415_v59, %v1886_v23 }
 0x377   :  { %5809 = vmatprep.mubr.msk.f32.mxu0 %vm6295_vm0, %v8384_v54  ;;  %v1887_v14 = vmul.f32 %v8408_v33, %v7401_v6  ;;  %v2238_v34 = vmul.f32 0.2, %v2014_v55  ;;  %vm2126_vm11 = vcmp.ge.f32.partialorder %v2014_v55, 0.0 }
 0x378   :  { %v2230_v2 = vmul.f32 0.2, %v2006_v39  ;;  %vm2118_vm3 = vcmp.ge.f32.partialorder %v2006_v39, 0.0 }
 0x379   :  { %v7840_v36 = vpop.f32.mrb[202].mxu1  ;;  %v2007_v19 = vadd.f32 %v7415_v59, %v1887_v14 }
 0x37a   :  { %v5608_v9 = vpop.f32.mrb[203].mxu1  ;;  %5810 = vmatmul.mubr.msk.f32.gmra.mrb[8].mxu0 %vm72_vm1, %v2332_v7  ;;  %v2341_v7 = vsel %vm2117_vm2, %v2005_v52, %v2229_v1  ;;  %v2349_v52 = vsel %vm2125_vm10, %v2013_v48, %v2237_v30 }
 0x37b   :  { %5812 = vmatprep.mubr.msk.f32.mxu0 %vm6295_vm0, %v8384_v54  ;;  %v8409_v9 = vld [vmem:[#allocation28_spill] sm:$0xff]  ;;  %v2231_v49 = vmul.f32 0.2, %v2007_v19  ;;  %vm2119_vm4 = vcmp.ge.f32.partialorder %v2007_v19, 0.0 }
 0x37c   :  { %v1888_v22 = vmul.f32 %v7401_v6, %v8409_v9  ;;  %v8419_v9 = vld [vmem:[#allocation39_spill] sm:$0xff] }
 0x37d   :  { %v7848_v44 = vpop.f32.mrb[204].mxu1  ;;  %v2343_v50 = vsel %vm2119_vm4, %v2007_v19, %v2231_v49  ;;  %v2017_v19 = vadd.f32 %v7415_v59, %v1897_v5 }
 0x37e   :  { %v5611_v8 = vpop.f32.mrb[205].mxu1  ;;  %5813 = vmatmul.mubr.msk.f32.gmra.mrb[10].mxu0 %vm72_vm1, %v2333_v38  ;;  %v2342_v38 = vsel %vm2118_vm3, %v2006_v39, %v2230_v2  ;;  %v2008_v40 = vadd.f32 %v7415_v59, %v1888_v22  ;;  %v2350_v39 = vsel %vm2126_vm11, %v2014_v55, %v2238_v34  ;;  %v1898_v22 = vmul.f32 %v7401_v6, %v8419_v9 }
 0x37f   :  { %5815 = vmatprep.mubr.msk.f32.mxu0 %vm6295_vm0, %v8384_v54  ;;  %v8410_v8 = vld [vmem:[#allocation27_spill] sm:$0xff]  ;;  %vm2129_vm14 = vcmp.ge.f32.partialorder %v2017_v19, 0.0 }
 0x380   :  { %v1889_v21 = vmul.f32 %v8410_v8, %v7401_v6  ;;  %v2232_v37 = vmul.f32 0.2, %v2008_v40  ;;  %vm2120_vm5 = vcmp.ge.f32.partialorder %v2008_v40, 0.0  ;;  %v2018_v49 = vadd.f32 %v7415_v59, %v1898_v22  ;;  %v2412_v22 = vld [vmem:[%s8305_s3 + $0xe0] sm:$0xff] }
 0x381   :  { %v7862_v42 = vpop.f32.mrb[206].mxu1 }
 0x382   :  { %v5614_v26 = vpop.f32.mrb[207].mxu1  ;;  %5816 = vmatmul.mubr.msk.f32.gmra.mrb[12].mxu0 %vm72_vm1, %v2334_v45  ;;  %v2009_v0 = vadd.f32 %v7415_v59, %v1889_v21  ;;  %v8411_v45 = vld [vmem:[#allocation30_spill] sm:$0xff]  ;;  %v2344_v62 = vsel %vm2120_vm5, %v2008_v40, %v2232_v37  ;;  %vm2130_vm15 = vcmp.ge.f32.partialorder %v2018_v49, 0.0 }
 0x383   :  { %5822 = vmatprep.mubr.msk.f32.mxu0 %vm6295_vm0, %v8384_v54  ;;  %v1890_v12 = vmul.f32 %v7401_v6, %v8411_v45  ;;  %v8420_v40 = vld [vmem:[#allocation38_spill] sm:$0xff] }
 0x384   :  { %v2233_v26 = vmul.f32 0.2, %v2009_v0  ;;  %vm2121_vm6 = vcmp.ge.f32.partialorder %v2009_v0, 0.0  ;;  %v1899_v8 = vmul.f32 %v8420_v40, %v7401_v6 }
 0x385   :  { %v7870_v56 = vpop.f32.mrb[208].mxu1  ;;  %v2010_v41 = vadd.f32 %v7415_v59, %v1890_v12 }
 0x386   :  { %v5617_v61 = vpop.f32.mrb[209].mxu1  ;;  %5823 = vmatmul.mubr.msk.f32.vlgmr.msra.gmra.mrb[0].mxu0 %vm72_vm1, %v2335_v25  ;;  %v2345_v25 = vsel %vm2121_vm6, %v2009_v0, %v2233_v26  ;;  %v2019_v37 = vadd.f32 %v7415_v59, %v1899_v8  ;;  %v8421_v0 = vld [vmem:[#allocation41_spill] sm:$0xff]  ;;  %v8430_v8 = vld [vmem:[#allocation48_spill] sm:$0xff] }
 0x387   :  { %5825 = vmatprep.mubr.msk.f32.mxu0 %vm6295_vm0, %v8384_v54  ;;  %6049 = vmatpush3.bf16.msra.mxu0 %v6048_v32  ;;  %v1891_v32 = vmul.f32 %v8412_v11, %v7401_v6  ;;  %v2234_v58 = vmul.f32 0.2, %v2010_v41  ;;  %vm2122_vm7 = vcmp.ge.f32.partialorder %v2010_v41, 0.0  ;;  %v8413_v61 = vld [vmem:[#allocation32_spill] sm:$0xff]  ;;  %v1900_v45 = vmul.f32 %v7401_v6, %v8421_v0 }
 0x388   :  { %6050 = vmatprep.subr.bf16.mxu0 %v8348_v60  ;;  %v1892_v16 = vmul.f32 %v7401_v6, %v8413_v61  ;;  %vm2131_vm2 = vcmp.ge.f32.partialorder %v2019_v37, 0.0 }
 0x389   :  { %v2011_v46 = vadd.f32 %v7415_v59, %v1891_v32  ;;  %v2346_v63 = vsel %vm2122_vm7, %v2010_v41, %v2234_v58  ;;  %v2020_v26 = vadd.f32 %v7415_v59, %v1900_v45  ;;  %v8422_v41 = vld [vmem:[#allocation40_spill] sm:$0xff] }
 0x38a   :  { %5826 = vmatmul.mubr.msk.f32.gmra.mrb[2].mxu0 %vm72_vm1, %v2336_v43  ;;  %v2012_v24 = vadd.f32 %v7415_v59, %v1892_v16  ;;  %v1901_v11 = vmul.f32 %v8422_v41, %v7401_v6  ;;  %v2410_v32 = vld [vmem:[%s8305_s3 + $0xd0] sm:$0xff]  ;;  %v8423_v16 = vld [vmem:[#allocation43_spill] sm:$0xff] }
 0x38b   :  { %5828 = vmatprep.mubr.msk.f32.mxu0 %vm6295_vm0, %v8384_v54  ;;  %v2235_v43 = vmul.f32 0.2, %v2011_v46  ;;  %vm2123_vm8 = vcmp.ge.f32.partialorder %v2011_v46, 0.0  ;;  %vm2132_vm3 = vcmp.ge.f32.partialorder %v2020_v26, 0.0 }
 0x38c   :  { %vm2124_vm9 = vcmp.ge.f32.partialorder %v2012_v24, 0.0  ;;  %v2021_v61 = vadd.f32 %v7415_v59, %v1901_v11 }
 0x38d   :  { %v2347_v57 = vsel %vm2123_vm8, %v2011_v46, %v2235_v43  ;;  %v2244_v46 = vmul.f32 0.2, %v2020_v26 }
 0x38e   :  { %5829 = vmatmul.mubr.msk.f32.gmra.mrb[4].mxu0 %vm72_vm1, %v2337_v53  ;;  %v2236_v53 = vmul.f32 0.2, %v2012_v24  ;;  %v2245_v28 = vmul.f32 0.2, %v2021_v61  ;;  %vm2133_vm4 = vcmp.ge.f32.partialorder %v2021_v61, 0.0 }
 0x38f   :  { %5831 = vmatprep.mubr.msk.f32.mxu0 %vm6295_vm0, %v8384_v54 }
 0x390   :  { %v2348_v47 = vsel %vm2124_vm9, %v2012_v24, %v2236_v53  ;;  %v2356_v24 = vsel %vm2132_vm3, %v2020_v26, %v2244_v46  ;;  %v2357_v48 = vsel %vm2133_vm4, %v2021_v61, %v2245_v28 }
 0x392   :  { %5832 = vmatmul.mubr.msk.f32.gmra.mrb[6].mxu0 %vm72_vm1, %v2338_v31  ;;  %v2409_v31 = vld [vmem:[%s8305_s3 + $0xc8] sm:$0xff] }
 0x393   :  { %5834 = vmatprep.mubr.msk.f32.mxu0 %vm6295_vm0, %v8384_v54  ;;  %v6054_v4 = vpack.c.bf16 %v2409_v31, %v2408_v51  ;;  %v8425_v51 = vld [vmem:[#allocation45_spill] sm:$0xff] }
 0x394   :  { %v1904_v31 = vmul.f32 %v7401_v6, %v8425_v51 }
 0x396   :  { %5835 = vmatmul.mubr.msk.f32.gmra.mrb[8].mxu0 %vm72_vm1, %v2339_v10  ;;  %v1895_v10 = vmul.f32 %v8416_v29, %v7401_v6  ;;  %v2024_v55 = vadd.f32 %v7415_v59, %v1904_v31  ;;  %v8426_v29 = vld [vmem:[#allocation44_spill] sm:$0xff] }
 0x397   :  { %5837 = vmatprep.mubr.msk.f32.mxu0 %vm6295_vm0, %v8384_v54 }
 0x398   :  { %v2015_v23 = vadd.f32 %v7415_v59, %v1895_v10  ;;  %v1905_v10 = vmul.f32 %v8426_v29, %v7401_v6  ;;  %vm2136_vm7 = vcmp.ge.f32.partialorder %v2024_v55, 0.0 }
 0x39a   :  { %5838 = vmatmul.mubr.msk.f32.gmra.mrb[10].mxu0 %vm72_vm1, %v2340_v13  ;;  %v8417_v13 = vld [vmem:[#allocation37_spill] sm:$0xff]  ;;  %v2239_v33 = vmul.f32 0.2, %v2015_v23  ;;  %vm2127_vm12 = vcmp.ge.f32.partialorder %v2015_v23, 0.0  ;;  %v2025_v34 = vadd.f32 %v7415_v59, %v1905_v10  ;;  %v2414_v10 = vld [vmem:[%s8305_s3 + $0xf0] sm:$0xff] }
 0x39b   :  { %5840 = vmatprep.mubr.msk.f32.mxu0 %vm6295_vm0, %v8384_v54  ;;  %v1896_v1 = vmul.f32 %v7401_v6, %v8417_v13 }
 0x39c   :  { %vm2137_vm8 = vcmp.ge.f32.partialorder %v2025_v34, 0.0 }
 0x39d   :  { %v2016_v14 = vadd.f32 %v7415_v59, %v1896_v1 }
 0x39e   :  { %5841 = vmatmul.mubr.msk.f32.gmra.mrb[12].mxu0 %vm72_vm1, %v2341_v7  ;;  %v2351_v7 = vsel %vm2127_vm12, %v2015_v23, %v2239_v33  ;;  %v8427_v23 = vld [vmem:[#allocation47_spill] sm:$0xff] }
 0x39f   :  { %5847 = vmatprep.mubr.msk.f32.mxu0 %vm6295_vm0, %v8384_v54  ;;  %v2240_v2 = vmul.f32 0.2, %v2016_v14  ;;  %vm2128_vm13 = vcmp.ge.f32.partialorder %v2016_v14, 0.0  ;;  %v1906_v13 = vmul.f32 %v7401_v6, %v8427_v23 }
 0x3a1   :  { %v2026_v33 = vadd.f32 %v7415_v59, %v1906_v13  ;;  %v8437_v13 = vld [vmem:[#allocation57_spill] sm:$0xff] }
 0x3a2   :  { %5848 = vmatmul.mubr.msk.f32.vlgmr.msra.gmra.mrb[0].mxu0 %vm72_vm1, %v2342_v38  ;;  %v2241_v38 = vmul.f32 0.2, %v2017_v19 }
 0x3a3   :  { %5850 = vmatprep.mubr.msk.f32.mxu0 %vm6295_vm0, %v8384_v54  ;;  %6052 = vmatpush3.bf16.msra.mxu0 %v6051_v35  ;;  %v2352_v35 = vsel %vm2128_vm13, %v2016_v14, %v2240_v2  ;;  %v8428_v14 = vld [vmem:[#allocation46_spill] sm:$0xff]  ;;  %vm2138_vm9 = vcmp.ge.f32.partialorder %v2026_v33, 0.0 }
 0x3a4   :  { %6053 = vmatprep.subr.bf16.mxu0 %v8348_v60  ;;  %v2353_v21 = vsel %vm2129_vm14, %v2017_v19, %v2241_v38  ;;  %v1907_v20 = vmul.f32 %v8428_v14, %v7401_v6  ;;  %v8429_v19 = vld [vmem:[#allocation49_spill] sm:$0xff] }
 0x3a5   :  { %v1908_v9 = vmul.f32 %v7401_v6, %v8429_v19 }
 0x3a6   :  { %5851 = vmatmul.mubr.msk.f32.gmra.mrb[2].mxu0 %vm72_vm1, %v2343_v50  ;;  %v2242_v50 = vmul.f32 0.2, %v2018_v49  ;;  %v2027_v2 = vadd.f32 %v7415_v59, %v1907_v20 }
 0x3a7   :  { %5853 = vmatprep.mubr.msk.f32.mxu0 %vm6295_vm0, %v8384_v54  ;;  %v2028_v40 = vadd.f32 %v7415_v59, %v1908_v9 }
 0x3a8   :  { %v2354_v12 = vsel %vm2130_vm15, %v2018_v49, %v2242_v50  ;;  %v2251_v49 = vmul.f32 0.2, %v2027_v2  ;;  %vm2139_vm10 = vcmp.ge.f32.partialorder %v2027_v2, 0.0 }
 0x3a9   :  { %v2252_v0 = vmul.f32 0.2, %v2028_v40  ;;  %vm2140_vm11 = vcmp.ge.f32.partialorder %v2028_v40, 0.0 }
 0x3aa   :  { %5854 = vmatmul.mubr.msk.f32.gmra.mrb[4].mxu0 %vm72_vm1, %v2344_v62  ;;  %v2243_v62 = vmul.f32 0.2, %v2019_v37 }
 0x3ab   :  { %5856 = vmatprep.mubr.msk.f32.mxu0 %vm6295_vm0, %v8384_v54  ;;  %v2364_v26 = vsel %vm2140_vm11, %v2028_v40, %v2252_v0 }
 0x3ac   :  { %v2355_v58 = vsel %vm2131_vm2, %v2019_v37, %v2243_v62  ;;  %v2363_v37 = vsel %vm2139_vm10, %v2027_v2, %v2251_v49 }
 0x3ae   :  { %5857 = vmatmul.mubr.msk.f32.gmra.mrb[6].mxu0 %vm72_vm1, %v2345_v25  ;;  %v2411_v25 = vld [vmem:[%s8305_s3 + $0xd8] sm:$0xff] }
 0x3af   :  { %5859 = vmatprep.mubr.msk.f32.mxu0 %vm6295_vm0, %v8384_v54  ;;  %v6057_v43 = vpack.c.bf16 %v2411_v25, %v2410_v32  ;;  %v8432_v32 = vld [vmem:[#allocation50_spill] sm:$0xff] }
 0x3b0   :  { %v1911_v25 = vmul.f32 %v8432_v32, %v7401_v6 }
 0x3b2   :  { %5860 = vmatmul.mubr.msk.f32.gmra.mrb[8].mxu0 %vm72_vm1, %v2346_v63  ;;  %v1902_v63 = vmul.f32 %v7401_v6, %v8423_v16  ;;  %v2031_v61 = vadd.f32 %v7415_v59, %v1911_v25  ;;  %v8433_v16 = vld [vmem:[#allocation53_spill] sm:$0xff] }
 0x3b3   :  { %5862 = vmatprep.mubr.msk.f32.mxu0 %vm6295_vm0, %v8384_v54 }
 0x3b4   :  { %v2022_v3 = vadd.f32 %v7415_v59, %v1902_v63  ;;  %v1912_v63 = vmul.f32 %v7401_v6, %v8433_v16  ;;  %vm2143_vm14 = vcmp.ge.f32.partialorder %v2031_v61, 0.0 }
 0x3b6   :  { %5863 = vmatmul.mubr.msk.f32.gmra.mrb[10].mxu0 %vm72_vm1, %v2347_v57  ;;  %v8424_v57 = vld [vmem:[#allocation42_spill] sm:$0xff]  ;;  %v2246_v27 = vmul.f32 0.2, %v2022_v3  ;;  %vm2134_vm5 = vcmp.ge.f32.partialorder %v2022_v3, 0.0  ;;  %v2032_v28 = vadd.f32 %v7415_v59, %v1912_v63 }
 0x3b7   :  { %5865 = vmatprep.mubr.msk.f32.mxu0 %vm6295_vm0, %v8384_v54  ;;  %v1903_v53 = vmul.f32 %v8424_v57, %v7401_v6 }
 0x3b8   :  { %vm2144_vm15 = vcmp.ge.f32.partialorder %v2032_v28, 0.0 }
 0x3b9   :  { %v2023_v15 = vadd.f32 %v7415_v59, %v1903_v53 }
 0x3ba   :  { %5866 = vmatmul.mubr.msk.f32.gmra.mrb[12].mxu0 %vm72_vm1, %v2348_v47  ;;  %v2358_v47 = vsel %vm2134_vm5, %v2022_v3, %v2246_v27  ;;  %v8434_v3 = vld [vmem:[#allocation52_spill] sm:$0xff] }
 0x3bb   :  { %5872 = vmatprep.mubr.msk.f32.mxu0 %vm6295_vm0, %v8384_v54  ;;  %v2247_v30 = vmul.f32 0.2, %v2023_v15  ;;  %vm2135_vm6 = vcmp.ge.f32.partialorder %v2023_v15, 0.0  ;;  %v1913_v57 = vmul.f32 %v8434_v3, %v7401_v6 }
 0x3bd   :  { %v2033_v27 = vadd.f32 %v7415_v59, %v1913_v57 }
 0x3be   :  { %5873 = vmatmul.mubr.msk.f32.vlgmr.msra.gmra.mrb[0].mxu0 %vm72_vm1, %v2349_v52  ;;  %v2248_v52 = vmul.f32 0.2, %v2024_v55 }
 0x3bf   :  { %5875 = vmatprep.mubr.msk.f32.mxu0 %vm6295_vm0, %v8384_v54  ;;  %6055 = vmatpush3.bf16.msra.mxu0 %v6054_v4  ;;  %v2359_v4 = vsel %vm2135_vm6, %v2023_v15, %v2247_v30  ;;  %v8435_v15 = vld [vmem:[#allocation55_spill] sm:$0xff]  ;;  %vm2145_vm2 = vcmp.ge.f32.partialorder %v2033_v27, 0.0 }
 0x3c0   :  { %6056 = vmatprep.subr.bf16.mxu0 %v8348_v60  ;;  %v2360_v1 = vsel %vm2136_vm7, %v2024_v55, %v2248_v52  ;;  %v1914_v51 = vmul.f32 %v7401_v6, %v8435_v15  ;;  %v8436_v55 = vld [vmem:[#allocation54_spill] sm:$0xff] }
 0x3c1   :  { %v1915_v29 = vmul.f32 %v8436_v55, %v7401_v6 }
 0x3c2   :  { %5876 = vmatmul.mubr.msk.f32.gmra.mrb[2].mxu0 %vm72_vm1, %v2350_v39  ;;  %v2249_v39 = vmul.f32 0.2, %v2025_v34  ;;  %v2034_v30 = vadd.f32 %v7415_v59, %v1914_v51 }
 0x3c3   :  { %5878 = vmatprep.mubr.msk.f32.mxu0 %vm6295_vm0, %v8384_v54  ;;  %v2035_v23 = vadd.f32 %v7415_v59, %v1915_v29 }
 0x3c4   :  { %v2361_v5 = vsel %vm2137_vm8, %v2025_v34, %v2249_v39  ;;  %v2258_v34 = vmul.f32 0.2, %v2034_v30  ;;  %vm2146_vm3 = vcmp.ge.f32.partialorder %v2034_v30, 0.0 }
 0x3c5   :  { %v2259_v14 = vmul.f32 0.2, %v2035_v23  ;;  %vm2147_vm4 = vcmp.ge.f32.partialorder %v2035_v23, 0.0 }
 0x3c6   :  { %5879 = vmatmul.mubr.msk.f32.gmra.mrb[4].mxu0 %vm72_vm1, %v2351_v7  ;;  %v2250_v7 = vmul.f32 0.2, %v2026_v33 }
 0x3c7   :  { %5881 = vmatprep.mubr.msk.f32.mxu0 %vm6295_vm0, %v8384_v54  ;;  %v2371_v2 = vsel %vm2147_vm4, %v2035_v23, %v2259_v14 }
 0x3c8   :  { %v2362_v38 = vsel %vm2138_vm9, %v2026_v33, %v2250_v7  ;;  %v2370_v33 = vsel %vm2146_vm3, %v2034_v30, %v2258_v34  ;;  %v8446_v30 = vld [vmem:[#allocation64_spill] sm:$0xff]  ;;  %vm4450_vm3 = vcmask 261120  }
 0x3c9   :  { %v1925_v55 = vmul.f32 %v8446_v30, %v7401_v6 }
 0x3ca   :  { %5882 = vmatmul.mubr.msk.f32.gmra.mrb[6].mxu0 %vm72_vm1, %v2352_v35  ;;  %v2413_v35 = vld [vmem:[%s8305_s3 + $0xe8] sm:$0xff] }
 0x3cb   :  { %5884 = vmatprep.mubr.msk.f32.mxu0 %vm6295_vm0, %v8384_v54  ;;  %v6060_v50 = vpack.c.bf16 %v2413_v35, %v2412_v22  ;;  %v8439_v22 = vld [vmem:[#allocation59_spill] sm:$0xff] }
 0x3cc   :  { %v1918_v35 = vmul.f32 %v7401_v6, %v8439_v22 }
 0x3ce   :  { %5885 = vmatmul.mubr.msk.f32.gmra.mrb[8].mxu0 %vm72_vm1, %v2353_v21  ;;  %v1909_v21 = vmul.f32 %v8430_v8, %v7401_v6  ;;  %v2038_v40 = vadd.f32 %v7415_v59, %v1918_v35  ;;  %v8440_v8 = vld [vmem:[#allocation58_spill] sm:$0xff] }
 0x3cf   :  { %5887 = vmatprep.mubr.msk.f32.mxu0 %vm6295_vm0, %v8384_v54 }
 0x3d0   :  { %v2029_v45 = vadd.f32 %v7415_v59, %v1909_v21  ;;  %v1919_v21 = vmul.f32 %v8440_v8, %v7401_v6  ;;  %vm2150_vm7 = vcmp.ge.f32.partialorder %v2038_v40, 0.0 }
 0x3d2   :  { %5888 = vmatmul.mubr.msk.f32.gmra.mrb[10].mxu0 %vm72_vm1, %v2354_v12  ;;  %v8431_v12 = vld [vmem:[#allocation51_spill] sm:$0xff]  ;;  %v2253_v41 = vmul.f32 0.2, %v2029_v45  ;;  %vm2141_vm12 = vcmp.ge.f32.partialorder %v2029_v45, 0.0  ;;  %v2039_v0 = vadd.f32 %v7415_v59, %v1919_v21 }
 0x3d3   :  { %5890 = vmatprep.mubr.msk.f32.mxu0 %vm6295_vm0, %v8384_v54  ;;  %v1910_v62 = vmul.f32 %v7401_v6, %v8431_v12 }
 0x3d4   :  { %vm2151_vm8 = vcmp.ge.f32.partialorder %v2039_v0, 0.0 }
 0x3d5   :  { %v2030_v11 = vadd.f32 %v7415_v59, %v1910_v62 }
 0x3d6   :  { %5891 = vmatmul.mubr.msk.f32.gmra.mrb[12].mxu0 %vm72_vm1, %v2355_v58  ;;  %v2365_v58 = vsel %vm2141_vm12, %v2029_v45, %v2253_v41  ;;  %v8441_v45 = vld [vmem:[#allocation61_spill] sm:$0xff] }
 0x3d7   :  { %5897 = vmatprep.mubr.msk.f32.mxu0 %vm6295_vm0, %v8384_v54  ;;  %v2254_v46 = vmul.f32 0.2, %v2030_v11  ;;  %vm2142_vm13 = vcmp.ge.f32.partialorder %v2030_v11, 0.0  ;;  %v1920_v12 = vmul.f32 %v7401_v6, %v8441_v45 }
 0x3d9   :  { %v2040_v41 = vadd.f32 %v7415_v59, %v1920_v12 }
 0x3da   :  { %5898 = vmatmul.mubr.msk.f32.vlgmr.msra.gmra.mrb[0].mxu0 %vm72_vm1, %v2356_v24  ;;  %v2255_v24 = vmul.f32 0.2, %v2031_v61 }
 0x3db   :  { %5900 = vmatprep.mubr.msk.f32.mxu0 %vm6295_vm0, %v8384_v54  ;;  %6058 = vmatpush3.bf16.msra.mxu0 %v6057_v43  ;;  %v2366_v43 = vsel %vm2142_vm13, %v2030_v11, %v2254_v46  ;;  %v8442_v11 = vld [vmem:[#allocation60_spill] sm:$0xff]  ;;  %vm2152_vm9 = vcmp.ge.f32.partialorder %v2040_v41, 0.0 }
 0x3dc   :  { %6059 = vmatprep.subr.bf16.mxu0 %v8348_v60  ;;  %v2367_v53 = vsel %vm2143_vm14, %v2031_v61, %v2255_v24  ;;  %v1921_v32 = vmul.f32 %v8442_v11, %v7401_v6  ;;  %v8443_v61 = vld [vmem:[#allocation63_spill] sm:$0xff] }
 0x3dd   :  { %v1922_v16 = vmul.f32 %v7401_v6, %v8443_v61 }
 0x3de   :  { %5901 = vmatmul.mubr.msk.f32.gmra.mrb[2].mxu0 %vm72_vm1, %v2357_v48  ;;  %v2256_v48 = vmul.f32 0.2, %v2032_v28  ;;  %v2041_v46 = vadd.f32 %v7415_v59, %v1921_v32 }
 0x3df   :  { %5903 = vmatprep.mubr.msk.f32.mxu0 %vm6295_vm0, %v8384_v54  ;;  %v2042_v24 = vadd.f32 %v7415_v59, %v1922_v16 }
 0x3e0   :  { %v2368_v31 = vsel %vm2144_vm15, %v2032_v28, %v2256_v48  ;;  %vm2153_vm10 = vcmp.ge.f32.partialorder %v2041_v46, 0.0  ;;  %v8444_v28 = vld [vmem:[#allocation62_spill] sm:$0xff] }
 0x3e1   :  { %v1923_v3 = vmul.f32 %v8444_v28, %v7401_v6  ;;  %vm2154_vm11 = vcmp.ge.f32.partialorder %v2042_v24, 0.0 }
 0x3e2   :  { %5904 = vmatmul.mubr.msk.f32.gmra.mrb[4].mxu0 %vm72_vm1, %v2358_v47  ;;  %v2257_v47 = vmul.f32 0.2, %v2033_v27 }
 0x3e3   :  { %5906 = vmatprep.mubr.msk.f32.mxu0 %vm6295_vm0, %v8384_v54  ;;  %v2043_v48 = vadd.f32 %v7415_v59, %v1923_v3 }
 0x3e4   :  { %v2369_v52 = vsel %vm2145_vm2, %v2033_v27, %v2257_v47  ;;  %v8445_v27 = vld [vmem:[#allocation65_spill] sm:$0xff] }
 0x3e5   :  { %v1924_v15 = vmul.f32 %v7401_v6, %v8445_v27  ;;  %vm2155_vm12 = vcmp.ge.f32.partialorder %v2043_v48, 0.0 }
 0x3e6   :  { %5907 = vmatmul.mubr.msk.f32.gmra.mrb[6].mxu0 %vm72_vm1, %v2359_v4  ;;  %v2415_v4 = vld [vmem:[%s8305_s3 + $0xf8] sm:$0xff]  ;;  %s6300_s3 = smov 32  }
 0x3e7   :  { %5909 = vmatprep.mubr.msk.f32.mxu0 %vm6295_vm0, %v8384_v54  ;;  %v6063_v39 = vpack.c.bf16 %v2415_v4, %v2414_v10  ;;  %v2044_v47 = vadd.f32 %v7415_v59, %v1924_v15  ;;  %v2045_v4 = vadd.f32 %v7415_v59, %v1925_v55 }
 0x3e9   :  { %v2268_v10 = vmul.f32 0.2, %v2044_v47  ;;  %vm2156_vm13 = vcmp.ge.f32.partialorder %v2044_v47, 0.0  ;;  %vm2157_vm14 = vcmp.ge.f32.partialorder %v2045_v4, 0.0 }
 0x3ea   :  { %5910 = vmatmul.mubr.msk.f32.gmra.mrb[8].mxu0 %vm72_vm1, %v2360_v1  ;;  %v1916_v1 = vmul.f32 %v7401_v6, %v8437_v13  ;;  %v2269_v13 = vmul.f32 0.2, %v2045_v4 }
 0x3eb   :  { %5912 = vmatprep.mubr.msk.f32.mxu0 %vm6295_vm0, %v8384_v54  ;;  %v2380_v23 = vsel %vm2156_vm13, %v2044_v47, %v2268_v10 }
 0x3ec   :  { %v2036_v20 = vadd.f32 %v7415_v59, %v1916_v1  ;;  %v2381_v14 = vsel %vm2157_vm14, %v2045_v4, %v2269_v13 }
 0x3ee   :  { %5913 = vmatmul.mubr.msk.f32.gmra.mrb[10].mxu0 %vm72_vm1, %v2361_v5  ;;  %v8438_v5 = vld [vmem:[#allocation56_spill] sm:$0xff]  ;;  %v2260_v19 = vmul.f32 0.2, %v2036_v20  ;;  %vm2148_vm5 = vcmp.ge.f32.partialorder %v2036_v20, 0.0 }
 0x3ef   :  { %5915 = vmatprep.mubr.msk.f32.mxu0 %vm6295_vm0, %v8384_v54  ;;  %v1917_v7 = vmul.f32 %v8438_v5, %v7401_v6 }
 0x3f1   :  { %v2037_v9 = vadd.f32 %v7415_v59, %v1917_v7 }
 0x3f2   :  { %5916 = vmatmul.mubr.msk.f32.gmra.mrb[12].mxu0 %vm72_vm1, %v2362_v38  ;;  %v2372_v38 = vsel %vm2148_vm5, %v2036_v20, %v2260_v19 }
 0x3f3   :  { %5922 = vmatprep.mubr.msk.f32.mxu0 %vm6295_vm0, %v8384_v54  ;;  %v2261_v49 = vmul.f32 0.2, %v2037_v9  ;;  %vm2149_vm6 = vcmp.ge.f32.partialorder %v2037_v9, 0.0 }
 0x3f6   :  { %5923 = vmatmul.mubr.msk.f32.vlgmr.msra.gmra.mrb[0].mxu0 %vm72_vm1, %v2363_v37  ;;  %v2262_v37 = vmul.f32 0.2, %v2038_v40 }
 0x3f7   :  { %5925 = vmatprep.mubr.msk.f32.mxu0 %vm6295_vm0, %v8384_v54  ;;  %6061 = vmatpush3.bf16.msra.mxu0 %v6060_v50  ;;  %v2373_v50 = vsel %vm2149_vm6, %v2037_v9, %v2261_v49 }
 0x3f8   :  { %6062 = vmatprep.subr.bf16.mxu0 %v8348_v60  ;;  %v2374_v62 = vsel %vm2150_vm7, %v2038_v40, %v2262_v37 }
 0x3fa   :  { %5926 = vmatmul.mubr.msk.f32.gmra.mrb[2].mxu0 %vm72_vm1, %v2364_v26  ;;  %v2263_v26 = vmul.f32 0.2, %v2039_v0 }
 0x3fb   :  { %5928 = vmatprep.mubr.msk.f32.mxu0 %vm6295_vm0, %v8384_v54 }
 0x3fc   :  { %v2375_v25 = vsel %vm2151_vm8, %v2039_v0, %v2263_v26 }
 0x3fe   :  { %5929 = vmatmul.mubr.msk.f32.gmra.mrb[4].mxu0 %vm72_vm1, %v2365_v58  ;;  %v2264_v58 = vmul.f32 0.2, %v2040_v41 }
 0x3ff   :  { %5931 = vmatprep.mubr.msk.f32.mxu0 %vm6295_vm0, %v8384_v54 }
 0x400   :  { %v2376_v63 = vsel %vm2152_vm9, %v2040_v41, %v2264_v58 }
 0x402   :  { %5932 = vmatmul.mubr.msk.f32.gmra.mrb[6].mxu0 %vm72_vm1, %v2366_v43  ;;  %v2265_v43 = vmul.f32 0.2, %v2041_v46 }
 0x403   :  { %5934 = vmatprep.mubr.msk.f32.mxu0 %vm6295_vm0, %v8384_v54 }
 0x404   :  { %v2377_v57 = vsel %vm2153_vm10, %v2041_v46, %v2265_v43  ;;  %vm4614_vm10 = vcmask 1041408  }
 0x406   :  { %5935 = vmatmul.mubr.msk.f32.gmra.mrb[8].mxu0 %vm72_vm1, %v2367_v53  ;;  %v2266_v53 = vmul.f32 0.2, %v2042_v24 }
 0x407   :  { %5937 = vmatprep.mubr.msk.f32.mxu0 %vm6295_vm0, %v8384_v54 }
 0x408   :  { %v2378_v51 = vsel %vm2154_vm11, %v2042_v24, %v2266_v53  ;;  %vm4610_vm11 = vcmask 408576  }
 0x40a   :  { %5938 = vmatmul.mubr.msk.f32.gmra.mrb[10].mxu0 %vm72_vm1, %v2368_v31  ;;  %v2267_v31 = vmul.f32 0.2, %v2043_v48 }
 0x40b   :  { %5940 = vmatprep.mubr.msk.f32.mxu0 %vm6295_vm0, %v8384_v54 }
 0x40c   :  { %v2379_v29 = vsel %vm2155_vm12, %v2043_v48, %v2267_v31  ;;  %vm4702_vm12 = vcmask 1024  }
 0x40e   :  { %5941 = vmatmul.mubr.msk.f32.gmra.mrb[12].mxu0 %vm72_vm1, %v2369_v52  ;;  %v8447_v52 = vld [vmem:[#allocation67_spill] sm:$0xff] }
 0x40f   :  { %5947 = vmatprep.mubr.msk.f32.mxu0 %vm6295_vm0, %v8384_v54  ;;  %v1926_v34 = vmul.f32 %v7401_v6, %v8447_v52 }
 0x411   :  { %v2046_v1 = vadd.f32 %v7415_v59, %v1926_v34 }
 0x412   :  { %5948 = vmatmul.mubr.msk.f32.vlgmr.msra.gmra.mrb[0].mxu0 %vm72_vm1, %v2370_v33 }
 0x413   :  { %5950 = vmatprep.mubr.msk.f32.mxu0 %vm6295_vm0, %v8384_v54  ;;  %6064 = vmatpush3.bf16.msra.mxu0 %v6063_v39  ;;  %v8448_v39 = vld [vmem:[#allocation66_spill] sm:$0xff]  ;;  %v2270_v20 = vmul.f32 0.2, %v2046_v1  ;;  %vm2158_vm15 = vcmp.ge.f32.partialorder %v2046_v1, 0.0 }
 0x414   :  { %v1927_v33 = vmul.f32 %v8448_v39, %v7401_v6 }
 0x415   :  { %v2382_v7 = vsel %vm2158_vm15, %v2046_v1, %v2270_v20 }
 0x416   :  { %5951 = vmatmul.mubr.msk.f32.gmra.mrb[2].mxu0 %vm72_vm1, %v2371_v2  ;;  %v2047_v5 = vadd.f32 %v7415_v59, %v1927_v33 }
 0x417   :  { %5953 = vmatprep.mubr.msk.f32.mxu0 %vm6295_vm0, %v8384_v54 }
 0x418   :  { %v2271_v2 = vmul.f32 0.2, %v2047_v5  ;;  %vm2159_vm2 = vcmp.ge.f32.partialorder %v2047_v5, 0.0 }
 0x41a   :  { %5954 = vmatmul.mubr.msk.f32.gmra.mrb[4].mxu0 %vm72_vm1, %v2372_v38  ;;  %v2383_v6 = vsel %vm2159_vm2, %v2047_v5, %v2271_v2 }
 0x41b   :  { %5956 = vmatprep.mubr.msk.f32.mxu0 %vm6295_vm0, %v8384_v54 }
 0x41e   :  { %5957 = vmatmul.mubr.msk.f32.gmra.mrb[6].mxu0 %vm72_vm1, %v2373_v50 }
 0x41f   :  { %5959 = vmatprep.mubr.msk.f32.mxu0 %vm6295_vm0, %v8384_v54 }
 0x422   :  { %5960 = vmatmul.mubr.msk.f32.gmra.mrb[8].mxu0 %vm72_vm1, %v2374_v62 }
 0x423   :  { %5962 = vmatprep.mubr.msk.f32.mxu0 %vm6295_vm0, %v8384_v54 }
 0x426   :  { %5963 = vmatmul.mubr.msk.f32.gmra.mrb[10].mxu0 %vm72_vm1, %v2375_v25 }
 0x427   :  { %5965 = vmatprep.mubr.msk.f32.mxu0 %vm6295_vm0, %v8384_v54 }
 0x42a   :  { %5966 = vmatmul.mubr.msk.f32.gmra.mrb[12].mxu0 %vm72_vm1, %v2376_v63 }
 0x42b   :  { %5972 = vmatprep.mubr.msk.f32.mxu0 %vm6295_vm0, %v8384_v54 }
 0x42e   :  { %5973 = vmatmul.mubr.msk.f32.vlgmr.msra.gmra.mrb[0].mxu0 %vm72_vm1, %v2377_v57 }
 0x42f   :  { %5975 = vmatprep.mubr.msk.f32.mxu0 %vm6295_vm0, %v8384_v54 }
 0x432   :  { %5976 = vmatmul.mubr.msk.f32.gmra.mrb[2].mxu0 %vm72_vm1, %v2378_v51 }
 0x433   :  { %5978 = vmatprep.mubr.msk.f32.mxu0 %vm6295_vm0, %v8384_v54 }
 0x436   :  { %5979 = vmatmul.mubr.msk.f32.gmra.mrb[4].mxu0 %vm72_vm1, %v2379_v29 }
 0x437   :  { %5981 = vmatprep.mubr.msk.f32.mxu0 %vm6295_vm0, %v8384_v54 }
 0x43a   :  { %5982 = vmatmul.mubr.msk.f32.gmra.mrb[6].mxu0 %vm72_vm1, %v2380_v23 }
 0x43b   :  { %5984 = vmatprep.mubr.msk.f32.mxu0 %vm6295_vm0, %v8384_v54 }
 0x43e   :  { %5985 = vmatmul.mubr.msk.f32.gmra.mrb[8].mxu0 %vm72_vm1, %v2381_v14 }
 0x43f   :  { %5987 = vmatprep.mubr.msk.f32.mxu0 %vm6295_vm0, %v8384_v54 }
 0x442   :  { %5988 = vmatmul.mubr.msk.f32.gmra.mrb[10].mxu0 %vm72_vm1, %v2382_v7 }
 0x443   :  { %5990 = vmatprep.mubr.msk.f32.mxu0 %vm6295_vm0, %v8384_v54  ;;  %vm4462_vm0 = vcmask 254976  }
 0x446   :  { %5991 = vmatmul.mubr.msk.f32.gmra.mrb[12].mxu0 %vm72_vm1, %v2383_v6 }
 0x501   :  { %v8191_v19 = vpop.f32.mrb[0].mxu0 }
 0x502   :  { %v5974_v59 = vpop.f32.mrb[1].mxu0  ;;  %v4473_v0 = vmul.f32 %v8191_v19, %v8191_v19  ;;  %v4451_v45 = vsel %vm4450_vm3, %v8191_v19, 0.0 }
 0x504   :  { %v4480_v25 = vsel %vm4450_vm3, %v4473_v0, 0.0 }
 0x505   :  { %v4414_v9 = vpop.f32.mrb[2].mxu0 }
 0x506   :  { %v8194_v22 = vadd.f32 %v4414_v9, %v7824_v18  ;;  %v5977_v35 = vpop.f32.mrb[3].mxu0 }
 0x508   :  { %v4474_v21 = vmul.f32 %v8194_v22, %v8194_v22  ;;  %v4452_v18 = vsel %vm4450_vm3, %v8194_v22, 0.0 }
 0x509   :  { %v4419_v38 = vpop.f32.mrb[4].mxu0  ;;  %v4453_v32 = vadd.f32 %v4452_v18, %v4451_v45 }
 0x50a   :  { %v8197_v49 = vadd.f32 %v4419_v38, %v7832_v17  ;;  %v5980_v40 = vpop.f32.mrb[5].mxu0  ;;  %v4481_v62 = vsel %vm4450_vm3, %v4474_v21, 0.0 }
 0x50b   :  { %v4482_v16 = vadd.f32 %v4481_v62, %v4480_v25 }
 0x50c   :  { %v4475_v17 = vmul.f32 %v8197_v49, %v8197_v49 }
 0x50d   :  { %v4424_v8 = vpop.f32.mrb[6].mxu0 }
 0x50e   :  { %v8202_v50 = vadd.f32 %v4424_v8, %v7840_v36  ;;  %v5983_v37 = vpop.f32.mrb[7].mxu0  ;;  %v4454_v36 = vsel %vm4450_vm3, %v8197_v49, 0.0  ;;  %v4483_v58 = vsel %vm4450_vm3, %v4475_v17, 0.0  ;;  %v8449_v17 = vld [vmem:[#allocation2_spill] sm:$0xff] }
 0x50f   :  { %v4455_v63 = vadd.f32 %v4454_v36, %v4453_v32  ;;  %v4484_v57 = vadd.f32 %v4483_v58, %v4482_v16  ;;  %v8252_v36 = vld [vmem:[%s8304_s6] sm:$0x1] }
 0x510   :  { %v4476_v26 = vmul.f32 %v8202_v50, %v8202_v50  ;;  %v4456_v46 = vsel %vm4450_vm3, %v8202_v50, 0.0 }
 0x511   :  { %v4429_v12 = vpop.f32.mrb[8].mxu0  ;;  %v4457_v53 = vadd.f32 %v4456_v46, %v4455_v63 }
 0x512   :  { %v8218_v41 = vadd.f32 %v4429_v12, %v7848_v44  ;;  %v5986_v11 = vpop.f32.mrb[9].mxu0  ;;  %v4485_v24 = vsel %vm4450_vm3, %v4476_v26, 0.0 }
 0x513   :  { %v4486_v51 = vadd.f32 %v4485_v24, %v4484_v57  ;;  %v8450_v11 = vld [vmem:[#allocation36_spill] sm:$0xff] }
 0x514   :  { %v4477_v61 = vmul.f32 %v8218_v41, %v8218_v41  ;;  %v4458_v44 = vsel %vm4450_vm3, %v8218_v41, 0.0 }
 0x515   :  { %v4434_v43 = vpop.f32.mrb[10].mxu0  ;;  %v4459_v31 = vadd.f32 %v4458_v44, %v4457_v53 }
 0x516   :  { %v8230_v28 = vadd.f32 %v4434_v43, %v7862_v42  ;;  %v5989_v3 = vpop.f32.mrb[11].mxu0  ;;  %v4487_v48 = vsel %vm4450_vm3, %v4477_v61, 0.0 }
 0x517   :  { %v4488_v29 = vadd.f32 %v4487_v48, %v4486_v51 }
 0x518   :  { %v4460_v27 = vsel %vm4450_vm3, %v8230_v28, 0.0  ;;  %v4478_v15 = vmul.f32 %v8230_v28, %v8230_v28 }
 0x519   :  { %v4439_v47 = vpop.f32.mrb[12].mxu0  ;;  %v4461_v10 = vadd.f32 %v4460_v27, %v4459_v31 }
 0x51a   :  { %v4489_v30 = vsel %vm4450_vm3, %v4478_v15, 0.0  ;;  %v8239_v42 = vadd.f32 %v4439_v47, %v7870_v56  ;;  %v5992_v55 = vpop.f32.mrb[13].mxu0  ;;  %v4596_v47 = vld [vmem:[%s8306_s4] sm:$0xff] }
 0x51b   :  { %v4490_v34 = vadd.f32 %v4489_v30, %v4488_v29 }
 0x51c   :  { %v4463_v4 = vsel %vm4462_vm0, %v8239_v42, 0.0  ;;  %v4479_v52 = vmul.f32 %v8239_v42, %v8239_v42 }
 0x51d   :  { %v4464_v23 = vadd.f32 %v4463_v4, %v4461_v10  ;;  %v4598_v4 = vld [vmem:[%s8306_s4 + $0x10] sm:$0xff] }
 0x51e   :  { %v4491_v13 = vsel %vm4462_vm0, %v4479_v52, 0.0  ;;  %v4599_v52 = vld [vmem:[%s8306_s4 + $0x18] sm:$0xff] }
 0x51f   :  { %v4465_v1 = vrot.slane %v4464_v23, 4  ;;  %v4492_v39 = vadd.f32 %v4491_v13, %v4490_v34 }
 0x521   :  { %v4466_v33 = vadd.f32 %v4465_v1, %v4464_v23  ;;  %v4493_v14 = vrot.slane %v4492_v39, 4 }
 0x523   :  { %v4467_v20 = vrot.slane %v4466_v33, 2  ;;  %v4494_v56 = vadd.f32 %v4493_v14, %v4492_v39 }
 0x525   :  { %v4468_v5 = vadd.f32 %v4467_v20, %v4466_v33  ;;  %v4495_v7 = vrot.slane %v4494_v56, 2 }
 0x527   :  { %v4469_v2 = vrot.slane %v4468_v5, 1  ;;  %v4496_v6 = vadd.f32 %v4495_v7, %v4494_v56 }
 0x529   :  { %v4470_v59 = vadd.f32 %v4469_v2, %v4468_v5  ;;  %v4497_v9 = vrot.slane %v4496_v6, 1 }
 0x52b   :  { %v4472_v35 = vmul.f32 0.02, %v4470_v59  ;;  %v4498_v38 = vadd.f32 %v4497_v9, %v4496_v6  ;;  %v4600_v59 = vld [vmem:[%s8306_s4 + $0x20] sm:$0xff]  ;;  %v4601_v9 = vld [vmem:[%s8306_s4 + $0x28] sm:$0xff] }
 0x52d   :  { %v4499_v40 = vmul.f32 0.02, %v4498_v38  ;;  %v4500_v8 = vmul.f32 %v4472_v35, %v4472_v35 }
 0x52f   :  { %v4501_v21 = vsub.f32 %v4499_v40, %v4500_v8 }
 0x531   :  { %v4502_v37 = vmax.f32 %v4501_v21, 0.0 }
 0x533   :  { %v4503_v0 = vadd.f32 1e-05, %v4502_v37  ;;  %v4602_v37 = vld [vmem:[%s8306_s4 + $0x30] sm:$0x3] }
 0x535   :  { %6291 = vrsqrt.f32 %v4503_v0 }
 0x53f   :  { %v6292_v18 = vpop.eup %6291 }
 0x540   :  { %v4512_v45 = vrot.slane %v6292_v18, %v8449_v17  ;;  %v4595_v18 = vld [vmem:[%s8307_s5] sm:$0x3] }
 0x542   :  { %v4519_v12 = vrot.slane %v4512_v45, %v8449_v17 }
 0x544   :  { %4520 = vrot.lane.b32.xlu1 %v4519_v12, %s6300_s3  ;;  %v4695_v12 = vrot.slane %v8252_v36, %v8450_v11 }
 0x5b6   :  { %v4521_v62 = vpop.permute.xlu1 %4520 }
 0x5b7   :  { %v4523_v26 = vmul.f32 %v8252_v36, %v4521_v62 }
 0x5b9   :  { %v4528_v32 = vrot.slane %v4523_v26, %v8450_v11 }
 0x5bb   :  { %4529 = vrot.lane.b32.xlu1 %v4528_v32, %s6301_s9 }
 0x62d   :  { %v4530_v25 = vpop.permute.xlu1 %4529 }
 0x62e   :  { %v4532_v58 = vmul.f32 %v4530_v25, %v4472_v35  ;;  %v4552_v24 = vmul.f32 %v4530_v25, %v8191_v19  ;;  %v4553_v44 = vmul.f32 %v8194_v22, %v4530_v25  ;;  %v4554_v3 = vmul.f32 %v8197_v49, %v4530_v25  ;;  %v4597_v19 = vld [vmem:[%s8306_s4 + $0x8] sm:$0xff] }
 0x62f   :  { %v4555_v53 = vmul.f32 %v8202_v50, %v4530_v25  ;;  %v4556_v48 = vmul.f32 %v8218_v41, %v4530_v25  ;;  %v4557_v27 = vmul.f32 %v8230_v28, %v4530_v25  ;;  %v4558_v39 = vmul.f32 %v8239_v42, %v4530_v25 }
 0x630   :  { %v4540_v46 = vrot.slane %v4532_v58, %v8449_v17 }
 0x632   :  { %v4547_v61 = vrot.slane %v4540_v46, %v8449_v17 }
 0x634   :  { %4548 = vrot.lane.b32.xlu0 %v4547_v61, %s6302_s10 }
 0x6a6   :  { %v4549_v16 = vpop.permute.xlu0 %4548 }
 0x6a7   :  { %v4551_v63 = vsub.f32 %v8252_v36, %v4549_v16 }
 0x6a9   :  { %v4563_v43 = vrot.slane %v4551_v63, %v8450_v11 }
 0x6ab   :  { %4564 = vrot.lane.b32.xlu1 %v4563_v43, %s6302_s10 }
 0x71d   :  { %v4565_v57 = vpop.permute.xlu1 %4564 }
 0x71e   :  { %v4567_v15 = vadd.f32 %v4565_v57, %v4552_v24  ;;  %v4568_v51 = vadd.f32 %v4565_v57, %v4553_v44  ;;  %v4569_v31 = vadd.f32 %v4565_v57, %v4554_v3  ;;  %v4570_v22 = vadd.f32 %v4565_v57, %v4555_v53 }
 0x71f   :  { %v4571_v49 = vadd.f32 %v4565_v57, %v4556_v48  ;;  %v4572_v30 = vadd.f32 %v4565_v57, %v4557_v27  ;;  %v4573_v7 = vadd.f32 %v4565_v57, %v4558_v39 }
 0x720   :  { %vm4574_vm1 = vcmp.ge.f32.partialorder %v4567_v15, 0.0  ;;  %vm4575_vm4 = vcmp.ge.f32.partialorder %v4568_v51, 0.0  ;;  %v4581_v50 = vmul.f32 0.2, %v4567_v15  ;;  %v4582_v41 = vmul.f32 0.2, %v4568_v51 }
 0x721   :  { %vm4576_vm5 = vcmp.ge.f32.partialorder %v4569_v31, 0.0  ;;  %vm4577_vm6 = vcmp.ge.f32.partialorder %v4570_v22, 0.0  ;;  %v4583_v28 = vmul.f32 0.2, %v4569_v31  ;;  %v4584_v55 = vmul.f32 0.2, %v4570_v22 }
 0x722   :  { %v4588_v29 = vsel %vm4574_vm1, %v4567_v15, %v4581_v50  ;;  %v4589_v10 = vsel %vm4575_vm4, %v4568_v51, %v4582_v41  ;;  %vm4578_vm7 = vcmp.ge.f32.partialorder %v4571_v49, 0.0  ;;  %vm4579_vm8 = vcmp.ge.f32.partialorder %v4572_v30, 0.0 }
 0x723   :  { %v4603_v34 = vmul.f32 %v4596_v47, %v4588_v29  ;;  %v4604_v23 = vmul.f32 %v4597_v19, %v4589_v10  ;;  %v4590_v13 = vsel %vm4576_vm5, %v4569_v31, %v4583_v28  ;;  %v4591_v1 = vsel %vm4577_vm6, %v4570_v22, %v4584_v55 }
 0x724   :  { %v4585_v33 = vmul.f32 0.2, %v4571_v49  ;;  %v4586_v14 = vmul.f32 0.2, %v4572_v30  ;;  %v4605_v56 = vmul.f32 %v4598_v4, %v4590_v13  ;;  %v4606_v5 = vmul.f32 %v4599_v52, %v4591_v1 }
 0x725   :  { %v6066_v20 = vpack.c.bf16 %v4604_v23, %v4603_v34  ;;  %v4587_v40 = vmul.f32 0.2, %v4573_v7  ;;  %vm4580_vm9 = vcmp.ge.f32.partialorder %v4573_v7, 0.0 }
 0x726   :  { %v4592_v2 = vsel %vm4578_vm7, %v4571_v49, %v4585_v33  ;;  %v4593_v6 = vsel %vm4579_vm8, %v4572_v30, %v4586_v14  ;;  %v6069_v42 = vpack.c.bf16 %v4606_v5, %v4605_v56 }
 0x727   :  { %6067 = vmatpush3.bf16.msra.mxu1 %v6066_v20  ;;  %v4607_v35 = vmul.f32 %v4600_v59, %v4592_v2  ;;  %v4608_v38 = vmul.f32 %v4601_v9, %v4593_v6  ;;  %v4594_v21 = vsel %vm4580_vm9, %v4573_v7, %v4587_v40 }
 0x728   :  { %6068 = vmatprep.subr.bf16.mxu1 %v8348_v60  ;;  %v4609_v0 = vmul.f32 %v4602_v37, %v4594_v21 }
 0x729   :  { %v6072_v8 = vpack.c.bf16 %v4608_v38, %v4607_v35 }
 0x72b   :  { %6070 = vmatpush3.bf16.msra.mxu1 %v6069_v42 }
 0x72c   :  { %6071 = vmatprep.subr.bf16.mxu1 %v8348_v60 }
 0x72f   :  { %6073 = vmatpush3.bf16.msra.mxu1 %v6072_v8 }
 0x730   :  { %6005 = vmatprep.subr.mxu1 %v8384_v54 }
 0x733   :  { %6006 = vmatpush3.msk.msra.mxu1 %vm4614_vm10, %v4609_v0 }
 0x734   :  { %6008 = vmatmul.mubr.msk.f32.vlgmr.msra.gmra.mrb[210].mxu1 %vm4610_vm11, %v4595_v18 }
 0x807   :  { %v4684_v17 = vpop.f32.mrb[210].mxu1 }
 0x808   :  { %v6009_v60 = vpop.f32.mrb[211].mxu1  ;;  %v4688_v45 = vsel %vm4462_vm0, %v4684_v17, 0.0 }
 0x809   :  { %4689 = vadd.xlane.f32.xlu0 %v4688_v45 }
 0x896   :  { %v4690_v62 = vpop.xlane.xlu0 %4689 }
 0x897   :  { %v4697_v26 = vadd.f32 %v4695_v12, %v4690_v62 }
 0x899   :  { %4699 = vrot.lane.b32.xlu1 %v4697_v26, %s6300_s3 }
 0x90b   :  { %v4700_v54 = vpop.permute.xlu1 %4699 }
 0x90c   :  { %4703 = vst.msk [vmem:[%s8308_s7] sm:$0x3] %vm4702_vm12, %v4700_v54 }

</bundles_post_ra>
